<compile_context>
chip_gen: v5e
topology: v5e:2x2
jax: 0.10.0
libtpu: 0.0.40
codegen_flags: <defaults>
</compile_context>

<pallas_src>
import numpy as np
import jax
import jax.numpy as jnp
from jax.experimental import pallas as pl
from jax.experimental.pallas import tpu as pltpu

N_OBJ = 6      # objects per state description
D_TAB = 10     # per-object input features
D_QST = 11     # question features
D_OBJ = 100    # fc_in output per object
D_G   = 256    # g / f hidden width
D_PAD = 128    # lane-padded width for the tiny feature dims / logit slab
N_CLS = 10
NEG   = -1e9   # bias for padded logit columns (exp underflows to 0 in f32)


def rn_kernel(tabs_ref, qst_ref,
              w_in1, b_in1, w_in2, b_in2,
              wa, wb, wq, bg1,
              wg2, bg2, wg3, bg3, wg4, bg4,
              wf_, bf_, wo2, bo2, wo3, bo3,
              out_ref):
    n = N_OBJ
    tb = qst_ref.shape[0]                       # batch tile (multiple of 8)

    relu = lambda v: jnp.maximum(v, 0.0)

    def mm(a, w_ref):
        # bf16 operands on the MXU, f32 accumulation.
        return jnp.dot(a.astype(jnp.bfloat16), w_ref[...],
                       preferred_element_type=jnp.float32)

    # ---- fc_in on all 6*tb objects at once; rows are object-major: o*tb + b ----
    x = tabs_ref[...].reshape(n * tb, D_PAD)            # (6*tb, 128) f32
    h = relu(mm(x, w_in1) + b_in1[...])                 # (6*tb, 256)
    h = relu(mm(h, w_in2) + b_in2[...])                 # (6*tb, 128)

    # ---- g_fc1 split along the concat axis (fc_in.fc3 folded into wa/wb) ----
    # pair vector for (b, i, j) = [x[b,j] | x[b,i] | qst[b]]
    A = mm(h, wa)                                       # (6*tb, 256): object j path
    B = mm(h, wb)                                       # (6*tb, 256): object i path
    Q = mm(qst_ref[...], wq)                            # (tb, 256):  question path

    # pre[(i*6 + j)*tb + b] = A[j*tb + b] + B[i*tb + b] + Q[b] + bg1
    A_rep = jnp.concatenate([A] * n, axis=0)                                # (36*tb, 256)
    B_rep = jnp.concatenate(
        [jnp.broadcast_to(B[o * tb:(o + 1) * tb][None],
                          (n, tb, D_G)).reshape(n * tb, D_G)
         for o in range(n)], axis=0)                                        # (36*tb, 256)
    Q_rep = jnp.broadcast_to(Q[None], (n * n, tb, D_G)).reshape(n * n * tb, D_G)

    g = relu(A_rep + B_rep + Q_rep + bg1[...])          # g_fc1 + ReLU
    g = relu(mm(g, wg2) + bg2[...])
    g = relu(mm(g, wg3) + bg3[...])
    g = relu(mm(g, wg4) + bg4[...])                     # (36*tb, 256)

    # sum over the 36 ordered pairs of each batch element
    xg = jnp.sum(g.reshape(n * n, tb, D_G), axis=0)     # (tb, 256)

    # ---- f MLP + output head ----
    xf = relu(mm(xg, wf_) + bf_[...])
    y = relu(mm(xf, wo2) + bo2[...])
    # TODO(synk): F.dropout(p=0.5) treated as identity (inference behaviour).
    logits = mm(y, wo3) + bo3[...]                      # (tb, 128); cols >= 10 biased to -1e9

    # log_softmax (padded columns contribute exactly 0 to the denominator)
    m = jnp.max(logits, axis=1, keepdims=True)
    z = logits - m
    out_ref[...] = z - jnp.log(jnp.sum(jnp.exp(z), axis=1, keepdims=True))


def make_params(key):
    def lin(k, fi, fo):
        kw, kb = jax.random.split(k)
        bound = 1.0 / np.sqrt(fi)
        w = jax.random.uniform(kw, (fi, fo), jnp.float32, -bound, bound)
        b = jax.random.uniform(kb, (1, fo), jnp.float32, -bound, bound)
        return w, b

    keys = jax.random.split(key, 10)
    p = {}
    p["w_in1"], p["b_in1"] = lin(keys[0], D_TAB, 256)
    p["w_in2"], p["b_in2"] = lin(keys[1], 256, 128)
    p["w_in3"], p["b_in3"] = lin(keys[2], 128, D_OBJ)
    p["wg1"], p["bg1"] = lin(keys[3], 2 * D_OBJ + D_QST, D_G)
    p["wg2"], p["bg2"] = lin(keys[4], D_G, D_G)
    p["wg3"], p["bg3"] = lin(keys[5], D_G, D_G)
    p["wg4"], p["bg4"] = lin(keys[6], D_G, D_G)
    p["wf"], p["bf"] = lin(keys[7], D_G, D_G)
    p["wo2"], p["bo2"] = lin(keys[8], D_G, D_G)
    p["wo3"], p["bo3"] = lin(keys[9], D_G, N_CLS)
    return p


def prepare_kernel_params(p):
    """One-time host-side prep: fold fc_in.fc3 into the g_fc1 row slices, pad the
    tiny lane dims to 128, cast matmul weights to bf16 (biases stay f32)."""
    f32 = np.float32

    w_in1 = np.zeros((D_PAD, 256), f32)
    w_in1[:D_TAB] = np.asarray(p["w_in1"], f32)

    w_in3 = np.asarray(p["w_in3"], f32)
    b_in3 = np.asarray(p["b_in3"], f32)
    wg1 = np.asarray(p["wg1"], f32)
    wg1a, wg1b, wg1q = wg1[:D_OBJ], wg1[D_OBJ:2 * D_OBJ], wg1[2 * D_OBJ:]

    wa = w_in3 @ wg1a                       # (128, 256)
    wb = w_in3 @ wg1b                       # (128, 256)
    wq = np.zeros((D_PAD, D_G), f32)
    wq[:D_QST] = wg1q
    bg1 = np.asarray(p["bg1"], f32) + b_in3 @ wg1a + b_in3 @ wg1b

    wo3 = np.zeros((D_G, D_PAD), f32)
    wo3[:, :N_CLS] = np.asarray(p["wo3"], f32)
    bo3 = np.full((1, D_PAD), NEG, f32)
    bo3[:, :N_CLS] = np.asarray(p["bo3"], f32)

    bf16, jf32 = jnp.bfloat16, jnp.float32
    return {
        "w_in1": jnp.asarray(w_in1, bf16), "b_in1": jnp.asarray(p["b_in1"], jf32),
        "w_in2": jnp.asarray(p["w_in2"], bf16), "b_in2": jnp.asarray(p["b_in2"], jf32),
        "wa": jnp.asarray(wa, bf16), "wb": jnp.asarray(wb, bf16),
        "wq": jnp.asarray(wq, bf16), "bg1": jnp.asarray(bg1, jf32),
        "wg2": jnp.asarray(p["wg2"], bf16), "bg2": jnp.asarray(p["bg2"], jf32),
        "wg3": jnp.asarray(p["wg3"], bf16), "bg3": jnp.asarray(p["bg3"], jf32),
        "wg4": jnp.asarray(p["wg4"], bf16), "bg4": jnp.asarray(p["bg4"], jf32),
        "wf": jnp.asarray(p["wf"], bf16), "bf": jnp.asarray(p["bf"], jf32),
        "wo2": jnp.asarray(p["wo2"], bf16), "bo2": jnp.asarray(p["bo2"], jf32),
        "wo3": jnp.asarray(wo3, bf16), "bo3": jnp.asarray(bo3, jf32),
    }


def rn_forward(tabs, qst, kparams, tb=None):
    mb = tabs.shape[0]
    if tb is None:
        # "biggest tile that fits": ~20 MB of activations at tb=64, safe for v7x 64 MiB.
        tb = 64 if mb >= 64 else -(-mb // 8) * 8
    assert tb % 8 == 0, "batch tile must be a multiple of 8 (sublane alignment)"
    mb_p = -(-mb // tb) * tb

    # Object-major layout (6, mb_p, 128) so a batch tile is one contiguous block.
    tabs3 = jnp.transpose(tabs, (1, 0, 2))
    tabs3 = jnp.pad(tabs3, ((0, 0), (0, mb_p - mb), (0, D_PAD - D_TAB)))
    qst_p = jnp.pad(qst, ((0, mb_p - mb), (0, D_PAD - D_QST)))

    names = ["w_in1", "b_in1", "w_in2", "b_in2", "wa", "wb", "wq", "bg1",
             "wg2", "bg2", "wg3", "bg3", "wg4", "bg4", "wf", "bf",
             "wo2", "bo2", "wo3", "bo3"]
    weights = [kparams[k] for k in names]

    grid = (mb_p // tb,)
    in_specs = ([pl.BlockSpec((N_OBJ, tb, D_PAD), lambda i: (0, i, 0)),
                 pl.BlockSpec((tb, D_PAD), lambda i: (i, 0))]
                # weights/biases: full blocks, constant index -> stay VMEM-resident
                + [pl.BlockSpec(w.shape, lambda i: (0, 0)) for w in weights])

    out = pl.pallas_call(
        rn_kernel,
        out_shape=jax.ShapeDtypeStruct((mb_p, D_PAD), jnp.float32),
        grid=grid,
        in_specs=in_specs,
        out_specs=pl.BlockSpec((tb, D_PAD), lambda i: (i, 0)),
        compiler_params=pltpu.CompilerParams(
            dimension_semantics=("parallel",),
            vmem_limit_bytes=48 * 1024 * 1024),
    )(tabs3, qst_p, *weights)

    return out[:mb, :N_CLS]


def rn_reference(tabs, qst, p):
    """Pure-JAX f32 mirror of the PyTorch forward (independent of the kernel path)."""
    relu = lambda v: jnp.maximum(v, 0.0)
    x = relu(tabs @ p["w_in1"] + p["b_in1"])
    x = relu(x @ p["w_in2"] + p["b_in2"])
    x = x @ p["w_in3"] + p["b_in3"]                                  # (mb, 6, 100)
    mb = x.shape[0]
    q = jnp.broadcast_to(qst[:, None, None, :], (mb, N_OBJ, 1, D_QST))
    x_i = jnp.broadcast_to(x[:, None, :, :], (mb, N_OBJ, N_OBJ, D_OBJ))
    x_j = jnp.concatenate([x[:, :, None, :], q], axis=3)
    x_j = jnp.broadcast_to(x_j, (mb, N_OBJ, N_OBJ, D_OBJ + D_QST))
    full = jnp.concatenate([x_i, x_j], axis=3).reshape(mb * N_OBJ * N_OBJ,
                                                       2 * D_OBJ + D_QST)
    h = relu(full @ p["wg1"] + p["bg1"])
    h = relu(h @ p["wg2"] + p["bg2"])
    h = relu(h @ p["wg3"] + p["bg3"])
    h = relu(h @ p["wg4"] + p["bg4"])
    xg = h.reshape(mb, N_OBJ * N_OBJ, D_G).sum(axis=1)
    xf = relu(xg @ p["wf"] + p["bf"])
    y = relu(xf @ p["wo2"] + p["bo2"])
    logits = y @ p["wo3"] + p["bo3"]
    return jax.nn.log_softmax(logits, axis=1)


if __name__ == "__main__":
    key = jax.random.PRNGKey(0)
    kparams_key, kt, kq = jax.random.split(key, 3)
    params = make_params(kparams_key)
    kernel_params = prepare_kernel_params(params)   # one-time prep, reused across calls

    mb = 16
    tabs = jax.random.normal(kt, (mb, N_OBJ, D_TAB), jnp.float32)
    qst = jax.random.normal(kq, (mb, D_QST), jnp.float32)

    out = rn_forward(tabs, qst, kernel_params, tb=8)   # grid=(2,): exercises batch tiling
    out = jax.block_until_ready(out)

    ref = rn_reference(tabs, qst, params)
    # bf16 MXU operands (f32 accumulate) vs f32 reference -> slightly looser tolerance.
    np.testing.assert_allclose(np.asarray(out), np.asarray(ref), rtol=2e-2, atol=2e-2)
    assert out.shape == (mb, N_CLS)
    print("KERNEL_OK")
</pallas_src>

<mosaic_0001>
module attributes {stable_mosaic.version = 11 : i64} {
  func.func @rn_kernel(%arg0: i32, %arg1: memref<6x8x128xf32, #tpu.memory_space<vmem>>, %arg2: memref<8x128xf32, #tpu.memory_space<vmem>>, %arg3: memref<128x256xbf16, #tpu.memory_space<vmem>>, %arg4: memref<1x256xf32, #tpu.memory_space<vmem>>, %arg5: memref<256x128xbf16, #tpu.memory_space<vmem>>, %arg6: memref<1x128xf32, #tpu.memory_space<vmem>>, %arg7: memref<128x256xbf16, #tpu.memory_space<vmem>>, %arg8: memref<128x256xbf16, #tpu.memory_space<vmem>>, %arg9: memref<128x256xbf16, #tpu.memory_space<vmem>>, %arg10: memref<1x256xf32, #tpu.memory_space<vmem>>, %arg11: memref<256x256xbf16, #tpu.memory_space<vmem>>, %arg12: memref<1x256xf32, #tpu.memory_space<vmem>>, %arg13: memref<256x256xbf16, #tpu.memory_space<vmem>>, %arg14: memref<1x256xf32, #tpu.memory_space<vmem>>, %arg15: memref<256x256xbf16, #tpu.memory_space<vmem>>, %arg16: memref<1x256xf32, #tpu.memory_space<vmem>>, %arg17: memref<256x256xbf16, #tpu.memory_space<vmem>>, %arg18: memref<1x256xf32, #tpu.memory_space<vmem>>, %arg19: memref<256x256xbf16, #tpu.memory_space<vmem>>, %arg20: memref<1x256xf32, #tpu.memory_space<vmem>>, %arg21: memref<256x128xbf16, #tpu.memory_space<vmem>>, %arg22: memref<1x128xf32, #tpu.memory_space<vmem>>, %arg23: memref<8x128xf32, #tpu.memory_space<vmem>>) attributes {dimension_semantics = [#tpu.dimension_semantics<parallel>], iteration_bounds = array<i64: 2>, scalar_prefetch = 0 : i64, scratch_operands = 0 : i64, tpu.core_type = #tpu.core_type<tc>, window_params = [{transform_indices = @transform_0, window_bounds = array<i64: 6, 8, 128>}, {transform_indices = @transform_1, window_bounds = array<i64: 8, 128>}, {pipeline_mode = #tpu.pipeline_mode<synchronous>, transform_indices = @transform_2, window_bounds = array<i64: 128, 256>}, {pipeline_mode = #tpu.pipeline_mode<synchronous>, transform_indices = @transform_3, window_bounds = array<i64: 1, 256>}, {pipeline_mode = #tpu.pipeline_mode<synchronous>, transform_indices = @transform_4, window_bounds = array<i64: 256, 128>}, {pipeline_mode = #tpu.pipeline_mode<synchronous>, transform_indices = @transform_5, window_bounds = array<i64: 1, 128>}, {pipeline_mode = #tpu.pipeline_mode<synchronous>, transform_indices = @transform_6, window_bounds = array<i64: 128, 256>}, {pipeline_mode = #tpu.pipeline_mode<synchronous>, transform_indices = @transform_7, window_bounds = array<i64: 128, 256>}, {pipeline_mode = #tpu.pipeline_mode<synchronous>, transform_indices = @transform_8, window_bounds = array<i64: 128, 256>}, {pipeline_mode = #tpu.pipeline_mode<synchronous>, transform_indices = @transform_9, window_bounds = array<i64: 1, 256>}, {pipeline_mode = #tpu.pipeline_mode<synchronous>, transform_indices = @transform_10, window_bounds = array<i64: 256, 256>}, {pipeline_mode = #tpu.pipeline_mode<synchronous>, transform_indices = @transform_11, window_bounds = array<i64: 1, 256>}, {pipeline_mode = #tpu.pipeline_mode<synchronous>, transform_indices = @transform_12, window_bounds = array<i64: 256, 256>}, {pipeline_mode = #tpu.pipeline_mode<synchronous>, transform_indices = @transform_13, window_bounds = array<i64: 1, 256>}, {pipeline_mode = #tpu.pipeline_mode<synchronous>, transform_indices = @transform_14, window_bounds = array<i64: 256, 256>}, {pipeline_mode = #tpu.pipeline_mode<synchronous>, transform_indices = @transform_15, window_bounds = array<i64: 1, 256>}, {pipeline_mode = #tpu.pipeline_mode<synchronous>, transform_indices = @transform_16, window_bounds = array<i64: 256, 256>}, {pipeline_mode = #tpu.pipeline_mode<synchronous>, transform_indices = @transform_17, window_bounds = array<i64: 1, 256>}, {pipeline_mode = #tpu.pipeline_mode<synchronous>, transform_indices = @transform_18, window_bounds = array<i64: 256, 256>}, {pipeline_mode = #tpu.pipeline_mode<synchronous>, transform_indices = @transform_19, window_bounds = array<i64: 1, 256>}, {pipeline_mode = #tpu.pipeline_mode<synchronous>, transform_indices = @transform_20, window_bounds = array<i64: 256, 128>}, {pipeline_mode = #tpu.pipeline_mode<synchronous>, transform_indices = @transform_21, window_bounds = array<i64: 1, 128>}, {transform_indices = @transform_22, window_bounds = array<i64: 8, 128>}]} {
    %c0 = arith.constant 0 : index
    %c0_0 = arith.constant 0 : index
    %c0_1 = arith.constant 0 : index
    %0 = vector.load %arg1[%c0, %c0_0, %c0_1] : memref<6x8x128xf32, #tpu.memory_space<vmem>>, vector<6x8x128xf32>
    %1 = vector.shape_cast %0 : vector<6x8x128xf32> to vector<48x128xf32>
    %2 = arith.truncf %1 : vector<48x128xf32> to vector<48x128xbf16>
    %c0_2 = arith.constant 0 : index
    %c0_3 = arith.constant 0 : index
    %3 = vector.load %arg3[%c0_2, %c0_3] : memref<128x256xbf16, #tpu.memory_space<vmem>>, vector<128x256xbf16>
    %cst = arith.constant dense<0.000000e+00> : vector<48x256xf32>
    %4 = tpu.matmul %2, %3, %cst {dimension_numbers = #tpu.dot_dimension_numbers<[1], [0], [0], [1], [0, 0, 1, 1], [], []>} : vector<48x128xbf16>, vector<128x256xbf16>, vector<48x256xf32> -> vector<48x256xf32>
    %c0_4 = arith.constant 0 : index
    %c0_5 = arith.constant 0 : index
    %5 = vector.load %arg4[%c0_4, %c0_5] : memref<1x256xf32, #tpu.memory_space<vmem>>, vector<1x256xf32>
    %6 = vector.broadcast %5 : vector<1x256xf32> to vector<48x256xf32>
    %7 = arith.addf %4, %6 : vector<48x256xf32>
    %cst_6 = arith.constant 0.000000e+00 : f32
    %8 = vector.broadcast %cst_6 : f32 to vector<48x256xf32>
    %9 = arith.maximumf %7, %8 : vector<48x256xf32>
    %10 = arith.truncf %9 : vector<48x256xf32> to vector<48x256xbf16>
    %c0_7 = arith.constant 0 : index
    %c0_8 = arith.constant 0 : index
    %11 = vector.load %arg5[%c0_7, %c0_8] : memref<256x128xbf16, #tpu.memory_space<vmem>>, vector<256x128xbf16>
    %cst_9 = arith.constant dense<0.000000e+00> : vector<48x128xf32>
    %12 = tpu.matmul %10, %11, %cst_9 {dimension_numbers = #tpu.dot_dimension_numbers<[1], [0], [0], [1], [0, 0, 1, 1], [], []>} : vector<48x256xbf16>, vector<256x128xbf16>, vector<48x128xf32> -> vector<48x128xf32>
    %c0_10 = arith.constant 0 : index
    %c0_11 = arith.constant 0 : index
    %13 = vector.load %arg6[%c0_10, %c0_11] : memref<1x128xf32, #tpu.memory_space<vmem>>, vector<1x128xf32>
    %14 = vector.broadcast %13 : vector<1x128xf32> to vector<48x128xf32>
    %15 = arith.addf %12, %14 : vector<48x128xf32>
    %cst_12 = arith.constant 0.000000e+00 : f32
    %16 = vector.broadcast %cst_12 : f32 to vector<48x128xf32>
    %17 = arith.maximumf %15, %16 : vector<48x128xf32>
    %18 = arith.truncf %17 : vector<48x128xf32> to vector<48x128xbf16>
    %c0_13 = arith.constant 0 : index
    %c0_14 = arith.constant 0 : index
    %19 = vector.load %arg7[%c0_13, %c0_14] : memref<128x256xbf16, #tpu.memory_space<vmem>>, vector<128x256xbf16>
    %cst_15 = arith.constant dense<0.000000e+00> : vector<48x256xf32>
    %20 = tpu.matmul %18, %19, %cst_15 {dimension_numbers = #tpu.dot_dimension_numbers<[1], [0], [0], [1], [0, 0, 1, 1], [], []>} : vector<48x128xbf16>, vector<128x256xbf16>, vector<48x256xf32> -> vector<48x256xf32>
    %21 = arith.truncf %17 : vector<48x128xf32> to vector<48x128xbf16>
    %c0_16 = arith.constant 0 : index
    %c0_17 = arith.constant 0 : index
    %22 = vector.load %arg8[%c0_16, %c0_17] : memref<128x256xbf16, #tpu.memory_space<vmem>>, vector<128x256xbf16>
    %cst_18 = arith.constant dense<0.000000e+00> : vector<48x256xf32>
    %23 = tpu.matmul %21, %22, %cst_18 {dimension_numbers = #tpu.dot_dimension_numbers<[1], [0], [0], [1], [0, 0, 1, 1], [], []>} : vector<48x128xbf16>, vector<128x256xbf16>, vector<48x256xf32> -> vector<48x256xf32>
    %c0_19 = arith.constant 0 : index
    %c0_20 = arith.constant 0 : index
    %24 = vector.load %arg2[%c0_19, %c0_20] : memref<8x128xf32, #tpu.memory_space<vmem>>, vector<8x128xf32>
    %25 = arith.truncf %24 : vector<8x128xf32> to vector<8x128xbf16>
    %c0_21 = arith.constant 0 : index
    %c0_22 = arith.constant 0 : index
    %26 = vector.load %arg9[%c0_21, %c0_22] : memref<128x256xbf16, #tpu.memory_space<vmem>>, vector<128x256xbf16>
    %cst_23 = arith.constant dense<0.000000e+00> : vector<8x256xf32>
    %27 = tpu.matmul %25, %26, %cst_23 {dimension_numbers = #tpu.dot_dimension_numbers<[1], [0], [0], [1], [0, 0, 1, 1], [], []>} : vector<8x128xbf16>, vector<128x256xbf16>, vector<8x256xf32> -> vector<8x256xf32>
    %28 = tpu.concatenate %20, %20, %20, %20, %20, %20 in 0 : vector<48x256xf32>, vector<48x256xf32>, vector<48x256xf32>, vector<48x256xf32>, vector<48x256xf32>, vector<48x256xf32> -> vector<288x256xf32>
    %29 = vector.extract_strided_slice %23 {offsets = [0, 0], sizes = [8, 256], strides = [1, 1]} : vector<48x256xf32> to vector<8x256xf32>
    %30 = vector.shape_cast %29 : vector<8x256xf32> to vector<1x8x256xf32>
    %31 = vector.shape_cast %30 : vector<1x8x256xf32> to vector<1x8x256xf32>
    %32 = vector.broadcast %31 : vector<1x8x256xf32> to vector<6x8x256xf32>
    %33 = vector.shape_cast %32 : vector<6x8x256xf32> to vector<48x256xf32>
    %34 = vector.extract_strided_slice %23 {offsets = [8, 0], sizes = [8, 256], strides = [1, 1]} : vector<48x256xf32> to vector<8x256xf32>
    %35 = vector.shape_cast %34 : vector<8x256xf32> to vector<1x8x256xf32>
    %36 = vector.shape_cast %35 : vector<1x8x256xf32> to vector<1x8x256xf32>
    %37 = vector.broadcast %36 : vector<1x8x256xf32> to vector<6x8x256xf32>
    %38 = vector.shape_cast %37 : vector<6x8x256xf32> to vector<48x256xf32>
    %39 = vector.extract_strided_slice %23 {offsets = [16, 0], sizes = [8, 256], strides = [1, 1]} : vector<48x256xf32> to vector<8x256xf32>
    %40 = vector.shape_cast %39 : vector<8x256xf32> to vector<1x8x256xf32>
    %41 = vector.shape_cast %40 : vector<1x8x256xf32> to vector<1x8x256xf32>
    %42 = vector.broadcast %41 : vector<1x8x256xf32> to vector<6x8x256xf32>
    %43 = vector.shape_cast %42 : vector<6x8x256xf32> to vector<48x256xf32>
    %44 = vector.extract_strided_slice %23 {offsets = [24, 0], sizes = [8, 256], strides = [1, 1]} : vector<48x256xf32> to vector<8x256xf32>
    %45 = vector.shape_cast %44 : vector<8x256xf32> to vector<1x8x256xf32>
    %46 = vector.shape_cast %45 : vector<1x8x256xf32> to vector<1x8x256xf32>
    %47 = vector.broadcast %46 : vector<1x8x256xf32> to vector<6x8x256xf32>
    %48 = vector.shape_cast %47 : vector<6x8x256xf32> to vector<48x256xf32>
    %49 = vector.extract_strided_slice %23 {offsets = [32, 0], sizes = [8, 256], strides = [1, 1]} : vector<48x256xf32> to vector<8x256xf32>
    %50 = vector.shape_cast %49 : vector<8x256xf32> to vector<1x8x256xf32>
    %51 = vector.shape_cast %50 : vector<1x8x256xf32> to vector<1x8x256xf32>
    %52 = vector.broadcast %51 : vector<1x8x256xf32> to vector<6x8x256xf32>
    %53 = vector.shape_cast %52 : vector<6x8x256xf32> to vector<48x256xf32>
    %54 = vector.extract_strided_slice %23 {offsets = [40, 0], sizes = [8, 256], strides = [1, 1]} : vector<48x256xf32> to vector<8x256xf32>
    %55 = vector.shape_cast %54 : vector<8x256xf32> to vector<1x8x256xf32>
    %56 = vector.shape_cast %55 : vector<1x8x256xf32> to vector<1x8x256xf32>
    %57 = vector.broadcast %56 : vector<1x8x256xf32> to vector<6x8x256xf32>
    %58 = vector.shape_cast %57 : vector<6x8x256xf32> to vector<48x256xf32>
    %59 = tpu.concatenate %33, %38, %43, %48, %53, %58 in 0 : vector<48x256xf32>, vector<48x256xf32>, vector<48x256xf32>, vector<48x256xf32>, vector<48x256xf32>, vector<48x256xf32> -> vector<288x256xf32>
    %60 = vector.shape_cast %27 : vector<8x256xf32> to vector<1x8x256xf32>
    %61 = vector.shape_cast %60 : vector<1x8x256xf32> to vector<1x8x256xf32>
    %62 = vector.broadcast %61 : vector<1x8x256xf32> to vector<36x8x256xf32>
    %63 = vector.shape_cast %62 : vector<36x8x256xf32> to vector<288x256xf32>
    %64 = arith.addf %28, %59 : vector<288x256xf32>
    %65 = arith.addf %64, %63 : vector<288x256xf32>
    %c0_24 = arith.constant 0 : index
    %c0_25 = arith.constant 0 : index
    %66 = vector.load %arg10[%c0_24, %c0_25] : memref<1x256xf32, #tpu.memory_space<vmem>>, vector<1x256xf32>
    %67 = vector.broadcast %66 : vector<1x256xf32> to vector<288x256xf32>
    %68 = arith.addf %65, %67 : vector<288x256xf32>
    %cst_26 = arith.constant 0.000000e+00 : f32
    %69 = vector.broadcast %cst_26 : f32 to vector<288x256xf32>
    %70 = arith.maximumf %68, %69 : vector<288x256xf32>
    %71 = arith.truncf %70 : vector<288x256xf32> to vector<288x256xbf16>
    %c0_27 = arith.constant 0 : index
    %c0_28 = arith.constant 0 : index
    %72 = vector.load %arg11[%c0_27, %c0_28] : memref<256x256xbf16, #tpu.memory_space<vmem>>, vector<256x256xbf16>
    %cst_29 = arith.constant dense<0.000000e+00> : vector<288x256xf32>
    %73 = tpu.matmul %71, %72, %cst_29 {dimension_numbers = #tpu.dot_dimension_numbers<[1], [0], [0], [1], [0, 0, 1, 1], [], []>} : vector<288x256xbf16>, vector<256x256xbf16>, vector<288x256xf32> -> vector<288x256xf32>
    %c0_30 = arith.constant 0 : index
    %c0_31 = arith.constant 0 : index
    %74 = vector.load %arg12[%c0_30, %c0_31] : memref<1x256xf32, #tpu.memory_space<vmem>>, vector<1x256xf32>
    %75 = vector.broadcast %74 : vector<1x256xf32> to vector<288x256xf32>
    %76 = arith.addf %73, %75 : vector<288x256xf32>
    %cst_32 = arith.constant 0.000000e+00 : f32
    %77 = vector.broadcast %cst_32 : f32 to vector<288x256xf32>
    %78 = arith.maximumf %76, %77 : vector<288x256xf32>
    %79 = arith.truncf %78 : vector<288x256xf32> to vector<288x256xbf16>
    %c0_33 = arith.constant 0 : index
    %c0_34 = arith.constant 0 : index
    %80 = vector.load %arg13[%c0_33, %c0_34] : memref<256x256xbf16, #tpu.memory_space<vmem>>, vector<256x256xbf16>
    %cst_35 = arith.constant dense<0.000000e+00> : vector<288x256xf32>
    %81 = tpu.matmul %79, %80, %cst_35 {dimension_numbers = #tpu.dot_dimension_numbers<[1], [0], [0], [1], [0, 0, 1, 1], [], []>} : vector<288x256xbf16>, vector<256x256xbf16>, vector<288x256xf32> -> vector<288x256xf32>
    %c0_36 = arith.constant 0 : index
    %c0_37 = arith.constant 0 : index
    %82 = vector.load %arg14[%c0_36, %c0_37] : memref<1x256xf32, #tpu.memory_space<vmem>>, vector<1x256xf32>
    %83 = vector.broadcast %82 : vector<1x256xf32> to vector<288x256xf32>
    %84 = arith.addf %81, %83 : vector<288x256xf32>
    %cst_38 = arith.constant 0.000000e+00 : f32
    %85 = vector.broadcast %cst_38 : f32 to vector<288x256xf32>
    %86 = arith.maximumf %84, %85 : vector<288x256xf32>
    %87 = arith.truncf %86 : vector<288x256xf32> to vector<288x256xbf16>
    %c0_39 = arith.constant 0 : index
    %c0_40 = arith.constant 0 : index
    %88 = vector.load %arg15[%c0_39, %c0_40] : memref<256x256xbf16, #tpu.memory_space<vmem>>, vector<256x256xbf16>
    %cst_41 = arith.constant dense<0.000000e+00> : vector<288x256xf32>
    %89 = tpu.matmul %87, %88, %cst_41 {dimension_numbers = #tpu.dot_dimension_numbers<[1], [0], [0], [1], [0, 0, 1, 1], [], []>} : vector<288x256xbf16>, vector<256x256xbf16>, vector<288x256xf32> -> vector<288x256xf32>
    %c0_42 = arith.constant 0 : index
    %c0_43 = arith.constant 0 : index
    %90 = vector.load %arg16[%c0_42, %c0_43] : memref<1x256xf32, #tpu.memory_space<vmem>>, vector<1x256xf32>
    %91 = vector.broadcast %90 : vector<1x256xf32> to vector<288x256xf32>
    %92 = arith.addf %89, %91 : vector<288x256xf32>
    %cst_44 = arith.constant 0.000000e+00 : f32
    %93 = vector.broadcast %cst_44 : f32 to vector<288x256xf32>
    %94 = arith.maximumf %92, %93 : vector<288x256xf32>
    %95 = vector.shape_cast %94 : vector<288x256xf32> to vector<36x8x256xf32>
    %cst_45 = arith.constant dense<0.000000e+00> : vector<8x256xf32>
    %96 = vector.multi_reduction <add>, %95, %cst_45 [0] : vector<36x8x256xf32> to vector<8x256xf32>
    %97 = arith.truncf %96 : vector<8x256xf32> to vector<8x256xbf16>
    %c0_46 = arith.constant 0 : index
    %c0_47 = arith.constant 0 : index
    %98 = vector.load %arg17[%c0_46, %c0_47] : memref<256x256xbf16, #tpu.memory_space<vmem>>, vector<256x256xbf16>
    %cst_48 = arith.constant dense<0.000000e+00> : vector<8x256xf32>
    %99 = tpu.matmul %97, %98, %cst_48 {dimension_numbers = #tpu.dot_dimension_numbers<[1], [0], [0], [1], [0, 0, 1, 1], [], []>} : vector<8x256xbf16>, vector<256x256xbf16>, vector<8x256xf32> -> vector<8x256xf32>
    %c0_49 = arith.constant 0 : index
    %c0_50 = arith.constant 0 : index
    %100 = vector.load %arg18[%c0_49, %c0_50] : memref<1x256xf32, #tpu.memory_space<vmem>>, vector<1x256xf32>
    %101 = vector.broadcast %100 : vector<1x256xf32> to vector<8x256xf32>
    %102 = arith.addf %99, %101 : vector<8x256xf32>
    %cst_51 = arith.constant 0.000000e+00 : f32
    %103 = vector.broadcast %cst_51 : f32 to vector<8x256xf32>
    %104 = arith.maximumf %102, %103 : vector<8x256xf32>
    %105 = arith.truncf %104 : vector<8x256xf32> to vector<8x256xbf16>
    %c0_52 = arith.constant 0 : index
    %c0_53 = arith.constant 0 : index
    %106 = vector.load %arg19[%c0_52, %c0_53] : memref<256x256xbf16, #tpu.memory_space<vmem>>, vector<256x256xbf16>
    %cst_54 = arith.constant dense<0.000000e+00> : vector<8x256xf32>
    %107 = tpu.matmul %105, %106, %cst_54 {dimension_numbers = #tpu.dot_dimension_numbers<[1], [0], [0], [1], [0, 0, 1, 1], [], []>} : vector<8x256xbf16>, vector<256x256xbf16>, vector<8x256xf32> -> vector<8x256xf32>
    %c0_55 = arith.constant 0 : index
    %c0_56 = arith.constant 0 : index
    %108 = vector.load %arg20[%c0_55, %c0_56] : memref<1x256xf32, #tpu.memory_space<vmem>>, vector<1x256xf32>
    %109 = vector.broadcast %108 : vector<1x256xf32> to vector<8x256xf32>
    %110 = arith.addf %107, %109 : vector<8x256xf32>
    %cst_57 = arith.constant 0.000000e+00 : f32
    %111 = vector.broadcast %cst_57 : f32 to vector<8x256xf32>
    %112 = arith.maximumf %110, %111 : vector<8x256xf32>
    %113 = arith.truncf %112 : vector<8x256xf32> to vector<8x256xbf16>
    %c0_58 = arith.constant 0 : index
    %c0_59 = arith.constant 0 : index
    %114 = vector.load %arg21[%c0_58, %c0_59] : memref<256x128xbf16, #tpu.memory_space<vmem>>, vector<256x128xbf16>
    %cst_60 = arith.constant dense<0.000000e+00> : vector<8x128xf32>
    %115 = tpu.matmul %113, %114, %cst_60 {dimension_numbers = #tpu.dot_dimension_numbers<[1], [0], [0], [1], [0, 0, 1, 1], [], []>} : vector<8x256xbf16>, vector<256x128xbf16>, vector<8x128xf32> -> vector<8x128xf32>
    %c0_61 = arith.constant 0 : index
    %c0_62 = arith.constant 0 : index
    %116 = vector.load %arg22[%c0_61, %c0_62] : memref<1x128xf32, #tpu.memory_space<vmem>>, vector<1x128xf32>
    %117 = vector.broadcast %116 : vector<1x128xf32> to vector<8x128xf32>
    %118 = arith.addf %115, %117 : vector<8x128xf32>
    %cst_63 = arith.constant dense<0xFF800000> : vector<8xf32>
    %119 = vector.multi_reduction <maximumf>, %118, %cst_63 [1] : vector<8x128xf32> to vector<8xf32>
    %120 = vector.shape_cast %119 : vector<8xf32> to vector<8x1xf32>
    %121 = vector.broadcast %120 : vector<8x1xf32> to vector<8x128xf32>
    %122 = arith.subf %118, %121 : vector<8x128xf32>
    %123 = math.exp %122 : vector<8x128xf32>
    %cst_64 = arith.constant dense<0.000000e+00> : vector<8xf32>
    %124 = vector.multi_reduction <add>, %123, %cst_64 [1] : vector<8x128xf32> to vector<8xf32>
    %125 = vector.shape_cast %124 : vector<8xf32> to vector<8x1xf32>
    %126 = math.log %125 : vector<8x1xf32>
    %127 = vector.broadcast %126 : vector<8x1xf32> to vector<8x128xf32>
    %128 = arith.subf %122, %127 : vector<8x128xf32>
    %c0_65 = arith.constant 0 : index
    %c0_66 = arith.constant 0 : index
    %129 = vector.load %arg23[%c0_65, %c0_66] : memref<8x128xf32, #tpu.memory_space<vmem>>, vector<8x128xf32>
    tpu.vector_store %arg23[%c0_65, %c0_66], %128 {strides = array<i32>} : memref<8x128xf32, #tpu.memory_space<vmem>>, vector<8x128xf32>,
    return
  }
  func.func @transform_0(%arg0: i32) -> (i32, i32, i32) {
    %c0_i32 = arith.constant 0 : i32
    %c0_i32_0 = arith.constant 0 : i32
    %c0_i32_1 = arith.constant 0 : i32
    return %c0_i32, %arg0, %c0_i32_0 : i32, i32, i32
  }
  func.func @transform_1(%arg0: i32) -> (i32, i32) {
    %c0_i32 = arith.constant 0 : i32
    %c0_i32_0 = arith.constant 0 : i32
    return %arg0, %c0_i32 : i32, i32
  }
  func.func @transform_2(%arg0: i32) -> (i32, i32) {
    %c0_i32 = arith.constant 0 : i32
    %c0_i32_0 = arith.constant 0 : i32
    %c0_i32_1 = arith.constant 0 : i32
    return %c0_i32, %c0_i32_0 : i32, i32
  }
  func.func @transform_3(%arg0: i32) -> (i32, i32) {
    %c0_i32 = arith.constant 0 : i32
    %c0_i32_0 = arith.constant 0 : i32
    %c0_i32_1 = arith.constant 0 : i32
    return %c0_i32, %c0_i32_0 : i32, i32
  }
  func.func @transform_4(%arg0: i32) -> (i32, i32) {
    %c0_i32 = arith.constant 0 : i32
    %c0_i32_0 = arith.constant 0 : i32
    %c0_i32_1 = arith.constant 0 : i32
    return %c0_i32, %c0_i32_0 : i32, i32
  }
  func.func @transform_5(%arg0: i32) -> (i32, i32) {
    %c0_i32 = arith.constant 0 : i32
    %c0_i32_0 = arith.constant 0 : i32
    %c0_i32_1 = arith.constant 0 : i32
    return %c0_i32, %c0_i32_0 : i32, i32
  }
  func.func @transform_6(%arg0: i32) -> (i32, i32) {
    %c0_i32 = arith.constant 0 : i32
    %c0_i32_0 = arith.constant 0 : i32
    %c0_i32_1 = arith.constant 0 : i32
    return %c0_i32, %c0_i32_0 : i32, i32
  }
  func.func @transform_7(%arg0: i32) -> (i32, i32) {
    %c0_i32 = arith.constant 0 : i32
    %c0_i32_0 = arith.constant 0 : i32
    %c0_i32_1 = arith.constant 0 : i32
    return %c0_i32, %c0_i32_0 : i32, i32
  }
  func.func @transform_8(%arg0: i32) -> (i32, i32) {
    %c0_i32 = arith.constant 0 : i32
    %c0_i32_0 = arith.constant 0 : i32
    %c0_i32_1 = arith.constant 0 : i32
    return %c0_i32, %c0_i32_0 : i32, i32
  }
  func.func @transform_9(%arg0: i32) -> (i32, i32) {
    %c0_i32 = arith.constant 0 : i32
    %c0_i32_0 = arith.constant 0 : i32
    %c0_i32_1 = arith.constant 0 : i32
    return %c0_i32, %c0_i32_0 : i32, i32
  }
  func.func @transform_10(%arg0: i32) -> (i32, i32) {
    %c0_i32 = arith.constant 0 : i32
    %c0_i32_0 = arith.constant 0 : i32
    %c0_i32_1 = arith.constant 0 : i32
    return %c0_i32, %c0_i32_0 : i32, i32
  }
  func.func @transform_11(%arg0: i32) -> (i32, i32) {
    %c0_i32 = arith.constant 0 : i32
    %c0_i32_0 = arith.constant 0 : i32
    %c0_i32_1 = arith.constant 0 : i32
    return %c0_i32, %c0_i32_0 : i32, i32
  }
  func.func @transform_12(%arg0: i32) -> (i32, i32) {
    %c0_i32 = arith.constant 0 : i32
    %c0_i32_0 = arith.constant 0 : i32
    %c0_i32_1 = arith.constant 0 : i32
    return %c0_i32, %c0_i32_0 : i32, i32
  }
  func.func @transform_13(%arg0: i32) -> (i32, i32) {
    %c0_i32 = arith.constant 0 : i32
    %c0_i32_0 = arith.constant 0 : i32
    %c0_i32_1 = arith.constant 0 : i32
    return %c0_i32, %c0_i32_0 : i32, i32
  }
  func.func @transform_14(%arg0: i32) -> (i32, i32) {
    %c0_i32 = arith.constant 0 : i32
    %c0_i32_0 = arith.constant 0 : i32
    %c0_i32_1 = arith.constant 0 : i32
    return %c0_i32, %c0_i32_0 : i32, i32
  }
  func.func @transform_15(%arg0: i32) -> (i32, i32) {
    %c0_i32 = arith.constant 0 : i32
    %c0_i32_0 = arith.constant 0 : i32
    %c0_i32_1 = arith.constant 0 : i32
    return %c0_i32, %c0_i32_0 : i32, i32
  }
  func.func @transform_16(%arg0: i32) -> (i32, i32) {
    %c0_i32 = arith.constant 0 : i32
    %c0_i32_0 = arith.constant 0 : i32
    %c0_i32_1 = arith.constant 0 : i32
    return %c0_i32, %c0_i32_0 : i32, i32
  }
  func.func @transform_17(%arg0: i32) -> (i32, i32) {
    %c0_i32 = arith.constant 0 : i32
    %c0_i32_0 = arith.constant 0 : i32
    %c0_i32_1 = arith.constant 0 : i32
    return %c0_i32, %c0_i32_0 : i32, i32
  }
  func.func @transform_18(%arg0: i32) -> (i32, i32) {
    %c0_i32 = arith.constant 0 : i32
    %c0_i32_0 = arith.constant 0 : i32
    %c0_i32_1 = arith.constant 0 : i32
    return %c0_i32, %c0_i32_0 : i32, i32
  }
  func.func @transform_19(%arg0: i32) -> (i32, i32) {
    %c0_i32 = arith.constant 0 : i32
    %c0_i32_0 = arith.constant 0 : i32
    %c0_i32_1 = arith.constant 0 : i32
    return %c0_i32, %c0_i32_0 : i32, i32
  }
  func.func @transform_20(%arg0: i32) -> (i32, i32) {
    %c0_i32 = arith.constant 0 : i32
    %c0_i32_0 = arith.constant 0 : i32
    %c0_i32_1 = arith.constant 0 : i32
    return %c0_i32, %c0_i32_0 : i32, i32
  }
  func.func @transform_21(%arg0: i32) -> (i32, i32) {
    %c0_i32 = arith.constant 0 : i32
    %c0_i32_0 = arith.constant 0 : i32
    %c0_i32_1 = arith.constant 0 : i32
    return %c0_i32, %c0_i32_0 : i32, i32
  }
  func.func @transform_22(%arg0: i32) -> (i32, i32) {
    %c0_i32 = arith.constant 0 : i32
    %c0_i32_0 = arith.constant 0 : i32
    return %arg0, %c0_i32 : i32, i32
  }
}

</mosaic_0001>

<bundles_post_ra>
// kernel: tpu_custom_call.1
= control target key start
LH: loop header
LB: loop body
LE: loop exit
PB: predicated region body
PF: predicated region fallthrough
CT: control target
= control target key end

     0   :  { %s8900_s0 = inlined_call_operand.hbm [shape: f32[6,16,128], index: 0, kind: input, shape index: {}]   ;;  %s8901_s1 = inlined_call_operand.hbm [shape: f32[16,128], index: 1, kind: input, shape index: {}]   ;;  %s8902_s2 = inlined_call_operand.hbm [shape: bf16[128,256], index: 2, kind: input, shape index: {}]   ;;  %s8903_s3 = inlined_call_operand.vmem [shape: f32[1,256], index: 3, kind: input, shape index: {}]   ;;  %s8904_s4 = inlined_call_operand.hbm [shape: bf16[256,128], index: 4, kind: input, shape index: {}]   ;;  %s8905_s5 = inlined_call_operand.hbm [shape: f32[1,128], index: 5, kind: input, shape index: {}]   ;;  %s8906_s6 = inlined_call_operand.hbm [shape: bf16[128,256], index: 6, kind: input, shape index: {}]   ;;  %s8907_s7 = inlined_call_operand.hbm [shape: bf16[128,256], index: 7, kind: input, shape index: {}]   ;;  %s8908_s8 = inlined_call_operand.hbm [shape: bf16[128,256], index: 8, kind: input, shape index: {}]   ;;  %s8909_s9 = inlined_call_operand.vmem [shape: f32[1,256], index: 9, kind: input, shape index: {}]   ;;  %s8910_s10 = inlined_call_operand.hbm [shape: bf16[256,256], index: 10, kind: input, shape index: {}]   ;;  %s8911_s11 = inlined_call_operand.vmem [shape: f32[1,256], index: 11, kind: input, shape index: {}]   ;;  %s8912_s12 = inlined_call_operand.hbm [shape: bf16[256,256], index: 12, kind: input, shape index: {}]   ;;  %s8913_s13 = inlined_call_operand.vmem [shape: f32[1,256], index: 13, kind: input, shape index: {}]   ;;  %s8914_s14 = inlined_call_operand.hbm [shape: bf16[256,256], index: 14, kind: input, shape index: {}]   ;;  %s8915_s15 = inlined_call_operand.vmem [shape: f32[1,256], index: 15, kind: input, shape index: {}]   ;;  %s8916_s16 = inlined_call_operand.hbm [shape: bf16[256,256], index: 16, kind: input, shape index: {}]   ;;  %s8917_s17 = inlined_call_operand.vmem [shape: f32[1,256], index: 17, kind: input, shape index: {}]   ;;  %s8918_s18 = inlined_call_operand.hbm [shape: bf16[256,256], index: 18, kind: input, shape index: {}]   ;;  %s8919_s19 = inlined_call_operand.vmem [shape: f32[1,256], index: 19, kind: input, shape index: {}]   ;;  %s8920_s20 = inlined_call_operand.hbm [shape: bf16[256,128], index: 20, kind: input, shape index: {}]   ;;  %s8921_s21 = inlined_call_operand.vmem [shape: f32[1,128], index: 21, kind: input, shape index: {}]   ;;  %s8922_s22 = inlined_call_operand.hbm [shape: f32[16,128], index: 22, kind: output, shape index: {}]  }
   0x1   :  { %8932 = sst [smem:[#allocation38_spill]] %s8900_s0 }
   0x2   :  { %8933 = sst [smem:[#allocation39_spill]] %s8901_s1 }
   0x3   :  { %8934 = sst [smem:[#allocation40_spill]] %s8902_s2 }
   0x4   :  { %8935 = sst [smem:[#allocation41_spill]] %s8903_s3 }
   0x5   :  { %8936 = sst [smem:[#allocation42_spill]] %s8904_s4 }
   0x6   :  { %8937 = sst [smem:[#allocation43_spill]] %s8905_s5 }
   0x7   :  { %8938 = sst [smem:[#allocation44_spill]] %s8906_s6 }
   0x8   :  { %8939 = sst [smem:[#allocation45_spill]] %s8907_s7 }
   0x9   :  { %8940 = sst [smem:[#allocation46_spill]] %s8908_s8 }
   0xa   :  { %8941 = sst [smem:[#allocation47_spill]] %s8910_s10 }
   0xb   :  { %8942 = sst [smem:[#allocation48_spill]] %s8911_s11 }
   0xc   :  { %8943 = sst [smem:[#allocation49_spill]] %s8912_s12 }
   0xd   :  { %8944 = sst [smem:[#allocation50_spill]] %s8913_s13 }
   0xe   :  { %8945 = sst [smem:[#allocation51_spill]] %s8914_s14 }
   0xf   :  { %8946 = sst [smem:[#allocation52_spill]] %s8915_s15 }
  0x10   :  { %8947 = sst [smem:[#allocation53_spill]] %s8916_s16 }
  0x11   :  { %8948 = sst [smem:[#allocation54_spill]] %s8917_s17 }
  0x12   :  { %8949 = sst [smem:[#allocation55_spill]] %s8918_s18 }
  0x13   :  { %8950 = sst [smem:[#allocation56_spill]] %s8919_s19 }
  0x14   :  { %8951 = sst [smem:[#allocation57_spill]] %s8920_s20 }
  0x15   :  { %8952 = sst [smem:[#allocation58_spill]] %s8921_s21 }
  0x16   :  { %8953 = sst [smem:[#allocation59_spill]] %s8922_s22 }
  0x17   :  { %27 = vsyncpa [#allocation3], 0 }
  0x18   :  { %29 = vsyncpa [#allocation3 + $0x1], 0 }
  0x19   :  { %30 = vsyncpa [#allocation6], 0 }
  0x1a   :  { %32 = vsyncpa [#allocation6 + $0x1], 0 }
  0x1b   :  { %33 = vsyncpa [#allocation9], 0 }
  0x1c   :  { %34 = vsyncpa [#allocation12], 0 }
  0x1d   :  { %35 = vsyncpa [#allocation15], 0 }
  0x1e   :  { %36 = vsyncpa [#allocation18], 0 }
  0x1f   :  { %37 = vsyncpa [#allocation21], 0 }
  0x20   :  { %38 = vsyncpa [#allocation24], 0 }
  0x21   :  { %39 = vsyncpa [#allocation4], 0 }
  0x22   :  { %41 = vsyncpa [#allocation4 + $0x1], 0  ;;  %s7242_s3 = smov 0   ;;  %s7244_s28 = smov 0  }
  0x23   :  { %s7246_s29 = smov 0   ;;  %s7248_s30 = smov 0  }
  0x24 LB: > { %8954 = sst [smem:[#allocation36_spill]] %s7104_s29  ;;  %s7266_s5 = sadd.s32 4294967295, %s7108_s30   ;;  %s7108_s30 = sphi %s7248_s30, %s8993_s30   ;;  %s7104_s29 = sphi %s7246_s29, %s8990_s29   ;;  %s7100_s28 = sphi %s7244_s28, %s8992_s28   ;;  %s7096_s3 = sphi %s7242_s3, %s8991_s3  }
  0x25   : > { %s8955_s23 = sld [smem:[#allocation40_spill]]  ;;  %p5089_p0 = scmp.ge.s32.totalorder %s7108_s30, 1 }
  0x26   : > { %p68_p1 = scmp.eq.s32.totalorder %s7266_s5, 0  ;;  %p550_p2 = scmp.lt.s32.totalorder %s7108_s30, 3 }
  0x27   : > { %s7110_s6 = smov [#allocation7]   ;;  %s8957_s27 = sld [smem:[#allocation42_spill]] }
  0x28   : > { %p7271_p3 = pnand %p5089_p0, %p550_p2  ;;  %s563_s25 = sshll.u32 %s7110_s6, 4  ;;  %s564_s25 = int_to_ptr.vmem [resolvable:$true] %s563_s25 }
  0x29   : > { %s8928_s6 = smov 128   ;;  %s8929_s21 = smov 8  }
  0x2a   : > { %p6461_p4 = pneg %p7271_p3  ;;  %s8926_s26 = smov 64  }
  0x2b   : > { %s561_s1 = sshll.u32 %s8955_s23, 4  ;;  %s7111_s23 = smov [#allocation8]   ;;  %s562_s1 = int_to_ptr.hbm [resolvable:$true] %s561_s1 }
  0x2c   : > { %p7283_p6 = pnand %p6461_p4, %p68_p1  ;;  %s580_s22 = sshll.u32 %s7111_s23, 4  ;;  %s581_s22 = int_to_ptr.vmem [resolvable:$true] %s580_s22 }
  0x2d   : > { %s578_s4 = sshll.u32 %s8957_s27, 4  ;;  %s8927_s2 = smov 4   ;;  %s579_s4 = int_to_ptr.hbm [resolvable:$true] %s578_s4 }
  0x2e   : > { %6464 = dma.hbm_to_vmem [thread:$0]  (!%p7283_p6), %s562_s1, 2048, %s564_s25, [#allocation6], %s8928_s6, %s8928_s6, %s8929_s21  }
  0x2f   : > { %6467 = dma.hbm_to_vmem [thread:$0]  (!%p7283_p6), %s579_s4, 2048, %s581_s22, [#allocation9], %s8926_s26, %s8926_s26, %s8927_s2  }
  0x30   : > { %s8959_s17 = sld [smem:[#allocation44_spill]]  ;;  %s7116_s15 = smov [#allocation11]  }
  0x31   : > { %s606_s13 = sshll.u32 %s7116_s15, 4  ;;  %s8960_s8 = sld [smem:[#allocation46_spill]]  ;;  %s607_s13 = int_to_ptr.vmem [resolvable:$true] %s606_s13 }
  0x32   : > { %s7117_s22 = smov [#allocation14]   ;;  %s8961_s12 = sld [smem:[#allocation49_spill]] }
  0x33   : > { %s634_s4 = sshll.u32 %s7117_s22, 4  ;;  %s8962_s16 = sld [smem:[#allocation53_spill]]  ;;  %s635_s4 = int_to_ptr.vmem [resolvable:$true] %s634_s4 }
  0x34   : > { %s7119_s26 = smov [#allocation20]   ;;  %s8963_s2 = sld [smem:[#allocation43_spill]] }
  0x35   : > { %s702_s1 = sshll.u32 %s7119_s26, 4  ;;  %s8964_s7 = sld [smem:[#allocation45_spill]]  ;;  %s703_s1 = int_to_ptr.vmem [resolvable:$true] %s702_s1 }
  0x36   : > { %s604_s23 = sshll.u32 %s8959_s17, 4  ;;  %s8965_s10 = sld [smem:[#allocation47_spill]]  ;;  %s605_s23 = int_to_ptr.hbm [resolvable:$true] %s604_s23 }
  0x37   : > { %s632_s25 = sshll.u32 %s8960_s8, 4  ;;  %s8966_s14 = sld [smem:[#allocation51_spill]]  ;;  %s633_s25 = int_to_ptr.hbm [resolvable:$true] %s632_s25 }
  0x38   : > { %6473 = dma.hbm_to_vmem [thread:$0]  (!%p7283_p6), %s605_s23, 2048, %s607_s13, [#allocation12], %s8928_s6, %s8928_s6, %s8929_s21  }
  0x39   : > { %s666_s17 = sshll.u32 %s8961_s12, 4  ;;  %s700_s27 = sshll.u32 %s8962_s16, 4  ;;  %s667_s17 = int_to_ptr.hbm [resolvable:$true] %s666_s17  ;;  %s701_s27 = int_to_ptr.hbm [resolvable:$true] %s700_s27 }
  0x3a   : > { %6479 = dma.hbm_to_vmem [thread:$0]  (!%p7283_p6), %s633_s25, 2048, %s635_s4, [#allocation15], %s8928_s6, %s8928_s6, %s8929_s21  }
  0x3b   : > { %s7118_s13 = smov [#allocation17]   ;;  %s593_s25 = sshll.u32 %s8963_s2, 4  ;;  %s594_s25 = int_to_ptr.hbm [resolvable:$true] %s593_s25 }
  0x3c   : > { %s668_s23 = sshll.u32 %s7118_s13, 4  ;;  %s618_s15 = sshll.u32 %s8964_s7, 4  ;;  %s669_s23 = int_to_ptr.vmem [resolvable:$true] %s668_s23  ;;  %s619_s15 = int_to_ptr.hbm [resolvable:$true] %s618_s15 }
  0x3d   : > { %6485 = dma.hbm_to_vmem [thread:$0]  (!%p7283_p6), %s667_s17, 4096, %s669_s23, [#allocation18], %s8928_s6, %s8928_s6, %s8929_s21  }
  0x3e   : > { %6491 = dma.hbm_to_vmem [thread:$0]  (!%p7283_p6), %s701_s27, 4096, %s703_s1, [#allocation21], %s8928_s6, %s8928_s6, %s8929_s21  }
  0x3f   : > { %s7120_s13 = smov [#allocation10]   ;;  %s7121_s23 = smov [#allocation13]  }
  0x40   : > { %s595_s17 = sshll.u32 %s7120_s13, 4  ;;  %s620_s2 = sshll.u32 %s7121_s23, 4  ;;  %s596_s17 = int_to_ptr.vmem [resolvable:$true] %s595_s17  ;;  %s621_s2 = int_to_ptr.vmem [resolvable:$true] %s620_s2 }
  0x41   : > { %6470 = dma.hbm_to_vmem [thread:$0]  (!%p7283_p6), %s594_s25, 16, %s596_s17, [#allocation9]  }
  0x42   : > { %s649_s19 = sshll.u32 %s8965_s10, 4  ;;  %s683_s4 = sshll.u32 %s8966_s14, 4  ;;  %s650_s19 = int_to_ptr.hbm [resolvable:$true] %s649_s19  ;;  %s684_s4 = int_to_ptr.hbm [resolvable:$true] %s683_s4 }
  0x43   : > { %6476 = dma.hbm_to_vmem [thread:$0]  (!%p7283_p6), %s619_s15, 2048, %s621_s2, [#allocation12], %s8928_s6, %s8928_s6, %s8929_s21  }
  0x44   : > { %s7122_s11 = smov [#allocation16]   ;;  %s7123_s13 = smov [#allocation19]  }
  0x45   : > { %s651_s25 = sshll.u32 %s7122_s11, 4  ;;  %s685_s17 = sshll.u32 %s7123_s13, 4  ;;  %s652_s25 = int_to_ptr.vmem [resolvable:$true] %s651_s25  ;;  %s686_s17 = int_to_ptr.vmem [resolvable:$true] %s685_s17 }
  0x46   : > { %6482 = dma.hbm_to_vmem [thread:$0]  (!%p7283_p6), %s650_s19, 4096, %s652_s25, [#allocation15], %s8928_s6, %s8928_s6, %s8929_s21  }
  0x47   : > { %s8967_s18 = sld [smem:[#allocation55_spill]]  ;;  %s7124_s27 = smov [#allocation22]  }
  0x48   : > { %6488 = dma.hbm_to_vmem [thread:$0]  (!%p7283_p6), %s684_s4, 4096, %s686_s17, [#allocation18], %s8928_s6, %s8928_s6, %s8929_s21  }
  0x49   : > { %s8968_s20 = sld [smem:[#allocation57_spill]]  ;;  %s719_s1 = sshll.u32 %s7124_s27, 4  ;;  %s720_s1 = int_to_ptr.vmem [resolvable:$true] %s719_s1 }
  0x4a   : > { %s7125_s4 = smov [#allocation23]   ;;  %s8969_s25 = smov 4  }
  0x4b   : > { %s736_s11 = sshll.u32 %s7125_s4, 4  ;;  %s8970_s13 = smov 64   ;;  %s737_s11 = int_to_ptr.vmem [resolvable:$true] %s736_s11 }
  0x4c   : > { %s5088_s17 = sadd.s32 4294967294, %s7108_s30   ;;  %s7376_s23 = sadd.s32 1, %s7108_s30  }
  0x4d   : > { %s717_s2 = sshll.u32 %s8967_s18, 4  ;;  %s51_s15 = ssub.s32 %s7108_s30, %s7376_s23  ;;  %s718_s2 = int_to_ptr.hbm [resolvable:$true] %s717_s2 }
  0x4e   : > { %6494 = dma.hbm_to_vmem [thread:$0]  (!%p7283_p6), %s718_s2, 4096, %s720_s1, [#allocation21], %s8928_s6, %s8928_s6, %s8929_s21  }
  0x4f   : > { %s734_s19 = sshll.u32 %s8968_s20, 4  ;;  %s54_s26 = sadd.s32 1, %s7104_s29  ;;  %s735_s19 = int_to_ptr.hbm [resolvable:$true] %s734_s19 }
  0x50   : > { %6497 = dma.hbm_to_vmem [thread:$0]  (!%p7283_p6), %s735_s19, 2048, %s737_s11, [#allocation24], %s8970_s13, %s8970_s13, %s8969_s25  }
  0x51   : > { %p52_p7 = scmp.eq.s32.totalorder %s51_s15, 0  ;;  %p61_p8 = scmp.ne.s32.totalorder %s7104_s29, %s7100_s28 }
  0x52   : > { %p62_p9 = scmp.eq.s32.totalorder %s7108_s30, 0  ;;  %p67_p10 = scmp.ne.s32.totalorder %s7100_s28, %s7096_s3 }
  0x53   : > { %s7387_s2 = scalar_select %p52_p7, %s7104_s29, %s54_s26  }
  0x54   : > { %p63_p11 = por %p62_p9, %p61_p8  ;;  %p7391_p12 = por %p68_p1, %p67_p10 }
  0x55   : > { %8971 = sst [smem:[#allocation37_spill]] %s7387_s2  ;;  %p537_p13 = scmp.eq.s32.totalorder %s7266_s5, 1 }
  0x56   : > { %p543_p0 = scmp.eq.s32.totalorder %s5088_s17, 1  ;;  %p6521_p2 = scmp.lt.s32.totalorder %s7108_s30, 2 }
  0x57   : > { %s7398_s22 = sand.u32 1, %s7104_s29   ;;  %p7400_p4 = por %p537_p13, %p61_p8 }
  0x58   : > { %p7404_p6 = por %p543_p0, %p67_p10  ;;  %s6405_s1 = smul.u32 48, %s7398_s22 }
  0x59   : > { %s5103_s4 = sshll.u32 %s7108_s30, 3  ;;  %p7410_p7 = pnand %p6521_p2, %p63_p11 }
  0x5a   : > { %s8976_s17 = sld [smem:[#allocation38_spill]]  ;;  %s757_s6 = scalar_lea.vmem [#allocation2], %s6405_s1 }
  0x5b   : > { %s764_s21 = sshll.u32 %s757_s6, 4  ;;  %s754_s7 = scalar_lea.sflag [#allocation3], %s7398_s22  ;;  %s765_s21 = int_to_ptr.vmem [resolvable:$true] %s764_s21 }
  0x5c   : > { %p6954_p9 = pneg %p7410_p7 }
  0x60   : > { %s761_s15 = scalar_lea.hbm %s8976_s17, %s5103_s4  ;;  %s6957_s12 = scalar_lea.hbm %s8976_s17, 96 }
  0x61   : > { %s762_s26 = sshll.u32 %s761_s15, 4  ;;  %s763_s26 = int_to_ptr.hbm [resolvable:$true] %s762_s26 }
  0x62   : > { %s6950_s8 = sshra.s32 %s763_s26, 4  ;;  %s6951_s8 = int_to_ptr.hbm [resolvable:$true] %s6950_s8 }
  0x63   : > { %s6952_s10 = scalar_lea.hbm %s6951_s8, 48  ;;  %p6958_p13 = scmp.lt.s32.totalorder %s6951_s8, %s8976_s17 }
  0x64   : > { %p6953_p8 = scmp.ne.s32.totalorder %s6951_s8, %s6952_s10  ;;  %p6959_p0 = scmp.lt.s32.totalorder %s6957_s12, %s6952_s10 }
  0x66   : > { %p6955_p10 = pnand %p6954_p9, %p6953_p8  ;;  %p6960_p2 = por %p6959_p0, %p6958_p13 }
  0x68   : > { %p6956_p11 = pneg %p6955_p10 }
  0x6a   : > { %p6961_p5 = pnand %p6960_p2, %p6956_p11 }
  0x6c   : > { %6964 = shalt.err (!%p6961_p5)
}
  0x6d   : > { %s7126_s6 = smov 256   ;;  %s8977_s14 = smov 8  }
  0x6e   : > { %s8978_s16 = smov 128   ;;  %s774_s18 = sand.u32 1, %s7108_s30  }
  0x6f   : > { %6501 = dma.hbm_to_vmem [thread:$0]  (!%p7410_p7), %s763_s26, 768, %s765_s21, %s754_s7, %s7126_s6, %s8978_s16, %s8977_s14  }
  0x70   : > { %s5104_s25 = sshll.u32 %s7398_s22, 3  ;;  %s8979_s2 = sld [smem:[#allocation39_spill]] }
  0x71   : > { %s778_s8 = scalar_lea.vmem [#allocation5], %s5104_s25  ;;  %s775_s1 = scalar_lea.sflag [#allocation6], %s774_s18 }
  0x72   : > { %s786_s10 = sshll.u32 %s778_s8, 4  ;;  %s787_s10 = int_to_ptr.vmem [resolvable:$true] %s786_s10 }
  0x76   : > { %s782_s15 = scalar_lea.hbm %s8979_s2, %s5103_s4  ;;  %s6987_s16 = scalar_lea.hbm %s8979_s2, 16 }
  0x77   : > { %s784_s12 = sshll.u32 %s782_s15, 4  ;;  %s785_s12 = int_to_ptr.hbm [resolvable:$true] %s784_s12 }
  0x78   : > { %s6980_s17 = sshra.s32 %s785_s12, 4  ;;  %s6981_s17 = int_to_ptr.hbm [resolvable:$true] %s6980_s17 }
  0x79   : > { %s6982_s29 = scalar_lea.hbm %s6981_s17, 8  ;;  %p6988_p11 = scmp.lt.s32.totalorder %s6981_s17, %s8979_s2 }
  0x7a   : > { %p6983_p5 = scmp.ne.s32.totalorder %s6981_s17, %s6982_s29  ;;  %p6989_p13 = scmp.lt.s32.totalorder %s6987_s16, %s6982_s29 }
  0x7c   : > { %p6985_p8 = pnand %p6983_p5, %p6954_p9  ;;  %p6990_p0 = por %p6989_p13, %p6988_p11 }
  0x7e   : > { %p6986_p10 = pneg %p6985_p8 }
  0x80   : > { %p6991_p2 = pnand %p6990_p0, %p6986_p10 }
  0x82   : > { %6994 = shalt.err (!%p6991_p2)
}
  0x83   : > { %6504 = dma.hbm_to_vmem [thread:$0]  (!%p7410_p7), %s785_s12, 128, %s787_s10, %s775_s1  }
  0x84   : > { %795 = sbr.rel (%p7271_p3) target bundleno = 2330 (0x91a), region = 108  ;;  %s7452_s18 = sand.u32 (!%p7271_p3), 1, %s7100_s28  }
  0x85   : > { %s6406_s22 = smul.u32 (!%p7271_p3), 48, %s7452_s18  ;;  %s798_s4 = scalar_lea.sflag (!%p7271_p3), [#allocation3], %s7452_s18 }
  0x87   : > { %s7456_s26 = scalar_lea.vmem (!%p7271_p3), [#allocation2], %s6406_s22 }
  0x89   : > { %7055 = dma.done.wait (%p7391_p12), %s798_s4, 768  }
  0x8a   : > { %7057 = vsyncadd (%p7391_p12), %s798_s4, 4294966528  ;;  %s807_s29 = sand.u32 1, %s7266_s5   ;;  %s5107_s24 = sshll.u32 %s7452_s18, 3 }
  0x8b   : > { %s808_s11 = scalar_lea.sflag [#allocation6], %s807_s29  ;;  %s7466_s17 = scalar_lea.vmem [#allocation5], %s5107_s24 }
  0x8c   : > { %7059 = dma.done.wait (%p7391_p12), %s808_s11, 128  }
  0x8d   : > { %7061 = vsyncadd (%p7391_p12), %s808_s11, 4294967168 }
  0x8e   : > { %7063 = dma.done.wait (%p68_p1), [#allocation6], 2048  }
  0x8f   : > { %7065 = vsyncadd (%p68_p1), [#allocation6], 4294965248 }
  0x90   : > { %7067 = dma.done.wait (%p68_p1), [#allocation9], 2064  }
  0x91   : > { %7069 = vsyncadd (%p68_p1), [#allocation9], 4294965232 }
  0x92   : > { %7071 = dma.done.wait (%p68_p1), [#allocation12], 4096  }
  0x93   : > { %7073 = vsyncadd (%p68_p1), [#allocation12], 4294963200 }
  0x94   : > { %7075 = dma.done.wait (%p68_p1), [#allocation15], 6144  }
  0x95   : > { %7077 = vsyncadd (%p68_p1), [#allocation15], 4294961152 }
  0x96   : > { %7079 = dma.done.wait (%p68_p1), [#allocation18], 8192  }
  0x97   : > { %7081 = vsyncadd (%p68_p1), [#allocation18], 4294959104 }
  0x98   : > { %7083 = dma.done.wait (%p68_p1), [#allocation21], 8192  }
  0x99   : > { %7085 = vsyncadd (%p68_p1), [#allocation21], 4294959104 }
  0x9a   : > { %7087 = dma.done.wait (%p68_p1), [#allocation24], 2048  }
  0x9b   : > { %7089 = vsyncadd (%p68_p1), [#allocation24], 4294965248  ;;  %v5179_v0 = vld [vmem:[#allocation7 + $0x70] sm:$0xf]  ;;  %v6164_v1 = vld [vmem:[#allocation7 + $0x74] sm:$0xf0] }
  0x9c   : > { %v6163_v2 = vld [vmem:[#allocation7 + $0x74] sm:$0xf]  ;;  %v5180_v3 = vor.u32 %v6164_v1, %v5179_v0  ;;  %v5181_v4 = vld [vmem:[#allocation7 + $0x78] sm:$0xf0]  ;;  %v5171_v5 = vld [vmem:[#allocation7 + $0x60] sm:$0xf] }
  0x9d   : > { %v6162_v6 = vld [vmem:[#allocation7 + $0x64] sm:$0xf0]  ;;  %v5184_v7 = vor.u32 %v6163_v2, %v5181_v4  ;;  %v6161_v8 = vld [vmem:[#allocation7 + $0x64] sm:$0xf]  ;;  %v5173_v9 = vld [vmem:[#allocation7 + $0x68] sm:$0xf0] }
  0x9e   : > { %1049 = vmatpush.bf16.msra.mxu0 %v5180_v3  ;;  %v5172_v10 = vor.u32 %v6162_v6, %v5171_v5  ;;  %v5176_v11 = vor.u32 %v6161_v8, %v5173_v9  ;;  %v5163_v12 = vld [vmem:[#allocation7 + $0x50] sm:$0xf]  ;;  %v6160_v13 = vld [vmem:[#allocation7 + $0x54] sm:$0xf0]  ;;  %v6159_v14 = vld [vmem:[#allocation7 + $0x54] sm:$0xf] }
  0x9f   : > { %1073 = vmatpush.bf16.msra.mxu1 %v5184_v7  ;;  %v5165_v15 = vld [vmem:[#allocation7 + $0x58] sm:$0xf0]  ;;  %v5164_v16 = vor.u32 %v6160_v13, %v5163_v12  ;;  %v5155_v18 = vld [vmem:[#allocation7 + $0x40] sm:$0xf]  ;;  %v6158_v19 = vld [vmem:[#allocation7 + $0x44] sm:$0xf0] }
  0xa0   : > { %v5168_v17 = vor.u32 %v6159_v14, %v5165_v15  ;;  %v6157_v20 = vld [vmem:[#allocation7 + $0x44] sm:$0xf]  ;;  %v5157_v21 = vld [vmem:[#allocation7 + $0x48] sm:$0xf0]  ;;  %v5156_v22 = vor.u32 %v6158_v19, %v5155_v18  ;;  %v5147_v23 = vld [vmem:[#allocation7 + $0x30] sm:$0xf] }
  0xa1   : > { %v5160_v24 = vor.u32 %v6157_v20, %v5157_v21  ;;  %v6156_v25 = vld [vmem:[#allocation7 + $0x34] sm:$0xf0]  ;;  %v6155_v26 = vld [vmem:[#allocation7 + $0x34] sm:$0xf]  ;;  %v5149_v27 = vld [vmem:[#allocation7 + $0x38] sm:$0xf0] }
  0xa2   : > { %1050 = vmatpush.bf16.msra.mxu0 %v5172_v10  ;;  %v5148_v28 = vor.u32 %v6156_v25, %v5147_v23  ;;  %v5152_v29 = vor.u32 %v6155_v26, %v5149_v27  ;;  %v5139_v30 = vld [vmem:[#allocation7 + $0x20] sm:$0xf]  ;;  %v6154_v31 = vld [vmem:[#allocation7 + $0x24] sm:$0xf0]  ;;  %v6153_v32 = vld [vmem:[#allocation7 + $0x24] sm:$0xf] }
  0xa3   : > { %1074 = vmatpush.bf16.msra.mxu1 %v5176_v11  ;;  %v5141_v33 = vld [vmem:[#allocation7 + $0x28] sm:$0xf0]  ;;  %v5140_v34 = vor.u32 %v6154_v31, %v5139_v30  ;;  %v5131_v36 = vld [vmem:[#allocation7 + $0x10] sm:$0xf]  ;;  %v6152_v37 = vld [vmem:[#allocation7 + $0x14] sm:$0xf0] }
  0xa4   : > { %v5144_v35 = vor.u32 %v6153_v32, %v5141_v33  ;;  %v6151_v38 = vld [vmem:[#allocation7 + $0x14] sm:$0xf]  ;;  %v5133_v39 = vld [vmem:[#allocation7 + $0x18] sm:$0xf0]  ;;  %v5132_v40 = vor.u32 %v6152_v37, %v5131_v36  ;;  %v5123_v42 = vld [vmem:[#allocation7] sm:$0xf] }
  0xa5   : > { %v5136_v41 = vor.u32 %v6151_v38, %v5133_v39  ;;  %v6150_v43 = vld [vmem:[#allocation7 + $0x4] sm:$0xf0]  ;;  %v6149_v44 = vld [vmem:[#allocation7 + $0x4] sm:$0xf]  ;;  %v5125_v45 = vld [vmem:[#allocation7 + $0x8] sm:$0xf0] }
  0xa6   : > { %1051 = vmatpush.bf16.msra.mxu0 %v5164_v16  ;;  %v5124_v46 = vor.u32 %v6150_v43, %v5123_v42  ;;  %v938_v47 = vld [vmem:[%s7456_s26] sm:$0xff]  ;;  %v939_v48 = vld [vmem:[%s7456_s26 + $0x8] sm:$0xff]  ;;  %v5128_v49 = vor.u32 %v6149_v44, %v5125_v45  ;;  %v940_v57 = vld [vmem:[%s7456_s26 + $0x10] sm:$0xff]  ;;  %s8980_s25 = sld [smem:[#allocation41_spill]]  ;;  %s6146_s13 = sshll.u32 %s7266_s5, 3 }
  0xa7   : > { %1075 = vmatpush.bf16.msra.mxu1 %v5168_v17  ;;  %v944_v50 = vpack.c.bf16 %v939_v48, %v938_v47  ;;  %v6172_v51 = vld [vmem:[#allocation8 + $0x38] sm:$0xff]  ;;  %v6171_v53 = vld [vmem:[#allocation8 + $0x30] sm:$0xff]  ;;  %v6170_v55 = vld [vmem:[#allocation8 + $0x28] sm:$0xff]  ;;  %s8981_s12 = sld [smem:[#allocation48_spill]]  ;;  %s937_s1 = scalar_lea.vmem [#allocation25], %s5107_s24 }
  0xa8   : > { %v6180_v52 = vld [vmem:[#allocation8 + $0x78] sm:$0xff]  ;;  %1247 = vmatpush.bf16.msra.mxu2 %v6172_v51  ;;  %v6179_v54 = vld [vmem:[#allocation8 + $0x70] sm:$0xff]  ;;  %v6178_v56 = vld [vmem:[#allocation8 + $0x68] sm:$0xff]  ;;  %s8982_s14 = sld [smem:[#allocation50_spill]]  ;;  %s4878_s7 = sshll.u32 %s937_s1, 4  ;;  %s4879_s7 = int_to_ptr.vmem [resolvable:$true] %s4878_s7 }
  0xa9   : > { %1271 = vmatpush.bf16.msra.mxu3 %v6180_v52  ;;  %v941_v58 = vld [vmem:[%s7456_s26 + $0x18] sm:$0xff]  ;;  %v6169_v59 = vld [vmem:[#allocation8 + $0x20] sm:$0xff]  ;;  %v943_v63 = vld [vmem:[%s7456_s26 + $0x28] sm:$0xff]  ;;  %s8983_s21 = sld [smem:[#allocation52_spill]]  ;;  %s4866_s16 = scalar_lea.sflag [#allocation4], %s7452_s18 }
  0xaa   : > { %1052 = vmatpush.bf16.msra.mxu0 %v5156_v22  ;;  %v6177_v60 = vld [vmem:[#allocation8 + $0x60] sm:$0xff]  ;;  %v945_v61 = vpack.c.bf16 %v941_v58, %v940_v57  ;;  %v6168_v1 = vld [vmem:[#allocation8 + $0x18] sm:$0xff]  ;;  %v6167_v3 = vld [vmem:[#allocation8 + $0x10] sm:$0xff]  ;;  %s8987_s10 = sld [smem:[#allocation59_spill]] }
  0xab   : > { %1076 = vmatpush.bf16.msra.mxu1 %v5160_v24  ;;  %v942_v62 = vld [vmem:[%s7456_s26 + $0x20] sm:$0xff]  ;;  %v6176_v2 = vld [vmem:[#allocation8 + $0x58] sm:$0xff]  ;;  %v6166_v5 = vld [vmem:[#allocation8 + $0x8] sm:$0xff]  ;;  %s8984_s26 = sld [smem:[#allocation54_spill]] }
  0xac   : > { %1248 = vmatpush.bf16.msra.mxu2 %v6171_v53  ;;  %v946_v0 = vpack.c.bf16 %v943_v63, %v942_v62  ;;  %v6175_v4 = vld [vmem:[#allocation8 + $0x50] sm:$0xff]  ;;  %v6174_v6 = vld [vmem:[#allocation8 + $0x48] sm:$0xff]  ;;  %v6165_v7 = vld [vmem:[#allocation8] sm:$0xff] }
  0xad   : > { %1272 = vmatpush.bf16.msra.mxu3 %v6179_v54  ;;  %v6173_v8 = vld [vmem:[#allocation8 + $0x40] sm:$0xff]  ;;  %v963_v9 = vld [vmem:[%s8980_s25] sm:$0x3]  ;;  %v5307_v27 = vld [vmem:[#allocation11 + $0x70] sm:$0xf]  ;;  %s8986_s25 = sld [smem:[#allocation58_spill]] }
  0xae   : > { %1053 = vmatpush.bf16.msra.mxu0 %v5148_v28  ;;  %v7509_v12 = vperm.slane %v963_v9, 0  ;;  %v7511_v13 = vperm.slane %v963_v9, 1  ;;  %v6196_v28 = vld [vmem:[#allocation11 + $0x74] sm:$0xf0]  ;;  %v5309_v32 = vld [vmem:[#allocation11 + $0x78] sm:$0xf0] }
  0xaf   : > { %1077 = vmatpush.bf16.msra.mxu1 %v5152_v29  ;;  %v6195_v29 = vld [vmem:[#allocation11 + $0x74] sm:$0xf]  ;;  %v5308_v31 = vor.u32 %v6196_v28, %v5307_v27  ;;  %v5299_v33 = vld [vmem:[#allocation11 + $0x60] sm:$0xf]  ;;  %v6193_v36 = vld [vmem:[#allocation11 + $0x64] sm:$0xf] }
  0xb0   : > { %1249 = vmatpush.bf16.msra.mxu2 %v6170_v55  ;;  %v5301_v37 = vld [vmem:[#allocation11 + $0x68] sm:$0xf0]  ;;  %v5291_v39 = vld [vmem:[#allocation11 + $0x50] sm:$0xf]  ;;  %v6191_v42 = vld [vmem:[#allocation11 + $0x54] sm:$0xf] }
  0xb1   : > { %1273 = vmatpush.bf16.msra.mxu3 %v6178_v56  ;;  %v5293_v43 = vld [vmem:[#allocation11 + $0x58] sm:$0xf0]  ;;  %v5371_v44 = vld [vmem:[#allocation13 + $0x70] sm:$0xf]  ;;  %v6212_v45 = vld [vmem:[#allocation13 + $0x74] sm:$0xf0] }
  0xb2   : > { %1054 = vmatpush.bf16.msra.mxu0 %v5140_v34  ;;  %v6194_v34 = vld [vmem:[#allocation11 + $0x64] sm:$0xf0]  ;;  %v5373_v47 = vld [vmem:[#allocation13 + $0x78] sm:$0xf0]  ;;  %v5372_v48 = vor.u32 %v6212_v45, %v5371_v44  ;;  %v5283_v52 = vld [vmem:[#allocation11 + $0x40] sm:$0xf]  ;;  %v5296_v57 = vor.u32 %v6191_v42, %v5293_v43 }
  0xb3   : > { %1078 = vmatpush.bf16.msra.mxu1 %v5144_v35  ;;  %v5312_v35 = vor.u32 %v6195_v29, %v5309_v32  ;;  %v5300_v38 = vor.u32 %v6194_v34, %v5299_v33  ;;  %v5363_v53 = vld [vmem:[#allocation13 + $0x60] sm:$0xf]  ;;  %v6210_v54 = vld [vmem:[#allocation13 + $0x64] sm:$0xf0]  ;;  %v5349_v27 = vld [vmem:[#allocation13 + $0x48] sm:$0xf0] }
  0xb4   : > { %1250 = vmatpush.bf16.msra.mxu2 %v6169_v59  ;;  %v6190_v58 = vld [vmem:[#allocation11 + $0x44] sm:$0xf0]  ;;  %v5364_v59 = vor.u32 %v6210_v54, %v5363_v53  ;;  %v5341_v53 = vld [vmem:[#allocation13 + $0x38] sm:$0xf0]  ;;  %s7030_s4 = scalar_lea.hbm %s8987_s10, 16 }
  0xb5   : > { %1274 = vmatpush.bf16.msra.mxu3 %v6177_v60  ;;  %v6209_v60 = vld [vmem:[#allocation13 + $0x64] sm:$0xf]  ;;  %v6186_v32 = vld [vmem:[#allocation11 + $0x24] sm:$0xf0] }
  0xb6   : > { %1055 = vmatpush.bf16.msra.mxu0 %v5132_v40  ;;  %v6192_v40 = vld [vmem:[#allocation11 + $0x54] sm:$0xf0] }
  0xb7   : > { %1079 = vmatpush.bf16.msra.mxu1 %v5136_v41  ;;  %v5304_v41 = vor.u32 %v6193_v36, %v5301_v37  ;;  %v5292_v51 = vor.u32 %v6192_v40, %v5291_v39 }
  0xb8   : > { %1251 = vmatpush.bf16.msra.mxu2 %v6168_v1  ;;  %v5285_v1 = vld [vmem:[#allocation11 + $0x48] sm:$0xf0] }
  0xb9   : > { %1275 = vmatpush.bf16.msra.mxu3 %v6176_v2 }
  0xba   : > { %1056 = vmatpush.bf16.msra.mxu0 %v5124_v46  ;;  %v6211_v46 = vld [vmem:[#allocation13 + $0x74] sm:$0xf] }
  0xbb   : > { %1080 = vmatpush.bf16.msra.mxu1 %v5128_v49  ;;  %v5376_v49 = vor.u32 %v6211_v46, %v5373_v47 }
  0xbc   : > { %1252 = vmatpush.bf16.msra.mxu2 %v6167_v3  ;;  %v5355_v3 = vld [vmem:[#allocation13 + $0x50] sm:$0xf] }
  0xbd   : > { %1057 = vmatmul.bf16.vlgmr.msra.gmra.mxu0 %v944_v50  ;;  %1276 = vmatpush.bf16.msra.mxu3 %v6175_v4 }
  0xbe   : > { %1081 = vmatmul.bf16.vlgmr.msra.gmra.mxu1 %v944_v50  ;;  %1400 = vmatpush.bf16.msrb.mxu0 %v5308_v31  ;;  %v5267_v31 = vld [vmem:[#allocation11 + $0x20] sm:$0xf] }
  0xbf   : > { %1424 = vmatpush.bf16.msrb.mxu1 %v5312_v35  ;;  %v5268_v36 = vor.u32 %v6186_v32, %v5267_v31 }
  0xc0   : > { %1253 = vmatpush.bf16.msra.mxu2 %v6166_v5  ;;  %v6208_v5 = vld [vmem:[#allocation13 + $0x54] sm:$0xf0] }
  0xc1   : > { %1277 = vmatpush.bf16.msra.mxu3 %v6174_v6  ;;  %v6207_v6 = vld [vmem:[#allocation13 + $0x54] sm:$0xf] }
  0xc2   : > { %1401 = vmatpush.bf16.msrb.mxu0 %v5300_v38 }
  0xc3   : > { %1425 = vmatpush.bf16.msrb.mxu1 %v5304_v41 }
  0xc4   : > { %1254 = vmatpush.bf16.msra.mxu2 %v6165_v7  ;;  %v5357_v7 = vld [vmem:[#allocation13 + $0x58] sm:$0xf0] }
  0xc5   : > { %1278 = vmatpush.bf16.msra.mxu3 %v6173_v8 }
  0xc6   : > { %1402 = vmatpush.bf16.msrb.mxu0 %v5292_v51  ;;  %v6203_v51 = vld [vmem:[#allocation13 + $0x34] sm:$0xf] }
  0xc7   : > { %1426 = vmatpush.bf16.msrb.mxu1 %v5296_v57  ;;  %v5344_v54 = vor.u32 %v6203_v51, %v5341_v53  ;;  %v5259_v57 = vld [vmem:[#allocation11 + $0x10] sm:$0xf] }
  0xc8   : > { %1544 = vmatpush.bf16.msrb.mxu2 %v5372_v48 }
  0xc9   : > { %1568 = vmatpush.bf16.msrb.mxu3 %v5376_v49  ;;  %v5339_v49 = vld [vmem:[#allocation13 + $0x30] sm:$0xf] }
  0xcc   : > { %1545 = vmatpush.bf16.msrb.mxu2 %v5364_v59  ;;  %v6202_v59 = vld [vmem:[#allocation13 + $0x24] sm:$0xf0] }
  0xcd   : > { %1062 = vmatmul.bf16.gmra.mxu0 %v945_v61 }
  0xce   : > { %1086 = vmatmul.bf16.gmra.mxu1 %v945_v61  ;;  %v5365_v61 = vld [vmem:[#allocation13 + $0x68] sm:$0xf0] }
  0xcf   : > { %v5368_v2 = vor.u32 %v6209_v60, %v5365_v61 }
  0xd1   : > { %1569 = vmatpush.bf16.msrb.mxu3 %v5368_v2  ;;  %v5261_v2 = vld [vmem:[#allocation11 + $0x18] sm:$0xf0] }
  0xdd   : > { %1067 = vmatmul.bf16.gmra.mxu0 %v946_v0 }
  0xde   : > { %1091 = vmatmul.bf16.gmra.mxu1 %v946_v0  ;;  %v6189_v0 = vld [vmem:[#allocation11 + $0x44] sm:$0xf] }
 0x13a   : > { %v1058_v10 = vpop.f32.mrf.mxu0 }
 0x13b   : > { %v1082_v11 = vpop.f32.mrf.mxu1  ;;  %v1059_v14 = vadd.f32 %v1058_v10, %v7509_v12  ;;  %v5284_v10 = vor.u32 %v6190_v58, %v5283_v52  ;;  %v6184_v58 = vld [vmem:[#allocation11 + $0x14] sm:$0xf0] }
 0x13c   : > { %v1083_v15 = vadd.f32 %v1082_v11, %v7511_v13  ;;  %v5260_v60 = vor.u32 %v6184_v58, %v5259_v57  ;;  %v5403_v58 = vld [vmem:[#allocation14 + $0x30] sm:$0xf] }
 0x13d   : > { %v1097_v20 = vmax.f32 %v1059_v14, 0.0  ;;  %1403 = vmatpush.bf16.msrb.mxu0 %v5284_v10  ;;  %v5251_v10 = vld [vmem:[#allocation11] sm:$0xf] }
 0x13e   : > { %v1098_v22 = vmax.f32 %v1083_v15, 0.0  ;;  %v5288_v15 = vor.u32 %v6189_v0, %v5285_v1  ;;  %v6183_v0 = vld [vmem:[#allocation11 + $0x14] sm:$0xf] }
 0x140   : > { %1427 = vmatpush.bf16.msrb.mxu1 %v5288_v15 }
 0x142   : > { %v1060_v16 = vpop.f32.mrf.mxu0 }
 0x143   : > { %v1061_v17 = vadd.f32 %v1060_v16, %v7509_v12  ;;  %v1084_v18 = vpop.f32.mrf.mxu1  ;;  %v5275_v16 = vld [vmem:[#allocation11 + $0x30] sm:$0xf] }
 0x144   : > { %v1085_v19 = vadd.f32 %v1084_v18, %v7511_v13 }
 0x145   : > { %v1099_v21 = vmax.f32 %v1061_v17, 0.0  ;;  %v6188_v17 = vld [vmem:[#allocation11 + $0x34] sm:$0xf0] }
 0x146   : > { %v1100_v23 = vmax.f32 %v1085_v19, 0.0  ;;  %v5356_v19 = vor.u32 %v6208_v5, %v5355_v3  ;;  %v5276_v28 = vor.u32 %v6188_v17, %v5275_v16  ;;  %v5264_v3 = vor.u32 %v6183_v0, %v5261_v2  ;;  %v6200_v5 = vld [vmem:[#allocation13 + $0x14] sm:$0xf0]  ;;  %v5253_v16 = vld [vmem:[#allocation11 + $0x8] sm:$0xf0] }
 0x147   : > { %v1109_v24 = vpack.c.bf16 %v1099_v21, %v1097_v20  ;;  %v5360_v20 = vor.u32 %v6207_v6, %v5357_v7  ;;  %v6187_v21 = vld [vmem:[#allocation11 + $0x34] sm:$0xf]  ;;  %v5315_v17 = vld [vmem:[#allocation13] sm:$0xf] }
 0x148   : > { %v1110_v25 = vpack.c.bf16 %v1100_v23, %v1098_v22  ;;  %v5277_v22 = vld [vmem:[#allocation11 + $0x38] sm:$0xf0]  ;;  %v5347_v23 = vld [vmem:[#allocation13 + $0x40] sm:$0xf]  ;;  %1546 = vmatpush.bf16.msrb.mxu2 %v5356_v19  ;;  %1404 = vmatpush.bf16.msrb.mxu0 %v5276_v28  ;;  %v6199_v6 = vld [vmem:[#allocation13 + $0x14] sm:$0xf] }
 0x149   : > { %1255 = vmatmul.bf16.vlgmr.msra.gmra.mxu2 %v1109_v24  ;;  %1570 = vmatpush.bf16.msrb.mxu3 %v5360_v20  ;;  %v5437_v28 = vld [vmem:[#allocation14 + $0x78] sm:$0xf0]  ;;  %v5395_v0 = vld [vmem:[#allocation14 + $0x20] sm:$0xf] }
 0x14a   : > { %1279 = vmatmul.bf16.vlgmr.msra.gmra.mxu3 %v1110_v25  ;;  %v1063_v26 = vpop.f32.mrf.mxu0  ;;  %v6206_v25 = vld [vmem:[#allocation13 + $0x44] sm:$0xf0] }
 0x14b   : > { %v1087_v30 = vpop.f32.mrf.mxu1  ;;  %v1064_v50 = vadd.f32 %v1063_v26, %v7509_v12  ;;  %v6205_v26 = vld [vmem:[#allocation13 + $0x44] sm:$0xf]  ;;  %v5348_v34 = vor.u32 %v6206_v25, %v5347_v23  ;;  %v6228_v25 = vld [vmem:[#allocation14 + $0x74] sm:$0xf0] }
 0x14c   : > { %v1088_v55 = vadd.f32 %v1087_v30, %v7511_v13  ;;  %v5280_v30 = vor.u32 %v6187_v21, %v5277_v22  ;;  %v5352_v35 = vor.u32 %v6205_v26, %v5349_v27  ;;  %1405 = vmatpush.bf16.msrb.mxu0 %v5268_v36  ;;  %v6197_v21 = vld [vmem:[#allocation13 + $0x4] sm:$0xf]  ;;  %v5317_v22 = vld [vmem:[#allocation13 + $0x8] sm:$0xf0]  ;;  %v6227_v26 = vld [vmem:[#allocation14 + $0x74] sm:$0xf] }
 0x14d   : > { %v1101_v8 = vmax.f32 %v1064_v50, 0.0  ;;  %1547 = vmatpush.bf16.msrb.mxu2 %v5348_v34  ;;  %v6204_v50 = vld [vmem:[#allocation13 + $0x34] sm:$0xf0]  ;;  %v5320_v23 = vor.u32 %v6197_v21, %v5317_v22  ;;  %v5440_v31 = vor.u32 %v6227_v26, %v5437_v28  ;;  %v5429_v34 = vld [vmem:[#allocation14 + $0x68] sm:$0xf0] }
 0x14e   : > { %v1102_v11 = vmax.f32 %v1088_v55, 0.0  ;;  %1428 = vmatpush.bf16.msrb.mxu1 %v5280_v30  ;;  %1571 = vmatpush.bf16.msrb.mxu3 %v5352_v35  ;;  %v5340_v52 = vor.u32 %v6204_v50, %v5339_v49  ;;  %v6185_v55 = vld [vmem:[#allocation11 + $0x24] sm:$0xf]  ;;  %v6226_v30 = vld [vmem:[#allocation14 + $0x64] sm:$0xf0] }
 0x14f   : > { %v5419_v35 = vld [vmem:[#allocation14 + $0x50] sm:$0xf]  ;;  %v6221_v49 = vld [vmem:[#allocation14 + $0x44] sm:$0xf]  ;;  %v5413_v50 = vld [vmem:[#allocation14 + $0x48] sm:$0xf0] }
 0x150   : > { %1406 = vmatpush.bf16.msrb.mxu0 %v5260_v60  ;;  %v5416_v51 = vor.u32 %v6221_v49, %v5413_v50  ;;  %v6219_v60 = vld [vmem:[#allocation14 + $0x34] sm:$0xf]  ;;  %v5381_v21 = vld [vmem:[#allocation14 + $0x8] sm:$0xf0]  ;;  %v6260_v49 = vld [vmem:[#allocation16 + $0xf4] sm:$0xf0] }
 0x151   : > { %1548 = vmatpush.bf16.msrb.mxu2 %v5340_v52 }
 0x152   : > { %v1065_v56 = vpop.f32.mrf.mxu0  ;;  %1572 = vmatpush.bf16.msrb.mxu3 %v5344_v54 }
 0x153   : > { %v1066_v62 = vadd.f32 %v1065_v56, %v7509_v12  ;;  %v1089_v63 = vpop.f32.mrf.mxu1  ;;  %v5331_v56 = vld [vmem:[#allocation13 + $0x20] sm:$0xf] }
 0x154   : > { %v1090_v4 = vadd.f32 %v1089_v63, %v7511_v13  ;;  %v5332_v61 = vor.u32 %v6202_v59, %v5331_v56  ;;  %v5333_v63 = vld [vmem:[#allocation13 + $0x28] sm:$0xf0]  ;;  %v6220_v59 = vld [vmem:[#allocation14 + $0x34] sm:$0xf0] }
 0x155   : > { %v1103_v9 = vmax.f32 %v1066_v62, 0.0  ;;  %v6201_v62 = vld [vmem:[#allocation13 + $0x24] sm:$0xf] }
 0x156   : > { %v1104_v14 = vmax.f32 %v1090_v4, 0.0  ;;  %v5336_v1 = vor.u32 %v6201_v62, %v5333_v63  ;;  %1549 = vmatpush.bf16.msrb.mxu2 %v5332_v61  ;;  %v5323_v4 = vld [vmem:[#allocation13 + $0x10] sm:$0xf]  ;;  %v5404_v62 = vor.u32 %v6220_v59, %v5403_v58  ;;  %v5405_v63 = vld [vmem:[#allocation14 + $0x38] sm:$0xf0] }
 0x157   : > { %v1111_v18 = vpack.c.bf16 %v1103_v9, %v1101_v8  ;;  %v5324_v7 = vor.u32 %v6200_v5, %v5323_v4  ;;  %v5325_v8 = vld [vmem:[#allocation13 + $0x18] sm:$0xf0]  ;;  %v6217_v4 = vld [vmem:[#allocation14 + $0x24] sm:$0xf]  ;;  %v5397_v5 = vld [vmem:[#allocation14 + $0x28] sm:$0xf0] }
 0x158   : > { %v1112_v24 = vpack.c.bf16 %v1104_v14, %v1102_v11  ;;  %1573 = vmatpush.bf16.msrb.mxu3 %v5336_v1  ;;  %v5328_v9 = vor.u32 %v6199_v6, %v5325_v8  ;;  %v6182_v11 = vld [vmem:[#allocation11 + $0x4] sm:$0xf0]  ;;  %v6181_v14 = vld [vmem:[#allocation11 + $0x4] sm:$0xf]  ;;  %v5387_v8 = vld [vmem:[#allocation14 + $0x10] sm:$0xf] }
 0x159   : > { %1260 = vmatmul.bf16.gmra.mxu2 %v1111_v18  ;;  %v5252_v15 = vor.u32 %v6182_v11, %v5251_v10  ;;  %v6198_v18 = vld [vmem:[#allocation13 + $0x4] sm:$0xf0]  ;;  %v5256_v19 = vor.u32 %v6181_v14, %v5253_v16  ;;  %v6215_v10 = vld [vmem:[#allocation14 + $0x14] sm:$0xf]  ;;  %v5389_v11 = vld [vmem:[#allocation14 + $0x18] sm:$0xf0] }
 0x15a   : > { %1284 = vmatmul.bf16.gmra.mxu3 %v1112_v24  ;;  %v1068_v29 = vpop.f32.mrf.mxu0  ;;  %1550 = vmatpush.bf16.msrb.mxu2 %v5324_v7  ;;  %v5316_v20 = vor.u32 %v6198_v18, %v5315_v17  ;;  %v5435_v24 = vld [vmem:[#allocation14 + $0x70] sm:$0xf]  ;;  %v6218_v1 = vld [vmem:[#allocation14 + $0x24] sm:$0xf0]  ;;  %v5400_v7 = vor.u32 %v6217_v4, %v5397_v5  ;;  %v5392_v16 = vor.u32 %v6215_v10, %v5389_v11  ;;  %v5379_v17 = vld [vmem:[#allocation14] sm:$0xf] }
 0x15b   : > { %v1092_v33 = vpop.f32.mrf.mxu1  ;;  %v1069_v37 = vadd.f32 %v1068_v29, %v7509_v12  ;;  %1407 = vmatpush.bf16.msrb.mxu0 %v5252_v15  ;;  %v5436_v27 = vor.u32 %v6228_v25, %v5435_v24  ;;  %v5427_v29 = vld [vmem:[#allocation14 + $0x60] sm:$0xf]  ;;  %v5396_v6 = vor.u32 %v6218_v1, %v5395_v0  ;;  %v6256_v58 = vld [vmem:[#allocation16 + $0xd4] sm:$0xf0]  ;;  %v5565_v0 = vld [vmem:[#allocation16 + $0xf8] sm:$0xf0] }
 0x15c   : > { %v1093_v38 = vadd.f32 %v1092_v33, %v7511_v13  ;;  %1574 = vmatpush.bf16.msrb.mxu3 %v5328_v9  ;;  %v5428_v32 = vor.u32 %v6226_v30, %v5427_v29  ;;  %v6225_v33 = vld [vmem:[#allocation14 + $0x64] sm:$0xf]  ;;  %v6216_v9 = vld [vmem:[#allocation14 + $0x14] sm:$0xf0]  ;;  %v5475_v1 = vld [vmem:[#allocation16 + $0x40] sm:$0xf] }
 0x15d   : > { %v1105_v43 = vmax.f32 %v1069_v37, 0.0  ;;  %v5432_v37 = vor.u32 %v6225_v33, %v5429_v34  ;;  %v5388_v15 = vor.u32 %v6216_v9, %v5387_v8  ;;  %v5539_v5 = vld [vmem:[#allocation16 + $0xc0] sm:$0xf]  ;;  %v6241_v8 = vld [vmem:[#allocation16 + $0x64] sm:$0xf] }
 0x15e   : > { %v1106_v45 = vmax.f32 %v1093_v38, 0.0  ;;  %1551 = vmatpush.bf16.msrb.mxu2 %v5316_v20  ;;  %v6224_v38 = vld [vmem:[#allocation14 + $0x54] sm:$0xf0]  ;;  %v6213_v20 = vld [vmem:[#allocation14 + $0x4] sm:$0xf] }
 0x15f   : > { %1690 = vmatpush.bf16.msra.mxu0 %v5436_v27  ;;  %v5384_v27 = vor.u32 %v6213_v20, %v5381_v21  ;;  %v5493_v9 = vld [vmem:[#allocation16 + $0x68] sm:$0xf0]  ;;  %v6257_v10 = vld [vmem:[#allocation16 + $0xe4] sm:$0xf]  ;;  %v6239_v20 = vld [vmem:[#allocation16 + $0x54] sm:$0xf] }
 0x160   : > { %1575 = vmatpush.bf16.msrb.mxu3 %v5320_v23  ;;  %v5496_v11 = vor.u32 %v6241_v8, %v5493_v9  ;;  %v6246_v8 = vld [vmem:[#allocation16 + $0x84] sm:$0xf0]  ;;  %v6229_v9 = vld [vmem:[#allocation16 + $0x4] sm:$0xf] }
 0x162   : > { %v1070_v39 = vpop.f32.mrf.mxu0 }
 0x163   : > { %v1071_v40 = vadd.f32 %v1070_v39, %v7509_v12  ;;  %v1094_v41 = vpop.f32.mrf.mxu1  ;;  %v5269_v12 = vld [vmem:[#allocation11 + $0x28] sm:$0xf0]  ;;  %1691 = vmatpush.bf16.msra.mxu0 %v5428_v32  ;;  %v6223_v39 = vld [vmem:[#allocation14 + $0x54] sm:$0xf] }
 0x164   : > { %v1095_v42 = vadd.f32 %v1094_v41, %v7511_v13  ;;  %v5272_v13 = vor.u32 %v6185_v55, %v5269_v12  ;;  %v7525_v41 = vld [vmem:[#allocation10] ss:$0 sm:$0xff] }
 0x165   : > { %v1107_v44 = vmax.f32 %v1071_v40, 0.0  ;;  %v5421_v40 = vld [vmem:[#allocation14 + $0x58] sm:$0xf0] }
 0x166   : > { %v1108_v46 = vmax.f32 %v1095_v42, 0.0  ;;  %1429 = vmatpush.bf16.msrb.mxu1 %v5272_v13 }
 0x167   : > { %v1113_v47 = vpack.c.bf16 %v1107_v44, %v1105_v43  ;;  %v5420_v43 = vor.u32 %v6224_v38, %v5419_v35  ;;  %v5424_v44 = vor.u32 %v6223_v39, %v5421_v40 }
 0x168   : > { %v1114_v48 = vpack.c.bf16 %v1108_v46, %v1106_v45  ;;  %v5411_v46 = vld [vmem:[#allocation14 + $0x40] sm:$0xf] }
 0x169   : > { %1265 = vmatmul.bf16.gmra.mxu2 %v1113_v47  ;;  %1692 = vmatpush.bf16.msra.mxu0 %v5420_v43  ;;  %v6222_v47 = vld [vmem:[#allocation14 + $0x44] sm:$0xf0]  ;;  %v1592_v43 = vld [vmem:[%s7466_s17] sm:$0xff]  ;;  %s8985_s17 = sld [smem:[#allocation56_spill]] }
 0x16a   : > { %1289 = vmatmul.bf16.gmra.mxu3 %v1114_v48  ;;  %1430 = vmatpush.bf16.msrb.mxu1 %v5264_v3  ;;  %v5412_v48 = vor.u32 %v6222_v47, %v5411_v46  ;;  %v5408_v3 = vor.u32 %v6219_v60, %v5405_v63  ;;  %v6244_v46 = vld [vmem:[#allocation16 + $0x74] sm:$0xf0]  ;;  %v5563_v47 = vld [vmem:[#allocation16 + $0xf0] sm:$0xf]  ;;  %v6243_v60 = vld [vmem:[#allocation16 + $0x74] sm:$0xf] }
 0x16b   : > { %v5564_v50 = vor.u32 %v6260_v49, %v5563_v47  ;;  %v6251_v47 = vld [vmem:[#allocation16 + $0xb4] sm:$0xf] }
 0x16d   : > { %1693 = vmatpush.bf16.msra.mxu0 %v5412_v48  ;;  %2343 = vmatpush.bf16.msra.mxu3 %v5564_v50 }
 0x16e   : > { %1431 = vmatpush.bf16.msrb.mxu1 %v5256_v19  ;;  %v6214_v19 = vld [vmem:[#allocation14 + $0x4] sm:$0xf0] }
 0x16f   : > { %v5380_v26 = vor.u32 %v6214_v19, %v5379_v17  ;;  %v6236_v19 = vld [vmem:[#allocation16 + $0x34] sm:$0xf0] }
 0x171   : > { %1694 = vmatpush.bf16.msra.mxu0 %v5404_v62  ;;  %v6259_v62 = vld [vmem:[#allocation16 + $0xf4] sm:$0xf] }
 0x172   : > { %1703 = vmatpush.bf16.msra.mxu1 %v5440_v31 }
 0x175   : > { %1695 = vmatpush.bf16.msra.mxu0 %v5396_v6  ;;  %v6254_v6 = vld [vmem:[#allocation16 + $0xc4] sm:$0xf0] }
 0x176   : > { %1704 = vmatpush.bf16.msra.mxu1 %v5432_v37 }
 0x179   : > { %1696 = vmatpush.bf16.msra.mxu0 %v5388_v15 }
 0x17a   : > { %1705 = vmatpush.bf16.msra.mxu1 %v5424_v44  ;;  %v1593_v44 = vpack.c.bf16 %v1592_v43, %v1592_v43  ;;  %v6250_v43 = vld [vmem:[#allocation16 + $0xa4] sm:$0xf0] }
 0x17d   : > { %1697 = vmatpush.bf16.msra.mxu0 %v5380_v26 }
 0x17e   : > { %1706 = vmatpush.bf16.msra.mxu1 %v5416_v51  ;;  %v6242_v51 = vld [vmem:[#allocation16 + $0x64] sm:$0xf0] }
 0x182   : > { %1707 = vmatpush.bf16.msra.mxu1 %v5408_v3  ;;  %v5568_v3 = vor.u32 %v6259_v62, %v5565_v0  ;;  %v6231_v62 = vld [vmem:[#allocation16 + $0x14] sm:$0xf] }
 0x183   : > { %v6247_v0 = vld [vmem:[#allocation16 + $0x94] sm:$0xf] }
 0x186   : > { %1708 = vmatpush.bf16.msra.mxu1 %v5400_v7  ;;  %v5540_v7 = vor.u32 %v6254_v6, %v5539_v5 }
 0x18a   : > { %1709 = vmatpush.bf16.msra.mxu1 %v5392_v16 }
 0x18e   : > { %1710 = vmatpush.bf16.msra.mxu1 %v5384_v27  ;;  %v5531_v27 = vld [vmem:[#allocation16 + $0xb0] sm:$0xf] }
 0x1cc   : > { %v1256_v36 = vpop.f32.mrf.mxu2 }
 0x1cd   : > { %v1280_v42 = vpop.f32.mrf.mxu3  ;;  %v1257_v45 = vadd.f32 %v7525_v41, %v1256_v36 }
 0x1cf   : > { %v1281_v53 = vadd.f32 %v1280_v42, %v1257_v45  ;;  %v5499_v45 = vld [vmem:[#allocation16 + $0x70] sm:$0xf] }
 0x1d0   : > { %v5500_v48 = vor.u32 %v6244_v46, %v5499_v45  ;;  %v5469_v46 = vld [vmem:[#allocation16 + $0x38] sm:$0xf0] }
 0x1d1   : > { %v1295_v56 = vmax.f32 %v1281_v53, 0.0  ;;  %v5555_v53 = vld [vmem:[#allocation16 + $0xe0] sm:$0xf] }
 0x1d2   : > { %2244 = vmatpush.bf16.msra.mxu2 %v5500_v48  ;;  %v5533_v48 = vld [vmem:[#allocation16 + $0xb8] sm:$0xf0] }
 0x1d3   : > { %v5536_v50 = vor.u32 %v6251_v47, %v5533_v48 }
 0x1d4   : > { %v1258_v52 = vpop.f32.mrf.mxu2 }
 0x1d5   : > { %v1259_v54 = vadd.f32 %v7525_v41, %v1258_v52  ;;  %v1282_v55 = vpop.f32.mrf.mxu3 }
 0x1d7   : > { %v1283_v12 = vadd.f32 %v1282_v55, %v1259_v54  ;;  %v6258_v54 = vld [vmem:[#allocation16 + $0xe4] sm:$0xf0]  ;;  %v5483_v55 = vld [vmem:[#allocation16 + $0x50] sm:$0xf] }
 0x1d9   : > { %v1296_v13 = vmax.f32 %v1283_v12, 0.0  ;;  %v5556_v12 = vor.u32 %v6258_v54, %v5555_v53  ;;  %v6233_v53 = vld [vmem:[#allocation16 + $0x24] sm:$0xf]  ;;  %v5461_v54 = vld [vmem:[#allocation16 + $0x28] sm:$0xf0] }
 0x1db   : > { %v1301_v57 = vpack.c.bf16 %v1296_v13, %v1295_v56  ;;  %v6240_v56 = vld [vmem:[#allocation16 + $0x54] sm:$0xf0]  ;;  %2344 = vmatpush.bf16.msra.mxu3 %v5556_v12  ;;  %v5464_v12 = vor.u32 %v6233_v53, %v5461_v54 }
 0x1dc   : > { %v1261_v61 = vpop.f32.mrf.mxu2  ;;  %v5484_v13 = vor.u32 %v6240_v56, %v5483_v55  ;;  %v6249_v55 = vld [vmem:[#allocation16 + $0xa4] sm:$0xf]  ;;  %v5525_v56 = vld [vmem:[#allocation16 + $0xa8] sm:$0xf0] }
 0x1dd   : > { %v1285_v2 = vpop.f32.mrf.mxu3  ;;  %1408 = vmatmul.bf16.vlgmr.msrb.gmra.mxu0 %v1301_v57  ;;  %1432 = vmatmul.bf16.vlgmr.msrb.gmra.mxu1 %v1301_v57  ;;  %v1262_v14 = vadd.f32 %v7525_v41, %v1261_v61  ;;  %v5501_v61 = vld [vmem:[#allocation16 + $0x78] sm:$0xf0] }
 0x1de   : > { %1552 = vmatmul.bf16.vlgmr.msrb.gmra.mxu2 %v1301_v57  ;;  %1576 = vmatmul.bf16.vlgmr.msrb.gmra.mxu3 %v1301_v57  ;;  %v5547_v57 = vld [vmem:[#allocation16 + $0xd0] sm:$0xf]  ;;  %v5504_v63 = vor.u32 %v6243_v60, %v5501_v61 }
 0x1df   : > { %v1286_v22 = vadd.f32 %v1285_v2, %v1262_v14  ;;  %v5548_v59 = vor.u32 %v6256_v58, %v5547_v57  ;;  %v6238_v2 = vld [vmem:[#allocation16 + $0x44] sm:$0xf0]  ;;  %2541 = vmatpush.bf16.msrb.mxu1 %v5568_v3  ;;  %v5557_v14 = vld [vmem:[#allocation16 + $0xe8] sm:$0xf0]  ;;  %v5515_v57 = vld [vmem:[#allocation16 + $0x90] sm:$0xf] }
 0x1e0   : > { %v5476_v4 = vor.u32 %v6238_v2, %v5475_v1  ;;  %2442 = vmatpush.bf16.msrb.mxu0 %v5504_v63  ;;  %v5560_v15 = vor.u32 %v6257_v10, %v5557_v14  ;;  %v6248_v58 = vld [vmem:[#allocation16 + $0x94] sm:$0xf0]  ;;  %v5453_v63 = vld [vmem:[#allocation16 + $0x18] sm:$0xf0]  ;;  %v5443_v3 = vld [vmem:[#allocation16] sm:$0xf] }
 0x1e1   : > { %v1297_v28 = vmax.f32 %v1286_v22, 0.0  ;;  %2345 = vmatpush.bf16.msra.mxu3 %v5548_v59  ;;  %v5485_v22 = vld [vmem:[#allocation16 + $0x58] sm:$0xf0]  ;;  %v5516_v61 = vor.u32 %v6248_v58, %v5515_v57  ;;  %v5456_v1 = vor.u32 %v6231_v62, %v5453_v63  ;;  %v6245_v14 = vld [vmem:[#allocation16 + $0x84] sm:$0xf] }
 0x1e2   : > { %v5517_v2 = vld [vmem:[#allocation16 + $0x98] sm:$0xf0] }
 0x1e3   : > { %2542 = vmatpush.bf16.msrb.mxu1 %v5560_v15  ;;  %v5520_v5 = vor.u32 %v6247_v0, %v5517_v2  ;;  %v5509_v15 = vld [vmem:[#allocation16 + $0x88] sm:$0xf0] }
 0x1e4   : > { %v1263_v18 = vpop.f32.mrf.mxu2  ;;  %2443 = vmatpush.bf16.msrb.mxu0 %v5496_v11  ;;  %v5445_v11 = vld [vmem:[#allocation16 + $0x8] sm:$0xf0] }
 0x1e5   : > { %v1264_v23 = vadd.f32 %v7525_v41, %v1263_v18  ;;  %v1287_v24 = vpop.f32.mrf.mxu3  ;;  %2346 = vmatpush.bf16.msra.mxu3 %v5540_v7  ;;  %v5467_v18 = vld [vmem:[#allocation16 + $0x30] sm:$0xf]  ;;  %v5507_v7 = vld [vmem:[#allocation16 + $0x80] sm:$0xf] }
 0x1e6   : > { %v5468_v21 = vor.u32 %v6236_v19, %v5467_v18  ;;  %v5508_v10 = vor.u32 %v6246_v8, %v5507_v7  ;;  %v5448_v18 = vor.u32 %v6229_v9, %v5445_v11  ;;  %v5512_v19 = vor.u32 %v6245_v14, %v5509_v15  ;;  %v5619_v8 = vld [vmem:[#allocation17 + $0x60] sm:$0xf]  ;;  %v6274_v9 = vld [vmem:[#allocation17 + $0x64] sm:$0xf0] }
 0x1e7   : > { %v1288_v25 = vadd.f32 %v1287_v24, %v1264_v23  ;;  %v6255_v23 = vld [vmem:[#allocation16 + $0xd4] sm:$0xf]  ;;  %v5549_v24 = vld [vmem:[#allocation16 + $0xd8] sm:$0xf0] }
 0x1e8   : > { %v5552_v26 = vor.u32 %v6255_v23, %v5549_v24  ;;  %v6276_v23 = vld [vmem:[#allocation17 + $0x74] sm:$0xf0]  ;;  %v5691_v24 = vld [vmem:[#allocation17 + $0xf0] sm:$0xf] }
 0x1e9   : > { %v1298_v29 = vmax.f32 %v1288_v25, 0.0  ;;  %v5488_v25 = vor.u32 %v6239_v20, %v5485_v22  ;;  %v5627_v22 = vld [vmem:[#allocation17 + $0x70] sm:$0xf] }
 0x1ea   : > { %2543 = vmatpush.bf16.msrb.mxu1 %v5552_v26  ;;  %v6292_v26 = vld [vmem:[#allocation17 + $0xf4] sm:$0xf0] }
 0x1eb   : > { %v1302_v30 = vpack.c.bf16 %v1298_v29, %v1297_v28  ;;  %v6252_v28 = vld [vmem:[#allocation16 + $0xb4] sm:$0xf0]  ;;  %2444 = vmatpush.bf16.msrb.mxu0 %v5488_v25  ;;  %v5628_v25 = vor.u32 %v6276_v23, %v5627_v22  ;;  %v6273_v22 = vld [vmem:[#allocation17 + $0x64] sm:$0xf] }
 0x1ec   : > { %v1266_v31 = vpop.f32.mrf.mxu2  ;;  %v5532_v29 = vor.u32 %v6252_v28, %v5531_v27  ;;  %v6275_v27 = vld [vmem:[#allocation17 + $0x74] sm:$0xf]  ;;  %v5629_v28 = vld [vmem:[#allocation17 + $0x78] sm:$0xf0] }
 0x1ed   : > { %v1290_v32 = vpop.f32.mrf.mxu3  ;;  %1413 = vmatmul.bf16.gmra.mxu0 %v1302_v30  ;;  %1437 = vmatmul.bf16.gmra.mxu1 %v1302_v30  ;;  %v1267_v33 = vadd.f32 %v7525_v41, %v1266_v31  ;;  %v5477_v31 = vld [vmem:[#allocation16 + $0x48] sm:$0xf0] }
 0x1ee   : > { %1557 = vmatmul.bf16.gmra.mxu2 %v1302_v30  ;;  %1581 = vmatmul.bf16.gmra.mxu3 %v1302_v30  ;;  %v6237_v30 = vld [vmem:[#allocation16 + $0x44] sm:$0xf] }
 0x1ef   : > { %v1291_v35 = vadd.f32 %v1290_v32, %v1267_v33  ;;  %v6253_v32 = vld [vmem:[#allocation16 + $0xc4] sm:$0xf]  ;;  %2347 = vmatpush.bf16.msra.mxu3 %v5532_v29  ;;  %v5480_v33 = vor.u32 %v6237_v30, %v5477_v31  ;;  %v5692_v29 = vor.u32 %v6292_v26, %v5691_v24  ;;  %v5632_v30 = vor.u32 %v6275_v27, %v5629_v28  ;;  %v6291_v31 = vld [vmem:[#allocation17 + $0xf4] sm:$0xf]  ;;  %v5621_v24 = vld [vmem:[#allocation17 + $0x68] sm:$0xf0] }
 0x1f0   : > { %v5624_v26 = vor.u32 %v6273_v22, %v5621_v24  ;;  %v5685_v27 = vld [vmem:[#allocation17 + $0xe8] sm:$0xf0] }
 0x1f1   : > { %v1299_v39 = vmax.f32 %v1291_v35, 0.0  ;;  %2445 = vmatpush.bf16.msrb.mxu0 %v5480_v33 }
 0x1f4   : > { %v1268_v34 = vpop.f32.mrf.mxu2 }
 0x1f5   : > { %v1269_v36 = vadd.f32 %v7525_v41, %v1268_v34  ;;  %v1292_v37 = vpop.f32.mrf.mxu3  ;;  %v5491_v41 = vld [vmem:[#allocation16 + $0x60] sm:$0xf]  ;;  %v5541_v34 = vld [vmem:[#allocation16 + $0xc8] sm:$0xf0] }
 0x1f6   : > { %v5492_v52 = vor.u32 %v6242_v51, %v5491_v41  ;;  %v5544_v35 = vor.u32 %v6253_v32, %v5541_v34  ;;  %v5451_v41 = vld [vmem:[#allocation16 + $0x10] sm:$0xf]  ;;  %v6232_v51 = vld [vmem:[#allocation16 + $0x14] sm:$0xf0]  ;;  %v5693_v32 = vld [vmem:[#allocation17 + $0xf8] sm:$0xf0] }
 0x1f7   : > { %v1293_v38 = vadd.f32 %v1292_v37, %v1269_v36  ;;  %v5459_v36 = vld [vmem:[#allocation16 + $0x20] sm:$0xf]  ;;  %v6234_v37 = vld [vmem:[#allocation16 + $0x24] sm:$0xf0]  ;;  %v5696_v33 = vor.u32 %v6291_v31, %v5693_v32 }
 0x1f8   : > { %2245 = vmatpush.bf16.msra.mxu2 %v5492_v52  ;;  %2544 = vmatpush.bf16.msrb.mxu1 %v5544_v35  ;;  %v5452_v52 = vor.u32 %v6232_v51, %v5451_v41 }
 0x1f9   : > { %v1300_v40 = vmax.f32 %v1293_v38, 0.0 }
 0x1fb   : > { %v1303_v42 = vpack.c.bf16 %v1300_v40, %v1299_v39  ;;  %v5460_v40 = vor.u32 %v6234_v37, %v5459_v36 }
 0x1fc   : > { %2246 = vmatpush.bf16.msra.mxu2 %v5484_v13  ;;  %2545 = vmatpush.bf16.msrb.mxu1 %v5536_v50  ;;  %v5528_v13 = vor.u32 %v6249_v55, %v5525_v56 }
 0x1fd   : > { %1418 = vmatmul.bf16.gmra.mxu0 %v1303_v42  ;;  %1442 = vmatmul.bf16.gmra.mxu1 %v1303_v42 }
 0x1fe   : > { %1562 = vmatmul.bf16.gmra.mxu2 %v1303_v42  ;;  %1586 = vmatmul.bf16.gmra.mxu3 %v1303_v42  ;;  %v5523_v42 = vld [vmem:[#allocation16 + $0xa0] sm:$0xf] }
 0x1ff   : > { %v5524_v45 = vor.u32 %v6250_v43, %v5523_v42  ;;  %v1860_v43 = vld [vmem:[%s8909_s9] sm:$0x3] }
 0x200   : > { %2247 = vmatpush.bf16.msra.mxu2 %v5476_v4  ;;  %2546 = vmatpush.bf16.msrb.mxu1 %v5528_v13  ;;  %v6230_v4 = vld [vmem:[#allocation16 + $0x4] sm:$0xf0]  ;;  %v7571_v47 = vperm.slane %v1860_v43, 0 }
 0x201   : > { %2348 = vmatpush.bf16.msra.mxu3 %v5524_v45  ;;  %v5444_v6 = vor.u32 %v6230_v4, %v5443_v3 }
 0x204   : > { %2248 = vmatpush.bf16.msra.mxu2 %v5468_v21  ;;  %2547 = vmatpush.bf16.msrb.mxu1 %v5520_v5 }
 0x205   : > { %2349 = vmatpush.bf16.msra.mxu3 %v5516_v61 }
 0x208   : > { %2249 = vmatpush.bf16.msra.mxu2 %v5460_v40  ;;  %2548 = vmatpush.bf16.msrb.mxu1 %v5512_v19  ;;  %v6290_v19 = vld [vmem:[#allocation17 + $0xe4] sm:$0xf0] }
 0x209   : > { %2350 = vmatpush.bf16.msra.mxu3 %v5508_v10  ;;  %v5683_v10 = vld [vmem:[#allocation17 + $0xe0] sm:$0xf] }
 0x20a   : > { %v5684_v23 = vor.u32 %v6290_v19, %v5683_v10  ;;  %v5611_v10 = vld [vmem:[#allocation17 + $0x50] sm:$0xf] }
 0x20c   : > { %2250 = vmatpush.bf16.msra.mxu2 %v5452_v52 }
 0x20d   : > { %1698 = vmatmul.bf16.vlgmr.msra.gmra.mxu0 %v1593_v44  ;;  %1711 = vmatmul.bf16.vlgmr.msra.gmra.mxu1 %v1593_v44  ;;  %v6235_v44 = vld [vmem:[#allocation16 + $0x34] sm:$0xf] }
 0x20e   : > { %v5472_v49 = vor.u32 %v6235_v44, %v5469_v46  ;;  %3045 = vmatpush.bf16.msrb.mxu3 %v5692_v29  ;;  %3243 = vmatpush.bf16.msra.mxu1 %v5696_v33 }
 0x210   : > { %2446 = vmatpush.bf16.msrb.mxu0 %v5472_v49  ;;  %2251 = vmatpush.bf16.msra.mxu2 %v5444_v6  ;;  %v7575_v49 = vperm.slane %v1860_v43, 1 }
 0x212   : > { %3046 = vmatpush.bf16.msrb.mxu3 %v5684_v23  ;;  %v6288_v23 = vld [vmem:[#allocation17 + $0xd4] sm:$0xf0] }
 0x214   : > { %2447 = vmatpush.bf16.msrb.mxu0 %v5464_v12  ;;  %2946 = vmatpush.bf16.msrb.mxu2 %v5628_v25  ;;  %v6289_v25 = vld [vmem:[#allocation17 + $0xe4] sm:$0xf] }
 0x215   : > { %v5688_v28 = vor.u32 %v6289_v25, %v5685_v27 }
 0x217   : > { %3244 = vmatpush.bf16.msra.mxu1 %v5688_v28 }
 0x218   : > { %2448 = vmatpush.bf16.msrb.mxu0 %v5456_v1 }
 0x21c   : > { %2449 = vmatpush.bf16.msrb.mxu0 %v5448_v18  ;;  %v5620_v18 = vor.u32 %v6274_v9, %v5619_v8 }
 0x21e   : > { %2947 = vmatpush.bf16.msrb.mxu2 %v5620_v18 }
 0x220   : > { %3144 = vmatpush.bf16.msra.mxu0 %v5632_v30 }
 0x224   : > { %3145 = vmatpush.bf16.msra.mxu0 %v5624_v26 }
 0x25a   : > { %v7534_v16 = vpop.f32.mrf.mxu0  ;;  %v7536_v17 = vpop.f32.mrf.mxu1 }
 0x261   : > { %v7558_v40 = vpop.f32.mrf.mxu2  ;;  %v7560_v42 = vpop.f32.mrf.mxu3 }
 0x262   : > { %v7538_v38 = vpop.f32.mrf.mxu0  ;;  %v7540_v39 = vpop.f32.mrf.mxu1  ;;  %v1716_v44 = vadd.f32 %v7558_v40, %v7534_v16  ;;  %v1717_v45 = vadd.f32 %v7560_v42, %v7536_v17 }
 0x263   : > { %v1718_v46 = vadd.f32 %v7558_v40, %v7538_v38  ;;  %v1719_v48 = vadd.f32 %v7560_v42, %v7540_v39 }
 0x26a   : > { %v7542_v59 = vpop.f32.mrf.mxu0  ;;  %v7544_v60 = vpop.f32.mrf.mxu1 }
 0x26b   : > { %v1720_v3 = vadd.f32 %v7558_v40, %v7542_v59  ;;  %v1721_v5 = vadd.f32 %v7560_v42, %v7544_v60 }
 0x272   : > { %v7546_v20 = vpop.f32.mrf.mxu0  ;;  %v7548_v21 = vpop.f32.mrf.mxu1 }
 0x273   : > { %v1722_v4 = vadd.f32 %v7558_v40, %v7546_v20  ;;  %v1723_v6 = vadd.f32 %v7560_v42, %v7548_v21 }
 0x27a   : > { %v7550_v34 = vpop.f32.mrf.mxu0  ;;  %v7552_v35 = vpop.f32.mrf.mxu1 }
 0x282   : > { %v7554_v36 = vpop.f32.mrf.mxu0  ;;  %v7556_v37 = vpop.f32.mrf.mxu1 }
 0x28a   : > { %v7577_v50 = vpop.f32.mrf.mxu0  ;;  %v7579_v41 = vpop.f32.mrf.mxu1 }
 0x28b   : > { %v1788_v51 = vadd.f32 %v1716_v44, %v7577_v50  ;;  %v1790_v52 = vadd.f32 %v1718_v46, %v7577_v50  ;;  %v1789_v53 = vadd.f32 %v1717_v45, %v7579_v41  ;;  %v1791_v54 = vadd.f32 %v1719_v48, %v7579_v41 }
 0x28c   : > { %v1792_v7 = vadd.f32 %v1720_v3, %v7577_v50  ;;  %v1794_v11 = vadd.f32 %v1722_v4, %v7577_v50  ;;  %v1793_v14 = vadd.f32 %v1721_v5, %v7579_v41  ;;  %v1795_v15 = vadd.f32 %v1723_v6, %v7579_v41 }
 0x28d   : > { %v1866_v55 = vadd.f32 %v7571_v47, %v1788_v51  ;;  %v1868_v12 = vadd.f32 %v7571_v47, %v1790_v52  ;;  %v1867_v56 = vadd.f32 %v7575_v49, %v1789_v53  ;;  %v1869_v13 = vadd.f32 %v7575_v49, %v1791_v54 }
 0x28e   : > { %v1870_v29 = vadd.f32 %v7571_v47, %v1792_v7  ;;  %v1872_v30 = vadd.f32 %v7571_v47, %v1794_v11  ;;  %v1871_v31 = vadd.f32 %v7575_v49, %v1793_v14  ;;  %v1873_v32 = vadd.f32 %v7575_v49, %v1795_v15  ;;  %v6272_v11 = vld [vmem:[#allocation17 + $0x54] sm:$0xf0]  ;;  %v5675_v14 = vld [vmem:[#allocation17 + $0xd0] sm:$0xf] }
 0x28f   : > { %v1938_v57 = vmax.f32 %v1866_v55, 0.0  ;;  %v1940_v58 = vmax.f32 %v1868_v12, 0.0  ;;  %v1939_v61 = vmax.f32 %v1867_v56, 0.0  ;;  %v1941_v62 = vmax.f32 %v1869_v13, 0.0 }
 0x290   : > { %v1942_v33 = vmax.f32 %v1870_v29, 0.0  ;;  %v1944_v43 = vmax.f32 %v1872_v30, 0.0  ;;  %v1943_v44 = vmax.f32 %v1871_v31, 0.0  ;;  %v1945_v45 = vmax.f32 %v1873_v32, 0.0 }
 0x291   : > { %v2010_v63 = vpack.c.bf16 %v1940_v58, %v1938_v57  ;;  %v2011_v0 = vpack.c.bf16 %v1941_v62, %v1939_v61  ;;  %v1724_v51 = vadd.f32 %v7558_v40, %v7550_v34  ;;  %v1726_v52 = vadd.f32 %v7558_v40, %v7554_v36 }
 0x292   : > { %v1701_v1 = vpop.f32.mrf.mxu0  ;;  %v1714_v2 = vpop.f32.mrf.mxu1  ;;  %v2012_v46 = vpack.c.bf16 %v1944_v43, %v1942_v33  ;;  %v2013_v48 = vpack.c.bf16 %v1945_v45, %v1943_v44  ;;  %v1725_v53 = vadd.f32 %v7560_v42, %v7552_v35  ;;  %v1727_v54 = vadd.f32 %v7560_v42, %v7556_v37 }
 0x293   : > { %2252 = vmatmul.bf16.vlgmr.msra.gmra.mxu2 %v2010_v63  ;;  %2351 = vmatmul.bf16.vlgmr.msra.gmra.mxu3 %v2011_v0  ;;  %v1796_v55 = vadd.f32 %v1724_v51, %v7577_v50  ;;  %v1798_v12 = vadd.f32 %v1726_v52, %v7577_v50  ;;  %v7621_v1 = vpop.f32.mrf.mxu2  ;;  %v7623_v2 = vpop.f32.mrf.mxu3  ;;  %v5612_v22 = vor.u32 %v6272_v11, %v5611_v10  ;;  %v6271_v52 = vld [vmem:[#allocation17 + $0x54] sm:$0xf] }
 0x294   : > { %2450 = vmatmul.bf16.vlgmr.msrb.gmra.mxu0 %v2010_v63  ;;  %2549 = vmatmul.bf16.vlgmr.msrb.gmra.mxu1 %v2011_v0  ;;  %v1797_v56 = vadd.f32 %v1725_v53, %v7579_v41  ;;  %v1799_v13 = vadd.f32 %v1727_v54, %v7579_v41  ;;  %v1728_v5 = vadd.f32 %v7621_v1, %v7534_v16  ;;  %v5613_v53 = vld [vmem:[#allocation17 + $0x58] sm:$0xf0]  ;;  %v6287_v54 = vld [vmem:[#allocation17 + $0xd4] sm:$0xf] }
 0x295   : > { %v1874_v57 = vadd.f32 %v7571_v47, %v1796_v55  ;;  %v1876_v40 = vadd.f32 %v7571_v47, %v1798_v12  ;;  %v1730_v6 = vadd.f32 %v7621_v1, %v7538_v38  ;;  %v1729_v7 = vadd.f32 %v7623_v2, %v7536_v17  ;;  %2948 = vmatpush.bf16.msrb.mxu2 %v5612_v22 }
 0x296   : > { %v1875_v58 = vadd.f32 %v7575_v49, %v1797_v56  ;;  %v1877_v61 = vadd.f32 %v7575_v49, %v1799_v13  ;;  %v1731_v8 = vadd.f32 %v7623_v2, %v7540_v39  ;;  %v1800_v9 = vadd.f32 %v1728_v5, %v7577_v50 }
 0x297   : > { %v1946_v62 = vmax.f32 %v1874_v57, 0.0  ;;  %v1948_v42 = vmax.f32 %v1876_v40, 0.0  ;;  %v1802_v15 = vadd.f32 %v1730_v6, %v7577_v50  ;;  %v1801_v18 = vadd.f32 %v1729_v7, %v7579_v41  ;;  %v5677_v57 = vld [vmem:[#allocation17 + $0xd8] sm:$0xf0] }
 0x298   : > { %v1947_v63 = vmax.f32 %v1875_v58, 0.0  ;;  %v1949_v0 = vmax.f32 %v1877_v61, 0.0  ;;  %v1803_v19 = vadd.f32 %v1731_v8, %v7579_v41  ;;  %v5676_v24 = vor.u32 %v6288_v23, %v5675_v14  ;;  %v5603_v14 = vld [vmem:[#allocation17 + $0x40] sm:$0xf] }
 0x299   : > { %v2014_v3 = vpack.c.bf16 %v1948_v42, %v1946_v62  ;;  %v1878_v25 = vadd.f32 %v7571_v47, %v1800_v9  ;;  %v1880_v26 = vadd.f32 %v7571_v47, %v1802_v15  ;;  %v1879_v27 = vadd.f32 %v7575_v49, %v1801_v18  ;;  %v6270_v15 = vld [vmem:[#allocation17 + $0x44] sm:$0xf0]  ;;  %v5667_v18 = vld [vmem:[#allocation17 + $0xc0] sm:$0xf] }
 0x29a   : > { %v2015_v4 = vpack.c.bf16 %v1949_v0, %v1947_v63  ;;  %3047 = vmatpush.bf16.msrb.mxu3 %v5676_v24  ;;  %v1881_v28 = vadd.f32 %v7575_v49, %v1803_v19  ;;  %v1732_v44 = vadd.f32 %v7621_v1, %v7542_v59  ;;  %v1734_v45 = vadd.f32 %v7621_v1, %v7546_v20  ;;  %v6286_v24 = vld [vmem:[#allocation17 + $0xc4] sm:$0xf0] }
 0x29b   : > { %v1950_v29 = vmax.f32 %v1878_v25, 0.0  ;;  %v1952_v30 = vmax.f32 %v1880_v26, 0.0  ;;  %v1951_v31 = vmax.f32 %v1879_v27, 0.0  ;;  %v5616_v13 = vor.u32 %v6271_v52, %v5613_v53 }
 0x29c   : > { %v1953_v32 = vmax.f32 %v1881_v28, 0.0  ;;  %v1804_v51 = vadd.f32 %v1732_v44, %v7577_v50  ;;  %v1806_v55 = vadd.f32 %v1734_v45, %v7577_v50  ;;  %v5680_v40 = vor.u32 %v6287_v54, %v5677_v57  ;;  %v6269_v54 = vld [vmem:[#allocation17 + $0x44] sm:$0xf] }
 0x29d   : > { %v2016_v33 = vpack.c.bf16 %v1952_v30, %v1950_v29  ;;  %3146 = vmatpush.bf16.msra.mxu0 %v5616_v13  ;;  %v1736_v7 = vadd.f32 %v7621_v1, %v7550_v34  ;;  %v1738_v8 = vadd.f32 %v7621_v1, %v7554_v36  ;;  %v1737_v9 = vadd.f32 %v7623_v2, %v7552_v35 }
 0x29e   : > { %v2017_v43 = vpack.c.bf16 %v1953_v32, %v1951_v31  ;;  %3245 = vmatpush.bf16.msra.mxu1 %v5680_v40  ;;  %v1882_v58 = vadd.f32 %v7571_v47, %v1804_v51  ;;  %v1884_v61 = vadd.f32 %v7571_v47, %v1806_v55  ;;  %v1739_v10 = vadd.f32 %v7623_v2, %v7556_v37  ;;  %v5605_v55 = vld [vmem:[#allocation17 + $0x48] sm:$0xf0] }
 0x29f   : > { %v1808_v11 = vadd.f32 %v1736_v7, %v7577_v50  ;;  %v1810_v19 = vadd.f32 %v1738_v8, %v7577_v50  ;;  %v1809_v22 = vadd.f32 %v1737_v9, %v7579_v41  ;;  %v5604_v1 = vor.u32 %v6270_v15, %v5603_v14 }
 0x2a0   : > { %v1954_v63 = vmax.f32 %v1882_v58, 0.0  ;;  %v1956_v0 = vmax.f32 %v1884_v61, 0.0  ;;  %v1811_v23 = vadd.f32 %v1739_v10, %v7579_v41  ;;  %v5668_v25 = vor.u32 %v6286_v24, %v5667_v18  ;;  %v5669_v58 = vld [vmem:[#allocation17 + $0xc8] sm:$0xf0] }
 0x2a1   : > { %2949 = vmatpush.bf16.msrb.mxu2 %v5604_v1  ;;  %v1888_v26 = vadd.f32 %v7571_v47, %v1810_v19  ;;  %v1887_v27 = vadd.f32 %v7575_v49, %v1809_v22  ;;  %v5608_v40 = vor.u32 %v6269_v54, %v5605_v55 }
 0x2a2   : > { %v2018_v5 = vpack.c.bf16 %v1956_v0, %v1954_v63  ;;  %3048 = vmatpush.bf16.msrb.mxu3 %v5668_v25  ;;  %v1889_v28 = vadd.f32 %v7575_v49, %v1811_v23 }
 0x2a3   : > { %2257 = vmatmul.bf16.gmra.mxu2 %v2012_v46  ;;  %2356 = vmatmul.bf16.gmra.mxu3 %v2013_v48  ;;  %v1960_v30 = vmax.f32 %v1888_v26, 0.0  ;;  %v1959_v31 = vmax.f32 %v1887_v27, 0.0 }
 0x2a4   : > { %2455 = vmatmul.bf16.gmra.mxu0 %v2012_v46  ;;  %2554 = vmatmul.bf16.gmra.mxu1 %v2013_v48  ;;  %v1733_v46 = vadd.f32 %v7623_v2, %v7544_v60  ;;  %v1735_v48 = vadd.f32 %v7623_v2, %v7548_v21  ;;  %v1886_v2 = vadd.f32 %v7571_v47, %v1808_v11  ;;  %v1961_v32 = vmax.f32 %v1889_v28, 0.0 }
 0x2a5   : > { %3147 = vmatpush.bf16.msra.mxu0 %v5608_v40  ;;  %v6284_v40 = vld [vmem:[#allocation17 + $0xb4] sm:$0xf0] }
 0x2a6   : > { %v1805_v12 = vadd.f32 %v1733_v46, %v7579_v41  ;;  %v1807_v56 = vadd.f32 %v1735_v48, %v7579_v41  ;;  %v1958_v29 = vmax.f32 %v1886_v2, 0.0  ;;  %v2021_v45 = vpack.c.bf16 %v1961_v32, %v1959_v31 }
 0x2a8   : > { %v1883_v62 = vadd.f32 %v7575_v49, %v1805_v12  ;;  %v1885_v42 = vadd.f32 %v7575_v49, %v1807_v56  ;;  %v2020_v44 = vpack.c.bf16 %v1960_v30, %v1958_v29  ;;  %v6285_v12 = vld [vmem:[#allocation17 + $0xc4] sm:$0xf] }
 0x2a9   : > { %v5672_v61 = vor.u32 %v6285_v12, %v5669_v58 }
 0x2ab   : > { %3246 = vmatpush.bf16.msra.mxu1 %v5672_v61 }
 0x2b3   : > { %2262 = vmatmul.bf16.gmra.mxu2 %v2014_v3  ;;  %2361 = vmatmul.bf16.gmra.mxu3 %v2015_v4 }
 0x2b4   : > { %2460 = vmatmul.bf16.gmra.mxu0 %v2014_v3  ;;  %2559 = vmatmul.bf16.gmra.mxu1 %v2015_v4  ;;  %v1955_v3 = vmax.f32 %v1883_v62, 0.0  ;;  %v1957_v4 = vmax.f32 %v1885_v42, 0.0 }
 0x2b6   : > { %v2019_v6 = vpack.c.bf16 %v1957_v4, %v1955_v3 }
 0x2c3   : > { %2267 = vmatmul.bf16.gmra.mxu2 %v2016_v33  ;;  %2366 = vmatmul.bf16.gmra.mxu3 %v2017_v43 }
 0x2c4   : > { %2465 = vmatmul.bf16.gmra.mxu0 %v2016_v33  ;;  %2564 = vmatmul.bf16.gmra.mxu1 %v2017_v43  ;;  %v1558_v33 = vpop.f32.mrf.mxu2  ;;  %v1582_v43 = vpop.f32.mrf.mxu3 }
 0x2c5   : > { %v1740_v46 = vadd.f32 %v1558_v33, %v7534_v16  ;;  %v1742_v48 = vadd.f32 %v1558_v33, %v7538_v38  ;;  %v1741_v51 = vadd.f32 %v1582_v43, %v7536_v17  ;;  %v1743_v52 = vadd.f32 %v1582_v43, %v7540_v39 }
 0x2c6   : > { %v1744_v9 = vadd.f32 %v1558_v33, %v7542_v59  ;;  %v1746_v10 = vadd.f32 %v1558_v33, %v7546_v20  ;;  %v1745_v11 = vadd.f32 %v1582_v43, %v7544_v60  ;;  %v1747_v14 = vadd.f32 %v1582_v43, %v7548_v21 }
 0x2c7   : > { %v1812_v53 = vadd.f32 %v1740_v46, %v7577_v50  ;;  %v1814_v56 = vadd.f32 %v1742_v48, %v7577_v50  ;;  %v1813_v13 = vadd.f32 %v1741_v51, %v7579_v41  ;;  %v1815_v57 = vadd.f32 %v1743_v52, %v7579_v41 }
 0x2c8   : > { %v1816_v15 = vadd.f32 %v1744_v9, %v7577_v50  ;;  %v1818_v18 = vadd.f32 %v1746_v10, %v7577_v50  ;;  %v1817_v19 = vadd.f32 %v1745_v11, %v7579_v41  ;;  %v1819_v22 = vadd.f32 %v1747_v14, %v7579_v41  ;;  %v6267_v9 = vld [vmem:[#allocation17 + $0x34] sm:$0xf]  ;;  %v5597_v10 = vld [vmem:[#allocation17 + $0x38] sm:$0xf0] }
 0x2c9   : > { %v1890_v62 = vadd.f32 %v7571_v47, %v1812_v53  ;;  %v1892_v42 = vadd.f32 %v7571_v47, %v1814_v56  ;;  %v1891_v63 = vadd.f32 %v7575_v49, %v1813_v13  ;;  %v1893_v0 = vadd.f32 %v7575_v49, %v1815_v57  ;;  %v5595_v56 = vld [vmem:[#allocation17 + $0x30] sm:$0xf]  ;;  %v6283_v11 = vld [vmem:[#allocation17 + $0xb4] sm:$0xf] }
 0x2ca   : > { %v1894_v23 = vadd.f32 %v7571_v47, %v1816_v15  ;;  %v1896_v1 = vadd.f32 %v7571_v47, %v1818_v18  ;;  %v1895_v24 = vadd.f32 %v7575_v49, %v1817_v19  ;;  %v1897_v25 = vadd.f32 %v7575_v49, %v1819_v22  ;;  %v5659_v13 = vld [vmem:[#allocation17 + $0xb0] sm:$0xf]  ;;  %v5661_v15 = vld [vmem:[#allocation17 + $0xb8] sm:$0xf0] }
 0x2cb   : > { %v1962_v3 = vmax.f32 %v1890_v62, 0.0  ;;  %v1964_v4 = vmax.f32 %v1892_v42, 0.0  ;;  %v1749_v46 = vadd.f32 %v1582_v43, %v7552_v35  ;;  %v1751_v48 = vadd.f32 %v1582_v43, %v7556_v37 }
 0x2cc   : > { %v7697_v2 = vpop.f32.mrf.mxu2  ;;  %v7699_v26 = vpop.f32.mrf.mxu3  ;;  %v1966_v27 = vmax.f32 %v1894_v23, 0.0  ;;  %v1968_v28 = vmax.f32 %v1896_v1, 0.0  ;;  %v1967_v29 = vmax.f32 %v1895_v24, 0.0  ;;  %v1969_v30 = vmax.f32 %v1897_v25, 0.0 }
 0x2cd   : > { %v2022_v7 = vpack.c.bf16 %v1964_v4, %v1962_v3  ;;  %v1821_v55 = vadd.f32 %v1749_v46, %v7579_v41  ;;  %v1823_v12 = vadd.f32 %v1751_v48, %v7579_v41  ;;  %v5660_v58 = vor.u32 %v6284_v40, %v5659_v13 }
 0x2ce   : > { %v2024_v31 = vpack.c.bf16 %v1968_v28, %v1966_v27  ;;  %v2025_v32 = vpack.c.bf16 %v1969_v30, %v1967_v29  ;;  %v5600_v14 = vor.u32 %v6267_v9, %v5597_v10  ;;  %v5664_v18 = vor.u32 %v6283_v11, %v5661_v15 }
 0x2cf   : > { %v1899_v62 = vadd.f32 %v7575_v49, %v1821_v55  ;;  %v1901_v42 = vadd.f32 %v7575_v49, %v1823_v12  ;;  %3049 = vmatpush.bf16.msrb.mxu3 %v5660_v58  ;;  %v1752_v25 = vadd.f32 %v7697_v2, %v7534_v16  ;;  %v1754_v28 = vadd.f32 %v7697_v2, %v7538_v38 }
 0x2d0   : > { %3148 = vmatpush.bf16.msra.mxu0 %v5600_v14  ;;  %3247 = vmatpush.bf16.msra.mxu1 %v5664_v18  ;;  %v1753_v29 = vadd.f32 %v7699_v26, %v7536_v17  ;;  %v1755_v30 = vadd.f32 %v7699_v26, %v7540_v39 }
 0x2d2   : > { %v1827_v46 = vadd.f32 %v1755_v30, %v7579_v41 }
 0x2d3   : > { %2272 = vmatmul.bf16.gmra.mxu2 %v2018_v5  ;;  %2371 = vmatmul.bf16.gmra.mxu3 %v2019_v6 }
 0x2d4   : > { %2470 = vmatmul.bf16.gmra.mxu0 %v2018_v5  ;;  %2569 = vmatmul.bf16.gmra.mxu1 %v2019_v6  ;;  %v1963_v5 = vmax.f32 %v1891_v63, 0.0  ;;  %v1965_v6 = vmax.f32 %v1893_v0, 0.0  ;;  %v7705_v51 = vpop.f32.mrf.mxu2  ;;  %v7707_v52 = vpop.f32.mrf.mxu3  ;;  %v2078_v63 = vld [vmem:[%s8981_s12] sm:$0x3]  ;;  %v1905_v40 = vadd.f32 %v7575_v49, %v1827_v46  ;;  %s4876_s12 = scalar_lea.hbm %s8987_s10, %s6146_s13 }
 0x2d5   : > { %v7720_v3 = vperm.slane %v2078_v63, 1  ;;  %v7729_v27 = vperm.slane %v2078_v63, 0 }
 0x2d6   : > { %v2023_v8 = vpack.c.bf16 %v1965_v6, %v1963_v5  ;;  %v1971_v5 = vmax.f32 %v1899_v62, 0.0  ;;  %v1973_v6 = vmax.f32 %v1901_v42, 0.0  ;;  %v1977_v63 = vmax.f32 %v1905_v40, 0.0 }
 0x2d8   : > { %v2027_v1 = vpack.c.bf16 %v1973_v6, %v1971_v5 }
 0x2e3   : > { %2277 = vmatmul.bf16.gmra.mxu2 %v2020_v44  ;;  %2376 = vmatmul.bf16.gmra.mxu3 %v2021_v45 }
 0x2e4   : > { %2475 = vmatmul.bf16.gmra.mxu0 %v2020_v44  ;;  %2574 = vmatmul.bf16.gmra.mxu1 %v2021_v45  ;;  %v1748_v44 = vadd.f32 %v1558_v33, %v7550_v34  ;;  %v1750_v45 = vadd.f32 %v1558_v33, %v7554_v36  ;;  %v6268_v33 = vld [vmem:[#allocation17 + $0x34] sm:$0xf0] }
 0x2e5   : > { %v5596_v57 = vor.u32 %v6268_v33, %v5595_v56 }
 0x2e6   : > { %v1820_v53 = vadd.f32 %v1748_v44, %v7577_v50  ;;  %v1822_v54 = vadd.f32 %v1750_v45, %v7577_v50  ;;  %v1826_v44 = vadd.f32 %v1754_v28, %v7577_v50  ;;  %v1825_v45 = vadd.f32 %v1753_v29, %v7579_v41 }
 0x2e7   : > { %2950 = vmatpush.bf16.msrb.mxu2 %v5596_v57  ;;  %v1757_v28 = vadd.f32 %v7699_v26, %v7544_v60  ;;  %v1759_v29 = vadd.f32 %v7699_v26, %v7548_v21 }
 0x2e8   : > { %v1898_v43 = vadd.f32 %v7571_v47, %v1820_v53  ;;  %v1900_v61 = vadd.f32 %v7571_v47, %v1822_v54  ;;  %v1904_v13 = vadd.f32 %v7571_v47, %v1826_v44  ;;  %v1903_v57 = vadd.f32 %v7575_v49, %v1825_v45 }
 0x2e9   : > { %v1829_v45 = vadd.f32 %v1757_v28, %v7579_v41  ;;  %v1831_v46 = vadd.f32 %v1759_v29, %v7579_v41  ;;  %v1760_v28 = vadd.f32 %v7697_v2, %v7550_v34  ;;  %v1762_v29 = vadd.f32 %v7697_v2, %v7554_v36 }
 0x2ea   : > { %v1970_v0 = vmax.f32 %v1898_v43, 0.0  ;;  %v1972_v4 = vmax.f32 %v1900_v61, 0.0  ;;  %v1976_v62 = vmax.f32 %v1904_v13, 0.0  ;;  %v1975_v42 = vmax.f32 %v1903_v57, 0.0 }
 0x2eb   : > { %v1907_v57 = vadd.f32 %v7575_v49, %v1829_v45  ;;  %v1909_v40 = vadd.f32 %v7575_v49, %v1831_v46  ;;  %v6265_v45 = vld [vmem:[#allocation17 + $0x24] sm:$0xf]  ;;  %v5589_v46 = vld [vmem:[#allocation17 + $0x28] sm:$0xf0] }
 0x2ec   : > { %v2026_v23 = vpack.c.bf16 %v1972_v4, %v1970_v0 }
 0x2f3   : > { %2282 = vmatmul.bf16.gmra.mxu2 %v2022_v7  ;;  %2381 = vmatmul.bf16.gmra.mxu3 %v2023_v8 }
 0x2f4   : > { %2480 = vmatmul.bf16.gmra.mxu0 %v2022_v7  ;;  %2579 = vmatmul.bf16.gmra.mxu1 %v2023_v8  ;;  %v7722_v7 = vpop.f32.mrf.mxu2  ;;  %v7724_v8 = vpop.f32.mrf.mxu3 }
 0x303   : > { %2287 = vmatmul.bf16.gmra.mxu2 %v2024_v31  ;;  %2386 = vmatmul.bf16.gmra.mxu3 %v2025_v32 }
 0x304   : > { %2485 = vmatmul.bf16.gmra.mxu0 %v2024_v31  ;;  %2584 = vmatmul.bf16.gmra.mxu1 %v2025_v32  ;;  %v1824_v32 = vadd.f32 %v1752_v25, %v7577_v50 }
 0x306   : > { %v1902_v55 = vadd.f32 %v7571_v47, %v1824_v32 }
 0x308   : > { %v1974_v61 = vmax.f32 %v1902_v55, 0.0 }
 0x30a   : > { %v2028_v18 = vpack.c.bf16 %v1976_v62, %v1974_v61  ;;  %v6266_v61 = vld [vmem:[#allocation17 + $0x24] sm:$0xf0] }
 0x311   : > { %v2451_v19 = vpop.f32.mrf.mxu0  ;;  %v2550_v22 = vpop.f32.mrf.mxu1 }
 0x312   : > { %v2452_v24 = vadd.f32 %v2451_v19, %v7720_v3  ;;  %v2029_v19 = vpack.c.bf16 %v1977_v63, %v1975_v42 }
 0x313   : > { %2292 = vmatmul.bf16.gmra.mxu2 %v2026_v23  ;;  %2391 = vmatmul.bf16.gmra.mxu3 %v2027_v1 }
 0x314   : > { %v2551_v31 = vadd.f32 %v2550_v22, %v2452_v24  ;;  %2490 = vmatmul.bf16.gmra.mxu0 %v2026_v23  ;;  %2589 = vmatmul.bf16.gmra.mxu1 %v2027_v1  ;;  %v1756_v23 = vadd.f32 %v7697_v2, %v7542_v59  ;;  %v1758_v1 = vadd.f32 %v7697_v2, %v7546_v20 }
 0x316   : > { %v2253_v48 = vpop.f32.mrf.mxu2  ;;  %v2352_v53 = vpop.f32.mrf.mxu3  ;;  %v2641_v0 = vmax.f32 %v2551_v31, 0.0  ;;  %v1828_v31 = vadd.f32 %v1756_v23, %v7577_v50  ;;  %v1830_v44 = vadd.f32 %v1758_v1, %v7577_v50 }
 0x317   : > { %v2254_v54 = vadd.f32 %v2253_v48, %v7729_v27 }
 0x318   : > { %v1906_v55 = vadd.f32 %v7571_v47, %v1828_v31  ;;  %v1908_v13 = vadd.f32 %v7571_v47, %v1830_v44  ;;  %v1761_v31 = vadd.f32 %v7699_v26, %v7552_v35  ;;  %v1763_v44 = vadd.f32 %v7699_v26, %v7556_v37  ;;  %v5653_v26 = vld [vmem:[#allocation17 + $0xa8] sm:$0xf0] }
 0x319   : > { %v2353_v12 = vadd.f32 %v2352_v53, %v2254_v54  ;;  %v2453_v56 = vpop.f32.mrf.mxu0  ;;  %v2552_v33 = vpop.f32.mrf.mxu1 }
 0x31a   : > { %v2454_v43 = vadd.f32 %v2453_v56, %v7720_v3  ;;  %v1978_v63 = vmax.f32 %v1906_v55, 0.0  ;;  %v1834_v55 = vadd.f32 %v1762_v29, %v7577_v50  ;;  %v1835_v2 = vadd.f32 %v1763_v44, %v7579_v41 }
 0x31b   : > { %v2640_v24 = vmax.f32 %v2353_v12, 0.0 }
 0x31c   : > { %v2553_v58 = vadd.f32 %v2552_v33, %v2454_v43 }
 0x31e   : > { %v2643_v4 = vmax.f32 %v2553_v58, 0.0  ;;  %v2255_v5 = vpop.f32.mrf.mxu2  ;;  %v2354_v6 = vpop.f32.mrf.mxu3  ;;  %v5587_v58 = vld [vmem:[#allocation17 + $0x20] sm:$0xf] }
 0x31f   : > { %v2256_v9 = vadd.f32 %v2255_v5, %v7729_v27  ;;  %v5588_v42 = vor.u32 %v6266_v61, %v5587_v58  ;;  %v1981_v5 = vmax.f32 %v1909_v40, 0.0 }
 0x320   : > { %v7748_v10 = vpack.c.bf16 %v2643_v4, %v2641_v0  ;;  %v1980_v0 = vmax.f32 %v1908_v13, 0.0  ;;  %v1979_v4 = vmax.f32 %v1907_v57, 0.0  ;;  %v6281_v57 = vld [vmem:[#allocation17 + $0xa4] sm:$0xf] }
 0x321   : > { %v2355_v11 = vadd.f32 %v2354_v6, %v2256_v9  ;;  %v2456_v14 = vpop.f32.mrf.mxu0  ;;  %v2555_v15 = vpop.f32.mrf.mxu1  ;;  %2951 = vmatpush.bf16.msrb.mxu2 %v5588_v42 }
 0x322   : > { %v2457_v22 = vadd.f32 %v2456_v14, %v7720_v3  ;;  %v6282_v14 = vld [vmem:[#allocation17 + $0xa4] sm:$0xf0]  ;;  %v2030_v1 = vpack.c.bf16 %v1980_v0, %v1978_v63  ;;  %v1912_v0 = vadd.f32 %v7571_v47, %v1834_v55 }
 0x323   : > { %v2642_v25 = vmax.f32 %v2355_v11, 0.0  ;;  %2297 = vmatmul.bf16.gmra.mxu2 %v2028_v18  ;;  %2396 = vmatmul.bf16.gmra.mxu3 %v2029_v19  ;;  %v5651_v11 = vld [vmem:[#allocation17 + $0xa0] sm:$0xf] }
 0x324   : > { %v7759_v30 = vadd.f32 %v2555_v15, %v2457_v22  ;;  %2495 = vmatmul.bf16.gmra.mxu0 %v2028_v18  ;;  %2594 = vmatmul.bf16.gmra.mxu1 %v2029_v19  ;;  %v5652_v18 = vor.u32 %v6282_v14, %v5651_v11  ;;  %v1984_v14 = vmax.f32 %v1912_v0, 0.0 }
 0x325   : > { %v7762_v32 = vpack.c.bf16 %v2642_v25, %v2640_v24  ;;  %v2031_v24 = vpack.c.bf16 %v1981_v5, %v1979_v4  ;;  %v1913_v5 = vadd.f32 %v7575_v49, %v1835_v2 }
 0x326   : > { %v2258_v48 = vpop.f32.mrf.mxu2  ;;  %v2357_v53 = vpop.f32.mrf.mxu3  ;;  %3050 = vmatpush.bf16.msrb.mxu3 %v5652_v18 }
 0x327   : > { %v2259_v54 = vadd.f32 %v2258_v48, %v7729_v27  ;;  %v1985_v18 = vmax.f32 %v1913_v5, 0.0 }
 0x329   : > { %v7769_v12 = vadd.f32 %v2357_v53, %v2259_v54  ;;  %v2458_v56 = vpop.f32.mrf.mxu0  ;;  %v2557_v33 = vpop.f32.mrf.mxu1  ;;  %v1832_v53 = vadd.f32 %v1760_v28, %v7577_v50  ;;  %v5592_v54 = vor.u32 %v6265_v45, %v5589_v46  ;;  %v1764_v45 = vadd.f32 %v7705_v51, %v7534_v16 }
 0x32a   : > { %v2459_v43 = vadd.f32 %v2458_v56, %v7720_v3  ;;  %v1833_v56 = vadd.f32 %v1761_v31, %v7579_v41  ;;  %v1766_v46 = vadd.f32 %v7705_v51, %v7538_v38 }
 0x32b   : > { %3149 = vmatpush.bf16.msra.mxu0 %v5592_v54  ;;  %v1910_v58 = vadd.f32 %v7571_v47, %v1832_v53  ;;  %v1765_v53 = vadd.f32 %v7707_v52, %v7536_v17  ;;  %v1767_v54 = vadd.f32 %v7707_v52, %v7540_v39 }
 0x32c   : > { %v7775_v62 = vadd.f32 %v2557_v33, %v2459_v43  ;;  %v5656_v43 = vor.u32 %v6281_v57, %v5653_v26  ;;  %v1911_v4 = vadd.f32 %v7575_v49, %v1833_v56  ;;  %v1836_v56 = vadd.f32 %v1764_v45, %v7577_v50  ;;  %v6280_v45 = vld [vmem:[#allocation17 + $0x94] sm:$0xf0] }
 0x32d   : > { %v1982_v11 = vmax.f32 %v1910_v58, 0.0  ;;  %v1838_v2 = vadd.f32 %v1766_v46, %v7577_v50 }
 0x32e   : > { %v2260_v6 = vpop.f32.mrf.mxu2  ;;  %v2359_v9 = vpop.f32.mrf.mxu3  ;;  %3248 = vmatpush.bf16.msra.mxu1 %v5656_v43  ;;  %v1914_v43 = vadd.f32 %v7571_v47, %v1836_v56 }
 0x32f   : > { %v2261_v15 = vadd.f32 %v2260_v6, %v7729_v27  ;;  %v2032_v29 = vpack.c.bf16 %v1984_v14, %v1982_v11  ;;  %v1916_v0 = vadd.f32 %v7571_v47, %v1838_v2 }
 0x330   : > { %v1986_v14 = vmax.f32 %v1914_v43, 0.0  ;;  %v2645_v43 = vmax.f32 %v7759_v30, 0.0 }
 0x331   : > { %v7778_v19 = vadd.f32 %v2359_v9, %v2261_v15  ;;  %v2461_v22 = vpop.f32.mrf.mxu0  ;;  %v2560_v23 = vpop.f32.mrf.mxu1  ;;  %v1983_v15 = vmax.f32 %v1911_v4, 0.0 }
 0x332   : > { %v2462_v25 = vadd.f32 %v2461_v22, %v7720_v3 }
 0x333   : > { %2302 = vmatmul.bf16.gmra.mxu2 %v2030_v1  ;;  %2401 = vmatmul.bf16.gmra.mxu3 %v2031_v24  ;;  %v2033_v31 = vpack.c.bf16 %v1985_v18, %v1983_v15  ;;  %v1988_v15 = vmax.f32 %v1916_v0, 0.0 }
 0x334   : > { %v7789_v48 = vadd.f32 %v2560_v23, %v2462_v25  ;;  %2500 = vmatmul.bf16.gmra.mxu0 %v2030_v1  ;;  %2599 = vmatmul.bf16.gmra.mxu1 %v2031_v24 }
 0x336   : > { %v2263_v33 = vpop.f32.mrf.mxu2  ;;  %v2362_v13 = vpop.f32.mrf.mxu3 }
 0x337   : > { %v2264_v40 = vadd.f32 %v2263_v33, %v7729_v27  ;;  %v1837_v33 = vadd.f32 %v1765_v53, %v7579_v41  ;;  %v2647_v53 = vmax.f32 %v7775_v62, 0.0  ;;  %v1769_v62 = vadd.f32 %v7707_v52, %v7544_v60 }
 0x339   : > { %v7797_v61 = vadd.f32 %v2362_v13, %v2264_v40  ;;  %v2463_v42 = vpop.f32.mrf.mxu0  ;;  %v2562_v63 = vpop.f32.mrf.mxu1  ;;  %v1839_v13 = vadd.f32 %v1767_v54, %v7579_v41  ;;  %v1915_v4 = vadd.f32 %v7575_v49, %v1837_v33  ;;  %v2034_v33 = vpack.c.bf16 %v1988_v15, %v1986_v14 }
 0x33a   : > { %v2464_v6 = vadd.f32 %v2463_v42, %v7720_v3 }
 0x33b   : > { %v1917_v5 = vadd.f32 %v7575_v49, %v1839_v13  ;;  %v1987_v18 = vmax.f32 %v1915_v4, 0.0 }
 0x33c   : > { %v7803_v9 = vadd.f32 %v2562_v63, %v2464_v6 }
 0x33e   : > { %v2265_v22 = vpop.f32.mrf.mxu2  ;;  %v2364_v23 = vpop.f32.mrf.mxu3 }
 0x33f   : > { %v2266_v1 = vadd.f32 %v2265_v22, %v7729_v27  ;;  %v1989_v22 = vmax.f32 %v1917_v5, 0.0  ;;  %v1841_v5 = vadd.f32 %v1769_v62, %v7579_v41 }
 0x341   : > { %v7806_v24 = vadd.f32 %v2364_v23, %v2266_v1  ;;  %v2466_v25 = vpop.f32.mrf.mxu0  ;;  %v2565_v28 = vpop.f32.mrf.mxu1  ;;  %v2035_v13 = vpack.c.bf16 %v1989_v22, %v1987_v18  ;;  %v6263_v18 = vld [vmem:[#allocation17 + $0x14] sm:$0xf]  ;;  %v5581_v22 = vld [vmem:[#allocation17 + $0x18] sm:$0xf0] }
 0x342   : > { %v2467_v44 = vadd.f32 %v2466_v25, %v7720_v3  ;;  %v5579_v25 = vld [vmem:[#allocation17 + $0x10] sm:$0xf] }
 0x343   : > { %2307 = vmatmul.bf16.gmra.mxu2 %v2032_v29  ;;  %2406 = vmatmul.bf16.gmra.mxu3 %v2033_v31 }
 0x344   : > { %v7817_v55 = vadd.f32 %v2565_v28, %v2467_v44  ;;  %2505 = vmatmul.bf16.gmra.mxu0 %v2032_v29  ;;  %2604 = vmatmul.bf16.gmra.mxu1 %v2033_v31  ;;  %v6264_v28 = vld [vmem:[#allocation17 + $0x14] sm:$0xf0]  ;;  %v5643_v44 = vld [vmem:[#allocation17 + $0x90] sm:$0xf] }
 0x345   : > { %v5580_v31 = vor.u32 %v6264_v28, %v5579_v25  ;;  %v5644_v46 = vor.u32 %v6280_v45, %v5643_v44  ;;  %v5584_v25 = vor.u32 %v6263_v18, %v5581_v22  ;;  %v6279_v28 = vld [vmem:[#allocation17 + $0x94] sm:$0xf] }
 0x346   : > { %v2268_v57 = vpop.f32.mrf.mxu2  ;;  %v2367_v26 = vpop.f32.mrf.mxu3 }
 0x347   : > { %v2269_v40 = vadd.f32 %v2268_v57, %v7729_v27  ;;  %2952 = vmatpush.bf16.msrb.mxu2 %v5580_v31  ;;  %3051 = vmatpush.bf16.msrb.mxu3 %v5644_v46  ;;  %v2644_v46 = vmax.f32 %v7769_v12, 0.0 }
 0x348   : > { %3150 = vmatpush.bf16.msra.mxu0 %v5584_v25  ;;  %v1774_v25 = vadd.f32 %v7705_v51, %v7554_v36 }
 0x349   : > { %v7825_v58 = vadd.f32 %v2367_v26, %v2269_v40  ;;  %v2468_v42 = vpop.f32.mrf.mxu0  ;;  %v2567_v63 = vpop.f32.mrf.mxu1  ;;  %v1768_v26 = vadd.f32 %v7705_v51, %v7542_v59  ;;  %v1770_v40 = vadd.f32 %v7705_v51, %v7546_v20 }
 0x34a   : > { %v2469_v6 = vadd.f32 %v2468_v42, %v7720_v3  ;;  %v1771_v42 = vadd.f32 %v7707_v52, %v7548_v21 }
 0x34b   : > { %v1840_v0 = vadd.f32 %v1768_v26, %v7577_v50  ;;  %v1842_v4 = vadd.f32 %v1770_v40, %v7577_v50 }
 0x34c   : > { %v7831_v11 = vadd.f32 %v2567_v63, %v2469_v6  ;;  %v1843_v30 = vadd.f32 %v1771_v42, %v7579_v41  ;;  %v7853_v6 = vpack.c.bf16 %v2647_v53, %v2645_v43 }
 0x34d   : > { %v1918_v31 = vadd.f32 %v7571_v47, %v1840_v0  ;;  %v1920_v44 = vadd.f32 %v7571_v47, %v1842_v4 }
 0x34e   : > { %v2270_v23 = vpop.f32.mrf.mxu2  ;;  %v2369_v1 = vpop.f32.mrf.mxu3 }
 0x34f   : > { %v2271_v29 = vadd.f32 %v2270_v23, %v7729_v27  ;;  %v2646_v23 = vmax.f32 %v7778_v19, 0.0  ;;  %v1921_v19 = vadd.f32 %v7575_v49, %v1843_v30  ;;  %v1990_v40 = vmax.f32 %v1918_v31, 0.0 }
 0x350   : > { %v1992_v43 = vmax.f32 %v1920_v44, 0.0 }
 0x351   : > { %v7835_v54 = vadd.f32 %v2369_v1, %v2271_v29  ;;  %v2471_v56 = vpop.f32.mrf.mxu0  ;;  %v2570_v2 = vpop.f32.mrf.mxu1  ;;  %v5645_v29 = vld [vmem:[#allocation17 + $0x98] sm:$0xf0]  ;;  %v1993_v12 = vmax.f32 %v1921_v19, 0.0 }
 0x352   : > { %v2472_v57 = vadd.f32 %v2471_v56, %v7720_v3  ;;  %v5648_v45 = vor.u32 %v6279_v28, %v5645_v29  ;;  %v2036_v18 = vpack.c.bf16 %v1992_v43, %v1990_v40  ;;  %v2649_v28 = vmax.f32 %v7789_v48, 0.0 }
 0x353   : > { %2312 = vmatmul.bf16.gmra.mxu2 %v2034_v33  ;;  %2411 = vmatmul.bf16.gmra.mxu3 %v2035_v13  ;;  %v1775_v29 = vadd.f32 %v7707_v52, %v7556_v37  ;;  %v2648_v40 = vmax.f32 %v7797_v61, 0.0 }
 0x354   : > { %v7847_v63 = vadd.f32 %v2570_v2, %v2472_v57  ;;  %2510 = vmatmul.bf16.gmra.mxu0 %v2034_v33  ;;  %2609 = vmatmul.bf16.gmra.mxu1 %v2035_v13  ;;  %v1919_v33 = vadd.f32 %v7575_v49, %v1841_v5  ;;  %v7865_v57 = vpack.c.bf16 %v2646_v23, %v2644_v46  ;;  %v2651_v5 = vmax.f32 %v7803_v9, 0.0 }
 0x355   : > { %3249 = vmatpush.bf16.msra.mxu1 %v5648_v45  ;;  %v1773_v9 = vadd.f32 %v7707_v52, %v7552_v35  ;;  %v1846_v45 = vadd.f32 %v1774_v25, %v7577_v50  ;;  %v1847_v48 = vadd.f32 %v1775_v29, %v7579_v41  ;;  %v1776_v25 = vadd.f32 %v7722_v7, %v7534_v16 }
 0x356   : > { %v2273_v14 = vpop.f32.mrf.mxu2  ;;  %v2372_v15 = vpop.f32.mrf.mxu3  ;;  %v1991_v62 = vmax.f32 %v1919_v33, 0.0  ;;  %v7889_v46 = vpack.c.bf16 %v2651_v5, %v2649_v28  ;;  %v2650_v33 = vmax.f32 %v7806_v24, 0.0  ;;  %v1778_v28 = vadd.f32 %v7722_v7, %v7538_v38 }
 0x357   : > { %v2274_v1 = vadd.f32 %v2273_v14, %v7729_v27  ;;  %v1779_v29 = vadd.f32 %v7724_v8, %v7540_v39  ;;  %v2653_v16 = vmax.f32 %v7817_v55, 0.0  ;;  %v1848_v38 = vadd.f32 %v1776_v25, %v7577_v50 }
 0x358   : > { %v2037_v22 = vpack.c.bf16 %v1993_v12, %v1991_v62  ;;  %v7901_v5 = vpack.c.bf16 %v2650_v33, %v2648_v40  ;;  %v1850_v39 = vadd.f32 %v1778_v28, %v7577_v50 }
 0x359   : > { %v7860_v53 = vadd.f32 %v2372_v15, %v2274_v1  ;;  %v2473_v56 = vpop.f32.mrf.mxu0  ;;  %v2572_v2 = vpop.f32.mrf.mxu1  ;;  %v1772_v1 = vadd.f32 %v7705_v51, %v7550_v34  ;;  %v1845_v51 = vadd.f32 %v1773_v9, %v7579_v41  ;;  %v1777_v9 = vadd.f32 %v7724_v8, %v7536_v17  ;;  %v5571_v17 = vld [vmem:[#allocation17] sm:$0xf] }
 0x35a   : > { %v2474_v13 = vadd.f32 %v2473_v56, %v7720_v3  ;;  %v1851_v40 = vadd.f32 %v1779_v29, %v7579_v41  ;;  %v6261_v29 = vld [vmem:[#allocation17 + $0x4] sm:$0xf] }
 0x35b   : > { %v1844_v44 = vadd.f32 %v1772_v1, %v7577_v50 }
 0x35c   : > { %v7867_v26 = vadd.f32 %v2572_v2, %v2474_v13  ;;  %v1924_v13 = vadd.f32 %v7571_v47, %v1846_v45 }
 0x35d   : > { %v1922_v19 = vadd.f32 %v7571_v47, %v1844_v44  ;;  %v2655_v44 = vmax.f32 %v7831_v11, 0.0 }
 0x35e   : > { %v2275_v42 = vpop.f32.mrf.mxu2  ;;  %v2374_v0 = vpop.f32.mrf.mxu3 }
 0x35f   : > { %v2276_v4 = vadd.f32 %v2275_v42, %v7729_v27  ;;  %v1923_v42 = vadd.f32 %v7575_v49, %v1845_v51 }
 0x361   : > { %v7871_v14 = vadd.f32 %v2374_v0, %v2276_v4  ;;  %v2476_v30 = vpop.f32.mrf.mxu0  ;;  %v2575_v15 = vpop.f32.mrf.mxu1  ;;  %v1925_v0 = vadd.f32 %v7575_v49, %v1847_v48 }
 0x362   : > { %v2477_v23 = vadd.f32 %v2476_v30, %v7720_v3  ;;  %v1994_v30 = vmax.f32 %v1922_v19, 0.0 }
 0x363   : > { %2317 = vmatmul.bf16.gmra.mxu2 %v2036_v18  ;;  %2416 = vmatmul.bf16.gmra.mxu3 %v2037_v22 }
 0x364   : > { %v7883_v31 = vadd.f32 %v2575_v15, %v2477_v23  ;;  %2515 = vmatmul.bf16.gmra.mxu0 %v2036_v18  ;;  %2614 = vmatmul.bf16.gmra.mxu1 %v2037_v22  ;;  %v1996_v15 = vmax.f32 %v1924_v13, 0.0  ;;  %v1995_v18 = vmax.f32 %v1923_v42, 0.0  ;;  %v1997_v22 = vmax.f32 %v1925_v0, 0.0  ;;  %v5635_v42 = vld [vmem:[#allocation17 + $0x80] sm:$0xf] }
 0x365   : > { %v1849_v13 = vadd.f32 %v1777_v9, %v7579_v41  ;;  %v6278_v0 = vld [vmem:[#allocation17 + $0x84] sm:$0xf0]  ;;  %v1929_v9 = vadd.f32 %v7575_v49, %v1851_v40  ;;  %v1780_v40 = vadd.f32 %v7722_v7, %v7542_v59 }
 0x366   : > { %v2278_v56 = vpop.f32.mrf.mxu2  ;;  %v2377_v2 = vpop.f32.mrf.mxu3 }
 0x367   : > { %v2279_v52 = vadd.f32 %v2278_v56, %v7729_v27  ;;  %v2038_v56 = vpack.c.bf16 %v1996_v15, %v1994_v30  ;;  %v5636_v15 = vor.u32 %v6278_v0, %v5635_v42  ;;  %v1927_v28 = vadd.f32 %v7575_v49, %v1849_v13 }
 0x368   : > { %v1783_v42 = vadd.f32 %v7724_v8, %v7548_v21  ;;  %v2659_v0 = vmax.f32 %v7867_v26, 0.0 }
 0x369   : > { %v7896_v43 = vadd.f32 %v2377_v2, %v2279_v52  ;;  %v2478_v62 = vpop.f32.mrf.mxu0  ;;  %v2577_v12 = vpop.f32.mrf.mxu1  ;;  %v2039_v2 = vpack.c.bf16 %v1997_v22, %v1995_v18  ;;  %v6262_v52 = vld [vmem:[#allocation17 + $0x4] sm:$0xf0]  ;;  %v1926_v18 = vadd.f32 %v7571_v47, %v1848_v38  ;;  %v1928_v22 = vadd.f32 %v7571_v47, %v1850_v39  ;;  %3052 = vmatpush.bf16.msrb.mxu3 %v5636_v15  ;;  %v5637_v39 = vld [vmem:[#allocation17 + $0x88] sm:$0xf0] }
 0x36a   : > { %v2479_v4 = vadd.f32 %v2478_v62, %v7720_v3  ;;  %v5572_v11 = vor.u32 %v6262_v52, %v5571_v17  ;;  %v7925_v62 = vpack.c.bf16 %v2655_v44, %v2653_v16  ;;  %v5573_v44 = vld [vmem:[#allocation17 + $0x8] sm:$0xf0]  ;;  %v2001_v16 = vmax.f32 %v1929_v9, 0.0  ;;  %v6277_v52 = vld [vmem:[#allocation17 + $0x84] sm:$0xf] }
 0x36b   : > { %v5640_v13 = vor.u32 %v6277_v52, %v5637_v39 }
 0x36c   : > { %v7903_v24 = vadd.f32 %v2577_v12, %v2479_v4  ;;  %2953 = vmatpush.bf16.msrb.mxu2 %v5572_v11  ;;  %v2654_v4 = vmax.f32 %v7835_v54, 0.0 }
 0x36d   : > { %3250 = vmatpush.bf16.msra.mxu1 %v5640_v13 }
 0x36e   : > { %v2280_v23 = vpop.f32.mrf.mxu2  ;;  %v2379_v61 = vpop.f32.mrf.mxu3 }
 0x36f   : > { %v2281_v1 = vadd.f32 %v2280_v23, %v7729_v27  ;;  %v2652_v23 = vmax.f32 %v7825_v58, 0.0  ;;  %v2000_v58 = vmax.f32 %v1928_v22, 0.0 }
 0x371   : > { %v7915_v45 = vadd.f32 %v2379_v61, %v2281_v1  ;;  %v2481_v51 = vpop.f32.mrf.mxu0  ;;  %v2580_v48 = vpop.f32.mrf.mxu1 }
 0x372   : > { %v2482_v33 = vadd.f32 %v2481_v51, %v7720_v3  ;;  %v7937_v51 = vpack.c.bf16 %v2654_v4, %v2652_v23  ;;  %v2657_v23 = vmax.f32 %v7847_v63, 0.0  ;;  %v2658_v63 = vmax.f32 %v7871_v14, 0.0 }
 0x373   : > { %2322 = vmatmul.bf16.gmra.mxu2 %v2038_v56  ;;  %2421 = vmatmul.bf16.gmra.mxu3 %v2039_v2 }
 0x374   : > { %v7920_v19 = vadd.f32 %v2580_v48, %v2482_v33  ;;  %2520 = vmatmul.bf16.gmra.mxu0 %v2038_v56  ;;  %2619 = vmatmul.bf16.gmra.mxu1 %v2039_v2  ;;  %v5576_v56 = vor.u32 %v6261_v29, %v5573_v44  ;;  %v1998_v2 = vmax.f32 %v1926_v18, 0.0  ;;  %v1999_v33 = vmax.f32 %v1927_v28, 0.0 }
 0x376   : > { %v2283_v55 = vpop.f32.mrf.mxu2  ;;  %v2382_v12 = vpop.f32.mrf.mxu3  ;;  %3151 = vmatpush.bf16.msra.mxu0 %v5576_v56  ;;  %v2040_v18 = vpack.c.bf16 %v2000_v58, %v1998_v2  ;;  %v2041_v22 = vpack.c.bf16 %v2001_v16, %v1999_v33  ;;  %v2656_v56 = vmax.f32 %v7860_v53, 0.0 }
 0x377   : > { %v2284_v30 = vadd.f32 %v2283_v55, %v7729_v27  ;;  %v1782_v55 = vadd.f32 %v7722_v7, %v7546_v20 }
 0x378   : > { %v7973_v52 = vpack.c.bf16 %v2658_v63, %v2656_v56  ;;  %v2662_v63 = vmax.f32 %v7915_v45, 0.0  ;;  %v6324_v56 = vld [vmem:[#allocation19 + $0xf4] sm:$0xf0] }
 0x379   : > { %v7932_v61 = vadd.f32 %v2382_v12, %v2284_v30  ;;  %v2483_v1 = vpop.f32.mrf.mxu0  ;;  %v2582_v25 = vpop.f32.mrf.mxu1  ;;  %v1781_v12 = vadd.f32 %v7724_v8, %v7544_v60  ;;  %v1852_v60 = vadd.f32 %v1780_v40, %v7577_v50  ;;  %v1854_v21 = vadd.f32 %v1782_v55, %v7577_v50 }
 0x37a   : > { %v2484_v54 = vadd.f32 %v2483_v1, %v7720_v3  ;;  %v1855_v1 = vadd.f32 %v1783_v42, %v7579_v41  ;;  %v1784_v42 = vadd.f32 %v7722_v7, %v7550_v34  ;;  %v2661_v34 = vmax.f32 %v7883_v31, 0.0  ;;  %v6308_v31 = vld [vmem:[#allocation19 + $0x74] sm:$0xf0] }
 0x37b   : > { %v1853_v26 = vadd.f32 %v1781_v12, %v7579_v41  ;;  %v1930_v29 = vadd.f32 %v7571_v47, %v1852_v60  ;;  %v1932_v44 = vadd.f32 %v7571_v47, %v1854_v21 }
 0x37c   : > { %v7939_v48 = vadd.f32 %v2582_v25, %v2484_v54  ;;  %v7961_v25 = vpack.c.bf16 %v2659_v0, %v2657_v23  ;;  %v1786_v0 = vadd.f32 %v7722_v7, %v7554_v36 }
 0x37d   : > { %v1931_v16 = vadd.f32 %v7575_v49, %v1853_v26  ;;  %v2002_v39 = vmax.f32 %v1930_v29, 0.0 }
 0x37e   : > { %v2285_v38 = vpop.f32.mrf.mxu2  ;;  %v2384_v17 = vpop.f32.mrf.mxu3 }
 0x37f   : > { %v2286_v11 = vadd.f32 %v2285_v38, %v7729_v27  ;;  %v1933_v38 = vadd.f32 %v7575_v49, %v1855_v1  ;;  %v2003_v13 = vmax.f32 %v1931_v16, 0.0 }
 0x381   : > { %v7951_v4 = vadd.f32 %v2384_v17, %v2286_v11  ;;  %v2486_v30 = vpop.f32.mrf.mxu0  ;;  %v2585_v15 = vpop.f32.mrf.mxu1  ;;  %v2004_v11 = vmax.f32 %v1932_v44, 0.0  ;;  %v2005_v40 = vmax.f32 %v1933_v38, 0.0  ;;  %v5819_v44 = vld [vmem:[#allocation19 + $0xf0] sm:$0xf] }
 0x382   : > { %v2487_v59 = vadd.f32 %v2486_v30, %v7720_v3  ;;  %v1785_v30 = vadd.f32 %v7724_v8, %v7552_v35  ;;  %v1856_v35 = vadd.f32 %v1784_v42, %v7577_v50 }
 0x383   : > { %2327 = vmatmul.bf16.gmra.mxu2 %v2040_v18  ;;  %2426 = vmatmul.bf16.gmra.mxu3 %v2041_v22  ;;  %v2042_v60 = vpack.c.bf16 %v2004_v11, %v2002_v39  ;;  %v2043_v21 = vpack.c.bf16 %v2005_v40, %v2003_v13 }
 0x384   : > { %v7955_v20 = vadd.f32 %v2585_v15, %v2487_v59  ;;  %2525 = vmatmul.bf16.gmra.mxu0 %v2040_v18  ;;  %2624 = vmatmul.bf16.gmra.mxu1 %v2041_v22  ;;  %v1787_v15 = vadd.f32 %v7724_v8, %v7556_v37  ;;  %v2663_v18 = vmax.f32 %v7903_v24, 0.0  ;;  %v1858_v37 = vadd.f32 %v1786_v0, %v7577_v50  ;;  %v6307_v0 = vld [vmem:[#allocation19 + $0x74] sm:$0xf] }
 0x385   : > { %v1857_v7 = vadd.f32 %v1785_v30, %v7579_v41  ;;  %v5757_v30 = vld [vmem:[#allocation19 + $0x78] sm:$0xf0] }
 0x386   : > { %v2288_v28 = vpop.f32.mrf.mxu2  ;;  %v2387_v9 = vpop.f32.mrf.mxu3  ;;  %v1859_v8 = vadd.f32 %v1787_v15, %v7579_v41  ;;  %v7997_v24 = vpack.c.bf16 %v2663_v18, %v2661_v34  ;;  %v1936_v50 = vadd.f32 %v7571_v47, %v1858_v37  ;;  %v2660_v41 = vmax.f32 %v7896_v43, 0.0 }
 0x387   : > { %v2289_v54 = vadd.f32 %v2288_v28, %v7729_v27  ;;  %v1935_v39 = vadd.f32 %v7575_v49, %v1857_v7  ;;  %v5760_v18 = vor.u32 %v6307_v0, %v5757_v30 }
 0x388   : > { %v1937_v45 = vadd.f32 %v7575_v49, %v1859_v8  ;;  %v8009_v13 = vpack.c.bf16 %v2662_v63, %v2660_v41  ;;  %v6323_v49 = vld [vmem:[#allocation19 + $0xf4] sm:$0xf]  ;;  %v2665_v8 = vmax.f32 %v7920_v19, 0.0 }
 0x389   : > { %v7968_v2 = vadd.f32 %v2387_v9, %v2289_v54  ;;  %v2488_v58 = vpop.f32.mrf.mxu0  ;;  %v2587_v33 = vpop.f32.mrf.mxu1  ;;  %v5755_v9 = vld [vmem:[#allocation19 + $0x70] sm:$0xf]  ;;  %3846 = vmatpush.bf16.msrb.mxu0 %v5760_v18  ;;  %v5747_v18 = vld [vmem:[#allocation19 + $0x60] sm:$0xf] }
 0x38a   : > { %v2489_v17 = vadd.f32 %v2488_v58, %v7720_v3  ;;  %v5756_v29 = vor.u32 %v6308_v31, %v5755_v9  ;;  %v1934_v58 = vadd.f32 %v7571_v47, %v1856_v35  ;;  %v2009_v43 = vmax.f32 %v1937_v45, 0.0 }
 0x38b   : > { %v2666_v31 = vmax.f32 %v7951_v4, 0.0 }
 0x38c   : > { %v7975_v14 = vadd.f32 %v2587_v33, %v2489_v17  ;;  %v5820_v33 = vor.u32 %v6324_v56, %v5819_v44  ;;  %3648 = vmatpush.bf16.msra.mxu2 %v5756_v29  ;;  %v2006_v47 = vmax.f32 %v1934_v58, 0.0 }
 0x38e   : > { %v2290_v55 = vpop.f32.mrf.mxu2  ;;  %v2389_v53 = vpop.f32.mrf.mxu3  ;;  %3747 = vmatpush.bf16.msra.mxu3 %v5820_v33  ;;  %v2671_v4 = vmax.f32 %v7975_v14, 0.0 }
 0x38f   : > { %v2291_v12 = vadd.f32 %v2290_v55, %v7729_v27  ;;  %v2008_v55 = vmax.f32 %v1936_v50, 0.0 }
 0x391   : > { %v7987_v22 = vadd.f32 %v2389_v53, %v2291_v12  ;;  %v2491_v59 = vpop.f32.mrf.mxu0  ;;  %v2590_v23 = vpop.f32.mrf.mxu1  ;;  %v2007_v53 = vmax.f32 %v1935_v39, 0.0  ;;  %v2044_v35 = vpack.c.bf16 %v2008_v55, %v2006_v47 }
 0x392   : > { %v2492_v26 = vadd.f32 %v2491_v59, %v7720_v3  ;;  %v5821_v59 = vld [vmem:[#allocation19 + $0xf8] sm:$0xf0] }
 0x393   : > { %2332 = vmatmul.bf16.gmra.mxu2 %v2042_v60  ;;  %2431 = vmatmul.bf16.gmra.mxu3 %v2043_v21  ;;  %v2045_v37 = vpack.c.bf16 %v2009_v43, %v2007_v53  ;;  %v2670_v43 = vmax.f32 %v7987_v22, 0.0  ;;  %v5811_v22 = vld [vmem:[#allocation19 + $0xe0] sm:$0xf] }
 0x394   : > { %v7991_v36 = vadd.f32 %v2590_v23, %v2492_v26  ;;  %2530 = vmatmul.bf16.gmra.mxu0 %v2042_v60  ;;  %2629 = vmatmul.bf16.gmra.mxu1 %v2043_v21  ;;  %v5824_v23 = vor.u32 %v6323_v49, %v5821_v59  ;;  %v2667_v60 = vmax.f32 %v7939_v48, 0.0 }
 0x396   : > { %v2293_v1 = vpop.f32.mrf.mxu2  ;;  %v2392_v28 = vpop.f32.mrf.mxu3  ;;  %3945 = vmatpush.bf16.msrb.mxu1 %v5824_v23 }
 0x397   : > { %v2294_v54 = vadd.f32 %v2293_v1, %v7729_v27 }
 0x399   : > { %v8004_v16 = vadd.f32 %v2392_v28, %v2294_v54  ;;  %v2493_v38 = vpop.f32.mrf.mxu0  ;;  %v2592_v17 = vpop.f32.mrf.mxu1  ;;  %v8021_v28 = vpack.c.bf16 %v2667_v60, %v2665_v8  ;;  %v2664_v54 = vmax.f32 %v7932_v61, 0.0 }
 0x39a   : > { %v2494_v11 = vadd.f32 %v2493_v38, %v7720_v3 }
 0x39b   : > { %v8029_v58 = vpack.c.bf16 %v2666_v31, %v2664_v54  ;;  %v6305_v31 = vld [vmem:[#allocation19 + $0x64] sm:$0xf] }
 0x39c   : > { %v8011_v40 = vadd.f32 %v2592_v17, %v2494_v11  ;;  %v2669_v11 = vmax.f32 %v7955_v20, 0.0  ;;  %v2668_v20 = vmax.f32 %v7968_v2, 0.0 }
 0x39e   : > { %v2295_v12 = vpop.f32.mrf.mxu2  ;;  %v2394_v42 = vpop.f32.mrf.mxu3  ;;  %v8045_v55 = vpack.c.bf16 %v2671_v4, %v2669_v11  ;;  %v8053_v49 = vpack.c.bf16 %v2670_v43, %v2668_v20 }
 0x39f   : > { %v2296_v15 = vadd.f32 %v2295_v12, %v7729_v27 }
 0x3a1   : > { %v8015_v21 = vadd.f32 %v2394_v42, %v2296_v15  ;;  %v2496_v26 = vpop.f32.mrf.mxu0  ;;  %v2595_v34 = vpop.f32.mrf.mxu1 }
 0x3a2   : > { %v2497_v7 = vadd.f32 %v2496_v26, %v7720_v3  ;;  %v6322_v26 = vld [vmem:[#allocation19 + $0xe4] sm:$0xf0] }
 0x3a3   : > { %2337 = vmatmul.bf16.gmra.mxu2 %v2044_v35  ;;  %2436 = vmatmul.bf16.gmra.mxu3 %v2045_v37 }
 0x3a4   : > { %v8019_v1 = vadd.f32 %v2595_v34, %v2497_v7  ;;  %2535 = vmatmul.bf16.gmra.mxu0 %v2044_v35  ;;  %2634 = vmatmul.bf16.gmra.mxu1 %v2045_v37  ;;  %v5812_v34 = vor.u32 %v6322_v26, %v5811_v22  ;;  %v2675_v35 = vmax.f32 %v8011_v40, 0.0 }
 0x3a6   : > { %v2298_v48 = vpop.f32.mrf.mxu2  ;;  %v2397_v9 = vpop.f32.mrf.mxu3  ;;  %3748 = vmatpush.bf16.msra.mxu3 %v5812_v34 }
 0x3a7   : > { %v2299_v63 = vadd.f32 %v2298_v48, %v7729_v27 }
 0x3a9   : > { %v8026_v29 = vadd.f32 %v2397_v9, %v2299_v63  ;;  %v2498_v44 = vpop.f32.mrf.mxu0  ;;  %v2597_v19 = vpop.f32.mrf.mxu1  ;;  %v2673_v9 = vmax.f32 %v7991_v36, 0.0  ;;  %v5749_v63 = vld [vmem:[#allocation19 + $0x68] sm:$0xf0] }
 0x3aa   : > { %v2499_v56 = vadd.f32 %v2498_v44, %v7720_v3  ;;  %v5752_v40 = vor.u32 %v6305_v31, %v5749_v63  ;;  %v5813_v36 = vld [vmem:[#allocation19 + $0xe8] sm:$0xf0]  ;;  %v5803_v31 = vld [vmem:[#allocation19 + $0xd0] sm:$0xf]  ;;  %v6320_v63 = vld [vmem:[#allocation19 + $0xd4] sm:$0xf0] }
 0x3ab   : > { %v8069_v44 = vpack.c.bf16 %v2675_v35, %v2673_v9 }
 0x3ac   : > { %v8031_v50 = vadd.f32 %v2597_v19, %v2499_v56  ;;  %3847 = vmatpush.bf16.msrb.mxu0 %v5752_v40 }
 0x3ae   : > { %v2300_v33 = vpop.f32.mrf.mxu2  ;;  %v2399_v41 = vpop.f32.mrf.mxu3 }
 0x3af   : > { %v2301_v38 = vadd.f32 %v2300_v33, %v7729_v27  ;;  %v6321_v33 = vld [vmem:[#allocation19 + $0xe4] sm:$0xf] }
 0x3b0   : > { %v5816_v4 = vor.u32 %v6321_v33, %v5813_v36 }
 0x3b1   : > { %v8035_v17 = vadd.f32 %v2399_v41, %v2301_v38  ;;  %v2501_v39 = vpop.f32.mrf.mxu0  ;;  %v2600_v61 = vpop.f32.mrf.mxu1  ;;  %v2674_v41 = vmax.f32 %v8015_v21, 0.0 }
 0x3b2   : > { %v2502_v45 = vadd.f32 %v2501_v39, %v7720_v3  ;;  %v2672_v39 = vmax.f32 %v8004_v16, 0.0  ;;  %3946 = vmatpush.bf16.msrb.mxu1 %v5816_v4 }
 0x3b3   : > { %2954 = vmatmul.bf16.vlgmr.msrb.gmra.mxu2 %v7762_v32  ;;  %3053 = vmatmul.bf16.vlgmr.msrb.gmra.mxu3 %v7748_v10 }
 0x3b4   : > { %v8041_v47 = vadd.f32 %v2600_v61, %v2502_v45  ;;  %3152 = vmatmul.bf16.vlgmr.msra.gmra.mxu0 %v7762_v32  ;;  %3251 = vmatmul.bf16.vlgmr.msra.gmra.mxu1 %v7748_v10  ;;  %v6306_v32 = vld [vmem:[#allocation19 + $0x64] sm:$0xf0]  ;;  %v8077_v11 = vpack.c.bf16 %v2674_v41, %v2672_v39 }
 0x3b5   : > { %v5748_v59 = vor.u32 %v6306_v32, %v5747_v18 }
 0x3b6   : > { %v2303_v14 = vpop.f32.mrf.mxu2  ;;  %v2402_v53 = vpop.f32.mrf.mxu3  ;;  %v2681_v41 = vmax.f32 %v8041_v47, 0.0 }
 0x3b7   : > { %v2304_v12 = vadd.f32 %v2303_v14, %v7729_v27  ;;  %3649 = vmatpush.bf16.msra.mxu2 %v5748_v59 }
 0x3b9   : > { %v8050_v42 = vadd.f32 %v2402_v53, %v2304_v12  ;;  %v2503_v0 = vpop.f32.mrf.mxu0  ;;  %v2602_v30 = vpop.f32.mrf.mxu1  ;;  %v2679_v12 = vmax.f32 %v8031_v50, 0.0 }
 0x3ba   : > { %v2504_v15 = vadd.f32 %v2503_v0, %v7720_v3 }
 0x3bc   : > { %v8055_v10 = vadd.f32 %v2602_v30, %v2504_v15  ;;  %v2677_v15 = vmax.f32 %v8019_v1, 0.0  ;;  %v2676_v1 = vmax.f32 %v8026_v29, 0.0  ;;  %v5804_v29 = vor.u32 %v6320_v63, %v5803_v31 }
 0x3be   : > { %v2305_v23 = vpop.f32.mrf.mxu2  ;;  %v2404_v60 = vpop.f32.mrf.mxu3  ;;  %v8093_v32 = vpack.c.bf16 %v2679_v12, %v2677_v15  ;;  %v2683_v40 = vmax.f32 %v8055_v10, 0.0  ;;  %3749 = vmatpush.bf16.msra.mxu3 %v5804_v29 }
 0x3bf   : > { %v2306_v2 = vadd.f32 %v2305_v23, %v7729_v27  ;;  %v2678_v23 = vmax.f32 %v8035_v17, 0.0 }
 0x3c0   : > { %v8117_v10 = vpack.c.bf16 %v2683_v40, %v2681_v41 }
 0x3c1   : > { %v8059_v37 = vadd.f32 %v2404_v60, %v2306_v2  ;;  %v2506_v7 = vpop.f32.mrf.mxu0  ;;  %v2605_v8 = vpop.f32.mrf.mxu1  ;;  %v8101_v35 = vpack.c.bf16 %v2678_v23, %v2676_v1 }
 0x3c2   : > { %v2507_v48 = vadd.f32 %v2506_v7, %v7720_v3 }
 0x3c3   : > { %2959 = vmatmul.bf16.gmra.mxu2 %v7865_v57  ;;  %3058 = vmatmul.bf16.gmra.mxu3 %v7853_v6 }
 0x3c4   : > { %v8065_v54 = vadd.f32 %v2605_v8, %v2507_v48  ;;  %3157 = vmatmul.bf16.gmra.mxu0 %v7865_v57  ;;  %3256 = vmatmul.bf16.gmra.mxu1 %v7853_v6  ;;  %v5739_v8 = vld [vmem:[#allocation19 + $0x50] sm:$0xf]  ;;  %v6304_v48 = vld [vmem:[#allocation19 + $0x54] sm:$0xf0] }
 0x3c5   : > { %v5740_v9 = vor.u32 %v6304_v48, %v5739_v8 }
 0x3c6   : > { %v2308_v19 = vpop.f32.mrf.mxu2  ;;  %v2407_v56 = vpop.f32.mrf.mxu3 }
 0x3c7   : > { %v2309_v38 = vadd.f32 %v2308_v19, %v7729_v27  ;;  %3650 = vmatpush.bf16.msra.mxu2 %v5740_v9 }
 0x3c9   : > { %v8074_v61 = vadd.f32 %v2407_v56, %v2309_v38  ;;  %v2508_v57 = vpop.f32.mrf.mxu0  ;;  %v2607_v45 = vpop.f32.mrf.mxu1 }
 0x3ca   : > { %v2509_v6 = vadd.f32 %v2508_v57, %v7720_v3  ;;  %v6303_v57 = vld [vmem:[#allocation19 + $0x54] sm:$0xf] }
 0x3cc   : > { %v8079_v14 = vadd.f32 %v2607_v45, %v2509_v6  ;;  %v5741_v45 = vld [vmem:[#allocation19 + $0x58] sm:$0xf0]  ;;  %v2682_v6 = vmax.f32 %v8059_v37, 0.0 }
 0x3ce   : > { %v2310_v53 = vpop.f32.mrf.mxu2  ;;  %v2409_v43 = vpop.f32.mrf.mxu3 }
 0x3cf   : > { %v2311_v21 = vadd.f32 %v2310_v53, %v7729_v27  ;;  %v5744_v53 = vor.u32 %v6303_v57, %v5741_v45  ;;  %v5731_v57 = vld [vmem:[#allocation19 + $0x40] sm:$0xf]  ;;  %v6302_v45 = vld [vmem:[#allocation19 + $0x44] sm:$0xf0] }
 0x3d1   : > { %v8083_v20 = vadd.f32 %v2409_v43, %v2311_v21  ;;  %v2511_v16 = vpop.f32.mrf.mxu0  ;;  %v2610_v0 = vpop.f32.mrf.mxu1  ;;  %v6319_v43 = vld [vmem:[#allocation19 + $0xd4] sm:$0xf]  ;;  %v5805_v21 = vld [vmem:[#allocation19 + $0xd8] sm:$0xf0]  ;;  %3848 = vmatpush.bf16.msrb.mxu0 %v5744_v53 }
 0x3d2   : > { %v2512_v30 = vadd.f32 %v2511_v16, %v7720_v3  ;;  %v5808_v12 = vor.u32 %v6319_v43, %v5805_v21  ;;  %v2680_v16 = vmax.f32 %v8050_v42, 0.0  ;;  %v5795_v21 = vld [vmem:[#allocation19 + $0xc0] sm:$0xf] }
 0x3d3   : > { %2964 = vmatmul.bf16.gmra.mxu2 %v7901_v5  ;;  %3063 = vmatmul.bf16.gmra.mxu3 %v7889_v46  ;;  %v2686_v48 = vmax.f32 %v8083_v20, 0.0 }
 0x3d4   : > { %v8089_v18 = vadd.f32 %v2610_v0, %v2512_v30  ;;  %3162 = vmatmul.bf16.gmra.mxu0 %v7901_v5  ;;  %3261 = vmatmul.bf16.gmra.mxu1 %v7889_v46  ;;  %v8125_v15 = vpack.c.bf16 %v2682_v6, %v2680_v16 }
 0x3d5   : > { %3947 = vmatpush.bf16.msrb.mxu1 %v5808_v12 }
 0x3d6   : > { %v2313_v50 = vpop.f32.mrf.mxu2  ;;  %v2412_v59 = vpop.f32.mrf.mxu3 }
 0x3d7   : > { %v2314_v60 = vadd.f32 %v2313_v50, %v7729_v27 }
 0x3d9   : > { %v8098_v22 = vadd.f32 %v2412_v59, %v2314_v60  ;;  %v2513_v26 = vpop.f32.mrf.mxu0  ;;  %v2612_v2 = vpop.f32.mrf.mxu1  ;;  %v2687_v60 = vmax.f32 %v8079_v14, 0.0 }
 0x3da   : > { %v2514_v34 = vadd.f32 %v2513_v26, %v7720_v3 }
 0x3dc   : > { %v8103_v5 = vadd.f32 %v2612_v2, %v2514_v34  ;;  %v2685_v34 = vmax.f32 %v8065_v54, 0.0  ;;  %v2684_v54 = vmax.f32 %v8074_v61, 0.0 }
 0x3de   : > { %v2315_v46 = vpop.f32.mrf.mxu2  ;;  %v2414_v7 = vpop.f32.mrf.mxu3  ;;  %v8149_v40 = vpack.c.bf16 %v2686_v48, %v2684_v54  ;;  %v2691_v20 = vmax.f32 %v8103_v5, 0.0  ;;  %v5732_v5 = vor.u32 %v6302_v45, %v5731_v57 }
 0x3df   : > { %v2316_v17 = vadd.f32 %v2315_v46, %v7729_v27 }
 0x3e0   : > { %3651 = vmatpush.bf16.msra.mxu2 %v5732_v5 }
 0x3e1   : > { %v8107_v19 = vadd.f32 %v2414_v7, %v2316_v17  ;;  %v2516_v56 = vpop.f32.mrf.mxu0  ;;  %v2615_v33 = vpop.f32.mrf.mxu1  ;;  %v8141_v7 = vpack.c.bf16 %v2687_v60, %v2685_v34  ;;  %v6317_v34 = vld [vmem:[#allocation19 + $0xc4] sm:$0xf] }
 0x3e2   : > { %v2517_v36 = vadd.f32 %v2516_v56, %v7720_v3 }
 0x3e3   : > { %2969 = vmatmul.bf16.gmra.mxu2 %v7937_v51  ;;  %3068 = vmatmul.bf16.gmra.mxu3 %v7925_v62  ;;  %v2690_v12 = vmax.f32 %v8107_v19, 0.0 }
 0x3e4   : > { %v8113_v38 = vadd.f32 %v2615_v33, %v2517_v36  ;;  %3167 = vmatmul.bf16.gmra.mxu0 %v7937_v51  ;;  %3266 = vmatmul.bf16.gmra.mxu1 %v7925_v62 }
 0x3e6   : > { %v2318_v4 = vpop.f32.mrf.mxu2  ;;  %v2417_v39 = vpop.f32.mrf.mxu3 }
 0x3e7   : > { %v2319_v47 = vadd.f32 %v2318_v4, %v7729_v27 }
 0x3e9   : > { %v8122_v0 = vadd.f32 %v2417_v39, %v2319_v47  ;;  %v2518_v51 = vpop.f32.mrf.mxu0  ;;  %v2617_v62 = vpop.f32.mrf.mxu1  ;;  %v2689_v39 = vmax.f32 %v8089_v18, 0.0  ;;  %v6318_v18 = vld [vmem:[#allocation19 + $0xc4] sm:$0xf0] }
 0x3ea   : > { %v2519_v30 = vadd.f32 %v2518_v51, %v7720_v3  ;;  %v5796_v51 = vor.u32 %v6318_v18, %v5795_v21 }
 0x3eb   : > { %v8165_v47 = vpack.c.bf16 %v2691_v20, %v2689_v39 }
 0x3ec   : > { %v8127_v50 = vadd.f32 %v2617_v62, %v2519_v30  ;;  %v2688_v62 = vmax.f32 %v8098_v22, 0.0  ;;  %3750 = vmatpush.bf16.msra.mxu3 %v5796_v51 }
 0x3ee   : > { %v2320_v37 = vpop.f32.mrf.mxu2  ;;  %v2419_v59 = vpop.f32.mrf.mxu3  ;;  %v8173_v60 = vpack.c.bf16 %v2690_v12, %v2688_v62  ;;  %v2695_v48 = vmax.f32 %v8127_v50, 0.0 }
 0x3ef   : > { %v2321_v23 = vadd.f32 %v2320_v37, %v7729_v27 }
 0x3f1   : > { %v8131_v1 = vadd.f32 %v2419_v59, %v2321_v23  ;;  %v2521_v42 = vpop.f32.mrf.mxu0  ;;  %v2620_v26 = vpop.f32.mrf.mxu1  ;;  %v6301_v59 = vld [vmem:[#allocation19 + $0x44] sm:$0xf]  ;;  %v5733_v23 = vld [vmem:[#allocation19 + $0x48] sm:$0xf0] }
 0x3f2   : > { %v2522_v2 = vadd.f32 %v2521_v42, %v7720_v3 }
 0x3f3   : > { %2974 = vmatmul.bf16.gmra.mxu2 %v7973_v52  ;;  %3073 = vmatmul.bf16.gmra.mxu3 %v7961_v25  ;;  %v2694_v20 = vmax.f32 %v8131_v1, 0.0 }
 0x3f4   : > { %v8137_v46 = vadd.f32 %v2620_v26, %v2522_v2  ;;  %3172 = vmatmul.bf16.gmra.mxu0 %v7973_v52  ;;  %3271 = vmatmul.bf16.gmra.mxu1 %v7961_v25  ;;  %v5736_v26 = vor.u32 %v6301_v59, %v5733_v23  ;;  %v5787_v23 = vld [vmem:[#allocation19 + $0xb0] sm:$0xf] }
 0x3f6   : > { %v2323_v14 = vpop.f32.mrf.mxu2  ;;  %v2422_v8 = vpop.f32.mrf.mxu3  ;;  %3849 = vmatpush.bf16.msrb.mxu0 %v5736_v26  ;;  %v2697_v12 = vmax.f32 %v8137_v46, 0.0  ;;  %v6316_v26 = vld [vmem:[#allocation19 + $0xb4] sm:$0xf0] }
 0x3f7   : > { %v2324_v17 = vadd.f32 %v2323_v14, %v7729_v27  ;;  %v5797_v14 = vld [vmem:[#allocation19 + $0xc8] sm:$0xf0] }
 0x3f9   : > { %v8146_v9 = vadd.f32 %v2422_v8, %v2324_v17  ;;  %v2523_v31 = vpop.f32.mrf.mxu0  ;;  %v2622_v63 = vpop.f32.mrf.mxu1  ;;  %v5800_v8 = vor.u32 %v6317_v34, %v5797_v14 }
 0x3fa   : > { %v2524_v29 = vadd.f32 %v2523_v31, %v7720_v3 }
 0x3fb   : > { %3948 = vmatpush.bf16.msrb.mxu1 %v5800_v8 }
 0x3fc   : > { %v8151_v52 = vadd.f32 %v2622_v63, %v2524_v29  ;;  %v2693_v29 = vmax.f32 %v8113_v38, 0.0  ;;  %v2692_v38 = vmax.f32 %v8122_v0, 0.0 }
 0x3fe   : > { %v2325_v25 = vpop.f32.mrf.mxu2  ;;  %v2424_v56 = vpop.f32.mrf.mxu3  ;;  %v8189_v50 = vpack.c.bf16 %v2695_v48, %v2693_v29  ;;  %v8197_v45 = vpack.c.bf16 %v2694_v20, %v2692_v38  ;;  %v2699_v1 = vmax.f32 %v8151_v52, 0.0 }
 0x3ff   : > { %v2326_v33 = vadd.f32 %v2325_v25, %v7729_v27 }
 0x400   : > { %v8213_v51 = vpack.c.bf16 %v2699_v1, %v2697_v12 }
 0x401   : > { %v8155_v36 = vadd.f32 %v2424_v56, %v2326_v33  ;;  %v2526_v41 = vpop.f32.mrf.mxu0  ;;  %v2625_v61 = vpop.f32.mrf.mxu1 }
 0x402   : > { %v2527_v4 = vadd.f32 %v2526_v41, %v7720_v3 }
 0x403   : > { %2979 = vmatmul.bf16.gmra.mxu2 %v8009_v13  ;;  %3078 = vmatmul.bf16.gmra.mxu3 %v7997_v24 }
 0x404   : > { %v8161_v6 = vadd.f32 %v2625_v61, %v2527_v4  ;;  %3177 = vmatmul.bf16.gmra.mxu0 %v8009_v13  ;;  %3276 = vmatmul.bf16.gmra.mxu1 %v7997_v24 }
 0x406   : > { %v2328_v53 = vpop.f32.mrf.mxu2  ;;  %v2427_v43 = vpop.f32.mrf.mxu3 }
 0x407   : > { %v2329_v16 = vadd.f32 %v2328_v53, %v7729_v27 }
 0x409   : > { %v8170_v30 = vadd.f32 %v2427_v43, %v2329_v16  ;;  %v2528_v13 = vpop.f32.mrf.mxu0  ;;  %v2627_v37 = vpop.f32.mrf.mxu1 }
 0x40a   : > { %v2529_v24 = vadd.f32 %v2528_v13, %v7720_v3  ;;  %v5723_v13 = vld [vmem:[#allocation19 + $0x30] sm:$0xf] }
 0x40c   : > { %v8175_v42 = vadd.f32 %v2627_v37, %v2529_v24  ;;  %v6300_v37 = vld [vmem:[#allocation19 + $0x34] sm:$0xf0]  ;;  %v2698_v24 = vmax.f32 %v8155_v36, 0.0  ;;  %v2780_v36 = vld [vmem:[%s8982_s14] sm:$0x3]  ;;  %s4880_s14 = sshll.u32 %s4876_s12, 4  ;;  %s4881_s14 = int_to_ptr.hbm [resolvable:$true] %s4880_s14 }
 0x40d   : > { %v5724_v59 = vor.u32 %v6300_v37, %v5723_v13  ;;  %s7024_s20 = sshra.s32 %s4881_s14, 4  ;;  %s7025_s20 = int_to_ptr.hbm [resolvable:$true] %s7024_s20 }
 0x40e   : > { %v2330_v19 = vpop.f32.mrf.mxu2  ;;  %v2429_v2 = vpop.f32.mrf.mxu3  ;;  %p7031_p7 = scmp.lt.s32.totalorder %s7025_s20, %s8987_s10 }
 0x40f   : > { %v2331_v22 = vadd.f32 %v2330_v19, %v7729_v27  ;;  %v5788_v19 = vor.u32 %v6316_v26, %v5787_v23  ;;  %3652 = vmatpush.bf16.msra.mxu2 %v5724_v59 }
 0x411   : > { %v8179_v17 = vadd.f32 %v2429_v2, %v2331_v22  ;;  %v2531_v54 = vpop.f32.mrf.mxu0  ;;  %v2630_v31 = vpop.f32.mrf.mxu1  ;;  %v2696_v2 = vmax.f32 %v8146_v9, 0.0  ;;  %3751 = vmatpush.bf16.msra.mxu3 %v5788_v19  ;;  %v6299_v9 = vld [vmem:[#allocation19 + $0x34] sm:$0xf] }
 0x412   : > { %v2532_v63 = vadd.f32 %v2531_v54, %v7720_v3 }
 0x413   : > { %2984 = vmatmul.bf16.gmra.mxu2 %v8029_v58  ;;  %3083 = vmatmul.bf16.gmra.mxu3 %v8021_v28  ;;  %v8224_v22 = vpack.c.bf16 %v2698_v24, %v2696_v2 }
 0x414   : > { %v8185_v25 = vadd.f32 %v2630_v31, %v2532_v63  ;;  %3182 = vmatmul.bf16.gmra.mxu0 %v8029_v58  ;;  %3281 = vmatmul.bf16.gmra.mxu1 %v8021_v28  ;;  %v8228_v31 = vperm.slane %v2780_v36, 1  ;;  %v5725_v63 = vld [vmem:[#allocation19 + $0x38] sm:$0xf0] }
 0x416   : > { %v2333_v56 = vpop.f32.mrf.mxu2  ;;  %v2432_v33 = vpop.f32.mrf.mxu3 }
 0x417   : > { %v2334_v41 = vadd.f32 %v2333_v56, %v7729_v27  ;;  %v5728_v56 = vor.u32 %v6299_v9, %v5725_v63 }
 0x419   : > { %v8194_v61 = vadd.f32 %v2432_v33, %v2334_v41  ;;  %v2533_v4 = vpop.f32.mrf.mxu0  ;;  %v2632_v39 = vpop.f32.mrf.mxu1  ;;  %v6315_v33 = vld [vmem:[#allocation19 + $0xb4] sm:$0xf]  ;;  %v2703_v41 = vmax.f32 %v8175_v42, 0.0  ;;  %3850 = vmatpush.bf16.msrb.mxu0 %v5728_v56 }
 0x41a   : > { %v2534_v57 = vadd.f32 %v2533_v4, %v7720_v3 }
 0x41c   : > { %v8199_v58 = vadd.f32 %v2632_v39, %v2534_v57 }
 0x41e   : > { %v2335_v28 = vpop.f32.mrf.mxu2  ;;  %v2434_v5 = vpop.f32.mrf.mxu3 }
 0x41f   : > { %v2336_v53 = vadd.f32 %v2335_v28, %v7729_v27  ;;  %v2701_v28 = vmax.f32 %v8161_v6, 0.0  ;;  %v2700_v6 = vmax.f32 %v8170_v30, 0.0 }
 0x421   : > { %v8203_v43 = vadd.f32 %v2434_v5, %v2336_v53  ;;  %v2536_v21 = vpop.f32.mrf.mxu0  ;;  %v2635_v0 = vpop.f32.mrf.mxu1  ;;  %v8242_v42 = vpack.c.bf16 %v2703_v41, %v2701_v28 }
 0x422   : > { %v2537_v18 = vadd.f32 %v2536_v21, %v7720_v3  ;;  %v2702_v21 = vmax.f32 %v8179_v17, 0.0  ;;  %v2707_v17 = vmax.f32 %v8199_v58, 0.0 }
 0x423   : > { %2989 = vmatmul.bf16.gmra.mxu2 %v8053_v49  ;;  %3088 = vmatmul.bf16.gmra.mxu3 %v8045_v55 }
 0x424   : > { %v8209_v16 = vadd.f32 %v2635_v0, %v2537_v18  ;;  %3187 = vmatmul.bf16.gmra.mxu0 %v8053_v49  ;;  %3286 = vmatmul.bf16.gmra.mxu1 %v8045_v55  ;;  %v8248_v13 = vpack.c.bf16 %v2702_v21, %v2700_v6 }
 0x426   : > { %v2338_v52 = vpop.f32.mrf.mxu2  ;;  %v2437_v62 = vpop.f32.mrf.mxu3 }
 0x427   : > { %v2339_v46 = vadd.f32 %v2338_v52, %v7729_v27 }
 0x429   : > { %v8218_v34 = vadd.f32 %v2437_v62, %v2339_v46  ;;  %v2538_v49 = vpop.f32.mrf.mxu0  ;;  %v2637_v55 = vpop.f32.mrf.mxu1 }
 0x42a   : > { %v2539_v14 = vadd.f32 %v2538_v49, %v7720_v3  ;;  %v5789_v3 = vld [vmem:[#allocation19 + $0xb8] sm:$0xf0]  ;;  %v2705_v49 = vmax.f32 %v8185_v25, 0.0  ;;  %v2706_v25 = vmax.f32 %v8203_v43, 0.0  ;;  %v5779_v43 = vld [vmem:[#allocation19 + $0xa0] sm:$0xf] }
 0x42b   : > { %v5792_v20 = vor.u32 %v6315_v33, %v5789_v3 }
 0x42c   : > { %v8226_v8 = vadd.f32 %v2637_v55, %v2539_v14 }
 0x42d   : > { %3949 = vmatpush.bf16.msrb.mxu1 %v5792_v20  ;;  %v5715_v20 = vld [vmem:[#allocation19 + $0x20] sm:$0xf] }
 0x42e   : > { %v2340_v48 = vpop.f32.mrf.mxu2  ;;  %v2439_v54 = vpop.f32.mrf.mxu3 }
 0x42f   : > { %v2341_v29 = vadd.f32 %v2340_v48, %v7729_v27  ;;  %v8238_v27 = vperm.slane %v2780_v36, 0  ;;  %v8264_v48 = vpack.c.bf16 %v2707_v17, %v2705_v49 }
 0x431   : > { %v8232_v38 = vadd.f32 %v2439_v54, %v2341_v29  ;;  %v3153_v4 = vpop.f32.mrf.mxu0  ;;  %v3252_v39 = vpop.f32.mrf.mxu1  ;;  %v2704_v29 = vmax.f32 %v8194_v61, 0.0 }
 0x432   : > { %v3154_v57 = vadd.f32 %v3153_v4, %v8228_v31 }
 0x433   : > { %2994 = vmatmul.bf16.gmra.mxu2 %v8077_v11  ;;  %3093 = vmatmul.bf16.gmra.mxu3 %v8069_v44  ;;  %v8272_v41 = vpack.c.bf16 %v2706_v25, %v2704_v29 }
 0x434   : > { %v3253_v5 = vadd.f32 %v3252_v39, %v3154_v57  ;;  %3192 = vmatmul.bf16.gmra.mxu0 %v8077_v11  ;;  %3291 = vmatmul.bf16.gmra.mxu1 %v8069_v44 }
 0x436   : > { %v2955_v53 = vpop.f32.mrf.mxu2  ;;  %v3054_v1 = vpop.f32.mrf.mxu3  ;;  %v3343_v37 = vmax.f32 %v3253_v5, 0.0  ;;  %v6314_v5 = vld [vmem:[#allocation19 + $0xa4] sm:$0xf0] }
 0x437   : > { %v2956_v0 = vadd.f32 %v2955_v53, %v8238_v27  ;;  %v5780_v53 = vor.u32 %v6314_v5, %v5779_v43 }
 0x439   : > { %v3055_v18 = vadd.f32 %v3054_v1, %v2956_v0  ;;  %v3155_v12 = vpop.f32.mrf.mxu0  ;;  %v3254_v52 = vpop.f32.mrf.mxu1  ;;  %v2711_v1 = vmax.f32 %v8226_v8, 0.0  ;;  %3752 = vmatpush.bf16.msra.mxu3 %v5780_v53  ;;  %v6296_v53 = vld [vmem:[#allocation19 + $0x14] sm:$0xf0] }
 0x43a   : > { %v3156_v62 = vadd.f32 %v3155_v12, %v8228_v31  ;;  %v2709_v12 = vmax.f32 %v8209_v16, 0.0  ;;  %v5781_v16 = vld [vmem:[#allocation19 + $0xa8] sm:$0xf0] }
 0x43b   : > { %v3342_v55 = vmax.f32 %v3055_v18, 0.0 }
 0x43c   : > { %v3255_v11 = vadd.f32 %v3254_v52, %v3156_v62  ;;  %v6297_v52 = vld [vmem:[#allocation19 + $0x24] sm:$0xf]  ;;  %v5717_v62 = vld [vmem:[#allocation19 + $0x28] sm:$0xf0] }
 0x43d   : > { %v5720_v8 = vor.u32 %v6297_v52, %v5717_v62 }
 0x43e   : > { %v3345_v44 = vmax.f32 %v3255_v11, 0.0  ;;  %v2957_v24 = vpop.f32.mrf.mxu2  ;;  %v3056_v46 = vpop.f32.mrf.mxu3 }
 0x43f   : > { %v2958_v59 = vadd.f32 %v2957_v24, %v8238_v27  ;;  %3851 = vmatpush.bf16.msrb.mxu0 %v5720_v8 }
 0x440   : > { %v8251_v23 = vpack.c.bf16 %v3345_v44, %v3343_v37  ;;  %v8288_v37 = vpack.c.bf16 %v2711_v1, %v2709_v12 }
 0x441   : > { %v3057_v26 = vadd.f32 %v3056_v46, %v2958_v59  ;;  %v3158_v30 = vpop.f32.mrf.mxu0  ;;  %v3257_v19 = vpop.f32.mrf.mxu1  ;;  %v6313_v46 = vld [vmem:[#allocation19 + $0xa4] sm:$0xf]  ;;  %v2710_v59 = vmax.f32 %v8232_v38, 0.0 }
 0x442   : > { %v3159_v2 = vadd.f32 %v3158_v30, %v8228_v31  ;;  %v2708_v30 = vmax.f32 %v8218_v34, 0.0 }
 0x443   : > { %v3344_v14 = vmax.f32 %v3057_v26, 0.0  ;;  %2999 = vmatmul.bf16.gmra.mxu2 %v8101_v35  ;;  %3098 = vmatmul.bf16.gmra.mxu3 %v8093_v32  ;;  %v5784_v26 = vor.u32 %v6313_v46, %v5781_v16 }
 0x444   : > { %v8258_v36 = vadd.f32 %v3257_v19, %v3159_v2  ;;  %3197 = vmatmul.bf16.gmra.mxu0 %v8101_v35  ;;  %3296 = vmatmul.bf16.gmra.mxu1 %v8093_v32  ;;  %v6298_v32 = vld [vmem:[#allocation19 + $0x24] sm:$0xf0]  ;;  %v8296_v49 = vpack.c.bf16 %v2710_v59, %v2708_v30  ;;  %v6295_v59 = vld [vmem:[#allocation19 + $0x14] sm:$0xf] }
 0x445   : > { %v8262_v58 = vpack.c.bf16 %v3344_v14, %v3342_v55  ;;  %v5716_v39 = vor.u32 %v6298_v32, %v5715_v20  ;;  %3950 = vmatpush.bf16.msrb.mxu1 %v5784_v26 }
 0x446   : > { %v2960_v54 = vpop.f32.mrf.mxu2  ;;  %v3059_v9 = vpop.f32.mrf.mxu3 }
 0x447   : > { %v2961_v63 = vadd.f32 %v2960_v54, %v8238_v27  ;;  %3653 = vmatpush.bf16.msra.mxu2 %v5716_v39 }
 0x449   : > { %v8269_v56 = vadd.f32 %v3059_v9, %v2961_v63  ;;  %v3160_v33 = vpop.f32.mrf.mxu0  ;;  %v3259_v3 = vpop.f32.mrf.mxu1 }
 0x44a   : > { %v3161_v35 = vadd.f32 %v3160_v33, %v8228_v31 }
 0x44c   : > { %v8274_v4 = vadd.f32 %v3259_v3, %v3161_v35 }
 0x44e   : > { %v2962_v57 = vpop.f32.mrf.mxu2  ;;  %v3061_v28 = vpop.f32.mrf.mxu3 }
 0x44f   : > { %v2963_v61 = vadd.f32 %v2962_v57, %v8238_v27 }
 0x451   : > { %v8278_v21 = vadd.f32 %v3061_v28, %v2963_v61  ;;  %v3163_v0 = vpop.f32.mrf.mxu0  ;;  %v3262_v6 = vpop.f32.mrf.mxu1  ;;  %v5707_v61 = vld [vmem:[#allocation19 + $0x10] sm:$0xf] }
 0x452   : > { %v3164_v18 = vadd.f32 %v3163_v0, %v8228_v31  ;;  %v5708_v1 = vor.u32 %v6296_v53, %v5707_v61  ;;  %v6312_v0 = vld [vmem:[#allocation19 + $0x94] sm:$0xf0] }
 0x453   : > { %3004 = vmatmul.bf16.gmra.mxu2 %v8125_v15  ;;  %3103 = vmatmul.bf16.gmra.mxu3 %v8117_v10  ;;  %v3348_v26 = vmax.f32 %v8278_v21, 0.0 }
 0x454   : > { %v8284_v11 = vadd.f32 %v3262_v6, %v3164_v18  ;;  %3202 = vmatmul.bf16.gmra.mxu0 %v8125_v15  ;;  %3301 = vmatmul.bf16.gmra.mxu1 %v8117_v10  ;;  %v3349_v18 = vmax.f32 %v8274_v4, 0.0 }
 0x455   : > { %3654 = vmatpush.bf16.msra.mxu2 %v5708_v1 }
 0x456   : > { %v2965_v44 = vpop.f32.mrf.mxu2  ;;  %v3064_v24 = vpop.f32.mrf.mxu3 }
 0x457   : > { %v2966_v17 = vadd.f32 %v2965_v44, %v8238_v27  ;;  %v3347_v44 = vmax.f32 %v8258_v36, 0.0 }
 0x459   : > { %v8293_v19 = vadd.f32 %v3064_v24, %v2966_v17  ;;  %v3165_v15 = vpop.f32.mrf.mxu0  ;;  %v3264_v2 = vpop.f32.mrf.mxu1  ;;  %v8328_v4 = vpack.c.bf16 %v3349_v18, %v3347_v44  ;;  %v5709_v17 = vld [vmem:[#allocation19 + $0x18] sm:$0xf0] }
 0x45a   : > { %v3166_v10 = vadd.f32 %v3165_v15, %v8228_v31  ;;  %v5712_v30 = vor.u32 %v6295_v59, %v5709_v17  ;;  %v6311_v15 = vld [vmem:[#allocation19 + $0x94] sm:$0xf]  ;;  %v5699_v59 = vld [vmem:[#allocation19] sm:$0xf]  ;;  %v6294_v17 = vld [vmem:[#allocation19 + $0x4] sm:$0xf0] }
 0x45c   : > { %v8298_v55 = vadd.f32 %v3264_v2, %v3166_v10  ;;  %v5773_v2 = vld [vmem:[#allocation19 + $0x98] sm:$0xf0]  ;;  %3852 = vmatpush.bf16.msrb.mxu0 %v5712_v30 }
 0x45d   : > { %v5776_v10 = vor.u32 %v6311_v15, %v5773_v2  ;;  %v5763_v2 = vld [vmem:[#allocation19 + $0x80] sm:$0xf] }
 0x45e   : > { %v2967_v14 = vpop.f32.mrf.mxu2  ;;  %v3066_v54 = vpop.f32.mrf.mxu3 }
 0x45f   : > { %v2968_v38 = vadd.f32 %v2967_v14, %v8238_v27  ;;  %v3346_v14 = vmax.f32 %v8269_v56, 0.0  ;;  %3951 = vmatpush.bf16.msrb.mxu1 %v5776_v10 }
 0x461   : > { %v8301_v9 = vadd.f32 %v3066_v54, %v2968_v38  ;;  %v3168_v25 = vpop.f32.mrf.mxu0  ;;  %v3267_v63 = vpop.f32.mrf.mxu1 }
 0x462   : > { %v3169_v34 = vadd.f32 %v3168_v25, %v8228_v31  ;;  %v8336_v25 = vpack.c.bf16 %v3348_v26, %v3346_v14 }
 0x463   : > { %3009 = vmatmul.bf16.gmra.mxu2 %v8149_v40  ;;  %3108 = vmatmul.bf16.gmra.mxu3 %v8141_v7  ;;  %v3352_v53 = vmax.f32 %v8301_v9, 0.0 }
 0x464   : > { %v8306_v29 = vadd.f32 %v3267_v63, %v3169_v34  ;;  %3207 = vmatmul.bf16.gmra.mxu0 %v8149_v40  ;;  %3306 = vmatmul.bf16.gmra.mxu1 %v8141_v7  ;;  %v5771_v7 = vld [vmem:[#allocation19 + $0x90] sm:$0xf] }
 0x465   : > { %v5772_v6 = vor.u32 %v6312_v0, %v5771_v7 }
 0x466   : > { %v2970_v33 = vpop.f32.mrf.mxu2  ;;  %v3069_v3 = vpop.f32.mrf.mxu3 }
 0x467   : > { %v2971_v35 = vadd.f32 %v2970_v33, %v8238_v27  ;;  %3753 = vmatpush.bf16.msra.mxu3 %v5772_v6 }
 0x469   : > { %v8311_v20 = vadd.f32 %v3069_v3, %v2971_v35  ;;  %v3170_v32 = vpop.f32.mrf.mxu0  ;;  %v3269_v39 = vpop.f32.mrf.mxu1  ;;  %v3353_v3 = vmax.f32 %v8298_v55, 0.0 }
 0x46a   : > { %v3171_v57 = vadd.f32 %v3170_v32, %v8228_v31 }
 0x46c   : > { %v8314_v28 = vadd.f32 %v3269_v39, %v3171_v57  ;;  %v3351_v57 = vmax.f32 %v8284_v11, 0.0  ;;  %v3350_v11 = vmax.f32 %v8293_v19, 0.0 }
 0x46e   : > { %v2972_v43 = vpop.f32.mrf.mxu2  ;;  %v3071_v5 = vpop.f32.mrf.mxu3  ;;  %v8360_v18 = vpack.c.bf16 %v3352_v53, %v3350_v11  ;;  %v3357_v9 = vmax.f32 %v8314_v28, 0.0  ;;  %v5700_v28 = vor.u32 %v6294_v17, %v5699_v59 }
 0x46f   : > { %v2973_v40 = vadd.f32 %v2972_v43, %v8238_v27 }
 0x470   : > { %3655 = vmatpush.bf16.msra.mxu2 %v5700_v28 }
 0x471   : > { %v8318_v12 = vadd.f32 %v3071_v5, %v2973_v40  ;;  %v3173_v52 = vpop.f32.mrf.mxu0  ;;  %v3272_v62 = vpop.f32.mrf.mxu1  ;;  %v8352_v5 = vpack.c.bf16 %v3353_v3, %v3351_v57  ;;  %v6309_v57 = vld [vmem:[#allocation19 + $0x84] sm:$0xf] }
 0x472   : > { %v3174_v8 = vadd.f32 %v3173_v52, %v8228_v31 }
 0x473   : > { %3014 = vmatmul.bf16.gmra.mxu2 %v8173_v60  ;;  %3113 = vmatmul.bf16.gmra.mxu3 %v8165_v47  ;;  %v3356_v10 = vmax.f32 %v8318_v12, 0.0 }
 0x474   : > { %v8324_v24 = vadd.f32 %v3272_v62, %v3174_v8  ;;  %3212 = vmatmul.bf16.gmra.mxu0 %v8173_v60  ;;  %3311 = vmatmul.bf16.gmra.mxu1 %v8165_v47 }
 0x476   : > { %v2975_v46 = vpop.f32.mrf.mxu2  ;;  %v3074_v16 = vpop.f32.mrf.mxu3 }
 0x477   : > { %v2976_v36 = vadd.f32 %v2975_v46, %v8238_v27 }
 0x479   : > { %v8333_v54 = vadd.f32 %v3074_v16, %v2976_v36  ;;  %v3175_v60 = vpop.f32.mrf.mxu0  ;;  %v3274_v47 = vpop.f32.mrf.mxu1  ;;  %v3355_v16 = vmax.f32 %v8306_v29, 0.0  ;;  %v6310_v29 = vld [vmem:[#allocation19 + $0x84] sm:$0xf0] }
 0x47a   : > { %v3176_v38 = vadd.f32 %v3175_v60, %v8228_v31  ;;  %v5764_v60 = vor.u32 %v6310_v29, %v5763_v2 }
 0x47b   : > { %v8376_v36 = vpack.c.bf16 %v3357_v9, %v3355_v16 }
 0x47c   : > { %v8338_v63 = vadd.f32 %v3274_v47, %v3176_v38  ;;  %v3354_v47 = vmax.f32 %v8311_v20, 0.0  ;;  %3754 = vmatpush.bf16.msra.mxu3 %v5764_v60 }
 0x47e   : > { %v2977_v21 = vpop.f32.mrf.mxu2  ;;  %v3076_v34 = vpop.f32.mrf.mxu3  ;;  %v8384_v3 = vpack.c.bf16 %v3356_v10, %v3354_v47  ;;  %v3361_v53 = vmax.f32 %v8338_v63, 0.0 }
 0x47f   : > { %v2978_v33 = vadd.f32 %v2977_v21, %v8238_v27 }
 0x481   : > { %v8342_v35 = vadd.f32 %v3076_v34, %v2978_v33  ;;  %v3178_v56 = vpop.f32.mrf.mxu0  ;;  %v3277_v32 = vpop.f32.mrf.mxu1  ;;  %v6293_v34 = vld [vmem:[#allocation19 + $0x4] sm:$0xf]  ;;  %v5701_v33 = vld [vmem:[#allocation19 + $0x8] sm:$0xf0] }
 0x482   : > { %v3179_v39 = vadd.f32 %v3178_v56, %v8228_v31 }
 0x483   : > { %3019 = vmatmul.bf16.gmra.mxu2 %v8197_v45  ;;  %3118 = vmatmul.bf16.gmra.mxu3 %v8189_v50  ;;  %v3360_v9 = vmax.f32 %v8342_v35, 0.0 }
 0x484   : > { %v8348_v43 = vadd.f32 %v3277_v32, %v3179_v39  ;;  %3217 = vmatmul.bf16.gmra.mxu0 %v8197_v45  ;;  %3316 = vmatmul.bf16.gmra.mxu1 %v8189_v50  ;;  %v5704_v32 = vor.u32 %v6293_v34, %v5701_v33 }
 0x486   : > { %v2980_v55 = vpop.f32.mrf.mxu2  ;;  %v3079_v61 = vpop.f32.mrf.mxu3  ;;  %3853 = vmatpush.bf16.msrb.mxu0 %v5704_v32  ;;  %v3363_v10 = vmax.f32 %v8348_v43, 0.0 }
 0x487   : > { %v2981_v40 = vadd.f32 %v2980_v55, %v8238_v27  ;;  %v5765_v55 = vld [vmem:[#allocation19 + $0x88] sm:$0xf0] }
 0x489   : > { %v8357_v1 = vadd.f32 %v3079_v61, %v2981_v40  ;;  %v3180_v7 = vpop.f32.mrf.mxu0  ;;  %v3279_v0 = vpop.f32.mrf.mxu1  ;;  %v5768_v61 = vor.u32 %v6309_v57, %v5765_v55 }
 0x48a   : > { %v3181_v6 = vadd.f32 %v3180_v7, %v8228_v31 }
 0x48b   : > { %3952 = vmatpush.bf16.msrb.mxu1 %v5768_v61  ;;  %v3362_v43 = vmax.f32 %v8357_v1, 0.0 }
 0x48c   : > { %v8362_v45 = vadd.f32 %v3279_v0, %v3181_v6  ;;  %v3359_v6 = vmax.f32 %v8324_v24, 0.0  ;;  %v3358_v24 = vmax.f32 %v8333_v54, 0.0 }
 0x48e   : > { %v2982_v50 = vpop.f32.mrf.mxu2  ;;  %v3081_v52 = vpop.f32.mrf.mxu3  ;;  %v8400_v63 = vpack.c.bf16 %v3361_v53, %v3359_v6  ;;  %v8408_v17 = vpack.c.bf16 %v3360_v9, %v3358_v24  ;;  %v3365_v35 = vmax.f32 %v8362_v45, 0.0 }
 0x48f   : > { %v2983_v62 = vadd.f32 %v2982_v50, %v8238_v27 }
 0x490   : > { %v8424_v60 = vpack.c.bf16 %v3365_v35, %v3363_v10 }
 0x491   : > { %v8366_v8 = vadd.f32 %v3081_v52, %v2983_v62  ;;  %v3183_v44 = vpop.f32.mrf.mxu0  ;;  %v3282_v19 = vpop.f32.mrf.mxu1 }
 0x492   : > { %v3184_v46 = vadd.f32 %v3183_v44, %v8228_v31 }
 0x493   : > { %3024 = vmatmul.bf16.gmra.mxu2 %v8224_v22  ;;  %3123 = vmatmul.bf16.gmra.mxu3 %v8213_v51 }
 0x494   : > { %v8372_v26 = vadd.f32 %v3282_v19, %v3184_v46  ;;  %3222 = vmatmul.bf16.gmra.mxu0 %v8224_v22  ;;  %3321 = vmatmul.bf16.gmra.mxu1 %v8213_v51 }
 0x496   : > { %v2985_v30 = vpop.f32.mrf.mxu2  ;;  %v3084_v15 = vpop.f32.mrf.mxu3  ;;  %v3367_v53 = vmax.f32 %v8372_v26, 0.0 }
 0x497   : > { %v2986_v14 = vadd.f32 %v2985_v30, %v8238_v27 }
 0x499   : > { %v8381_v38 = vadd.f32 %v3084_v15, %v2986_v14  ;;  %v3185_v22 = vpop.f32.mrf.mxu0  ;;  %v3284_v21 = vpop.f32.mrf.mxu1 }
 0x49a   : > { %v3186_v51 = vadd.f32 %v3185_v22, %v8228_v31  ;;  %v3364_v22 = vmax.f32 %v8366_v8, 0.0 }
 0x49b   : > { %v3366_v26 = vmax.f32 %v8381_v38, 0.0 }
 0x49c   : > { %v8386_v56 = vadd.f32 %v3284_v21, %v3186_v51 }
 0x49e   : > { %v2987_v12 = vpop.f32.mrf.mxu2  ;;  %v3086_v39 = vpop.f32.mrf.mxu3  ;;  %v3369_v8 = vmax.f32 %v8386_v56, 0.0 }
 0x49f   : > { %v2988_v20 = vadd.f32 %v2987_v12, %v8238_v27  ;;  %v8432_v12 = vpack.c.bf16 %v3364_v22, %v3362_v43 }
 0x4a1   : > { %v8390_v40 = vadd.f32 %v3086_v39, %v2988_v20  ;;  %v3188_v11 = vpop.f32.mrf.mxu0  ;;  %v3287_v7 = vpop.f32.mrf.mxu1 }
 0x4a2   : > { %v3189_v0 = vadd.f32 %v3188_v11, %v8228_v31 }
 0x4a3   : > { %3029 = vmatmul.bf16.gmra.mxu2 %v8248_v13  ;;  %3128 = vmatmul.bf16.gmra.mxu3 %v8242_v42  ;;  %v3368_v6 = vmax.f32 %v8390_v40, 0.0 }
 0x4a4   : > { %v8396_v50 = vadd.f32 %v3287_v7, %v3189_v0  ;;  %3227 = vmatmul.bf16.gmra.mxu0 %v8248_v13  ;;  %3326 = vmatmul.bf16.gmra.mxu1 %v8242_v42  ;;  %v8448_v7 = vpack.c.bf16 %v3369_v8, %v3367_v53 }
 0x4a6   : > { %v2990_v52 = vpop.f32.mrf.mxu2  ;;  %v3089_v62 = vpop.f32.mrf.mxu3  ;;  %v3371_v35 = vmax.f32 %v8396_v50, 0.0 }
 0x4a7   : > { %v2991_v44 = vadd.f32 %v2990_v52, %v8238_v27 }
 0x4a9   : > { %v8405_v19 = vadd.f32 %v3089_v62, %v2991_v44  ;;  %v3190_v46 = vpop.f32.mrf.mxu0  ;;  %v3289_v16 = vpop.f32.mrf.mxu1 }
 0x4aa   : > { %v3191_v59 = vadd.f32 %v3190_v46, %v8228_v31  ;;  %v8456_v46 = vpack.c.bf16 %v3368_v6, %v3366_v26 }
 0x4ab   : > { %v3370_v50 = vmax.f32 %v8405_v19, 0.0 }
 0x4ac   : > { %v8410_v13 = vadd.f32 %v3289_v16, %v3191_v59 }
 0x4ae   : > { %v2992_v42 = vpop.f32.mrf.mxu2  ;;  %v3091_v28 = vpop.f32.mrf.mxu3  ;;  %v3373_v40 = vmax.f32 %v8410_v13, 0.0 }
 0x4af   : > { %v2993_v30 = vadd.f32 %v2992_v42, %v8238_v27 }
 0x4b1   : > { %v8414_v15 = vadd.f32 %v3091_v28, %v2993_v30  ;;  %v3193_v2 = vpop.f32.mrf.mxu0  ;;  %v3292_v54 = vpop.f32.mrf.mxu1 }
 0x4b2   : > { %v3194_v29 = vadd.f32 %v3193_v2, %v8228_v31 }
 0x4b3   : > { %3034 = vmatmul.bf16.gmra.mxu2 %v8272_v41  ;;  %3133 = vmatmul.bf16.gmra.mxu3 %v8264_v48  ;;  %v3372_v10 = vmax.f32 %v8414_v15, 0.0 }
 0x4b4   : > { %v8420_v14 = vadd.f32 %v3292_v54, %v3194_v29  ;;  %3232 = vmatmul.bf16.gmra.mxu0 %v8272_v41  ;;  %3331 = vmatmul.bf16.gmra.mxu1 %v8264_v48  ;;  %v8472_v54 = vpack.c.bf16 %v3373_v40, %v3371_v35 }
 0x4b6   : > { %v2995_v45 = vpop.f32.mrf.mxu2  ;;  %v3094_v47 = vpop.f32.mrf.mxu3  ;;  %v3375_v8 = vmax.f32 %v8420_v14, 0.0 }
 0x4b7   : > { %v2996_v21 = vadd.f32 %v2995_v45, %v8238_v27 }
 0x4b9   : > { %v8429_v51 = vadd.f32 %v3094_v47, %v2996_v21  ;;  %v3195_v34 = vpop.f32.mrf.mxu0  ;;  %v3294_v33 = vpop.f32.mrf.mxu1 }
 0x4ba   : > { %v3196_v32 = vadd.f32 %v3195_v34, %v8228_v31  ;;  %v8480_v34 = vpack.c.bf16 %v3372_v10, %v3370_v50 }
 0x4bb   : > { %v3374_v14 = vmax.f32 %v8429_v51, 0.0 }
 0x4bc   : > { %v8434_v41 = vadd.f32 %v3294_v33, %v3196_v32 }
 0x4be   : > { %v2997_v48 = vpop.f32.mrf.mxu2  ;;  %v3096_v39 = vpop.f32.mrf.mxu3  ;;  %v3377_v15 = vmax.f32 %v8434_v41, 0.0 }
 0x4bf   : > { %v2998_v57 = vadd.f32 %v2997_v48, %v8238_v27 }
 0x4c1   : > { %v8438_v55 = vadd.f32 %v3096_v39, %v2998_v57  ;;  %v3198_v20 = vpop.f32.mrf.mxu0  ;;  %v3297_v1 = vpop.f32.mrf.mxu1 }
 0x4c2   : > { %v3199_v61 = vadd.f32 %v3198_v20, %v8228_v31 }
 0x4c3   : > { %3039 = vmatmul.bf16.gmra.mxu2 %v8296_v49  ;;  %3138 = vmatmul.bf16.gmra.mxu3 %v8288_v37  ;;  %v3376_v53 = vmax.f32 %v8438_v55, 0.0 }
 0x4c4   : > { %v8444_v11 = vadd.f32 %v3297_v1, %v3199_v61  ;;  %3237 = vmatmul.bf16.gmra.mxu0 %v8296_v49  ;;  %3336 = vmatmul.bf16.gmra.mxu1 %v8288_v37  ;;  %v8496_v1 = vpack.c.bf16 %v3377_v15, %v3375_v8 }
 0x4c6   : > { %v3000_v56 = vpop.f32.mrf.mxu2  ;;  %v3099_v0 = vpop.f32.mrf.mxu3  ;;  %v3379_v40 = vmax.f32 %v8444_v11, 0.0 }
 0x4c7   : > { %v3001_v52 = vadd.f32 %v3000_v56, %v8238_v27 }
 0x4c9   : > { %v8453_v62 = vadd.f32 %v3099_v0, %v3001_v52  ;;  %v3200_v9 = vpop.f32.mrf.mxu0  ;;  %v3299_v44 = vpop.f32.mrf.mxu1 }
 0x4ca   : > { %v3201_v24 = vadd.f32 %v3200_v9, %v8228_v31  ;;  %v8504_v9 = vpack.c.bf16 %v3376_v53, %v3374_v14 }
 0x4cb   : > { %v3378_v11 = vmax.f32 %v8453_v62, 0.0 }
 0x4cc   : > { %v8458_v49 = vadd.f32 %v3299_v44, %v3201_v24 }
 0x4ce   : > { %v3002_v37 = vpop.f32.mrf.mxu2  ;;  %v3101_v16 = vpop.f32.mrf.mxu3  ;;  %v3381_v55 = vmax.f32 %v8458_v49, 0.0 }
 0x4cf   : > { %v3003_v59 = vadd.f32 %v3002_v37, %v8238_v27 }
 0x4d1   : > { %v8462_v42 = vadd.f32 %v3101_v16, %v3003_v59  ;;  %v3203_v28 = vpop.f32.mrf.mxu0  ;;  %v3302_v38 = vpop.f32.mrf.mxu1 }
 0x4d2   : > { %v3204_v30 = vadd.f32 %v3203_v28, %v8228_v31 }
 0x4d3   : > { %3656 = vmatmul.bf16.vlgmr.msra.gmra.mxu2 %v8262_v58  ;;  %3755 = vmatmul.bf16.vlgmr.msra.gmra.mxu3 %v8251_v23  ;;  %v3380_v35 = vmax.f32 %v8462_v42, 0.0 }
 0x4d4   : > { %v8468_v2 = vadd.f32 %v3302_v38, %v3204_v30  ;;  %3854 = vmatmul.bf16.vlgmr.msrb.gmra.mxu0 %v8262_v58  ;;  %3953 = vmatmul.bf16.vlgmr.msrb.gmra.mxu1 %v8251_v23  ;;  %v8520_v38 = vpack.c.bf16 %v3381_v55, %v3379_v40 }
 0x4d6   : > { %v3005_v13 = vpop.f32.mrf.mxu2  ;;  %v3104_v29 = vpop.f32.mrf.mxu3  ;;  %v3383_v15 = vmax.f32 %v8468_v2, 0.0 }
 0x4d7   : > { %v3006_v45 = vadd.f32 %v3005_v13, %v8238_v27 }
 0x4d9   : > { %v8477_v47 = vadd.f32 %v3104_v29, %v3006_v45  ;;  %v3205_v22 = vpop.f32.mrf.mxu0  ;;  %v3304_v21 = vpop.f32.mrf.mxu1 }
 0x4da   : > { %v3206_v43 = vadd.f32 %v3205_v22, %v8228_v31  ;;  %v8528_v22 = vpack.c.bf16 %v3380_v35, %v3378_v11 }
 0x4db   : > { %v3382_v2 = vmax.f32 %v8477_v47, 0.0 }
 0x4dc   : > { %v8482_v58 = vadd.f32 %v3304_v21, %v3206_v43 }
 0x4de   : > { %v3007_v23 = vpop.f32.mrf.mxu2  ;;  %v3106_v33 = vpop.f32.mrf.mxu3  ;;  %v3385_v42 = vmax.f32 %v8482_v58, 0.0 }
 0x4df   : > { %v3008_v32 = vadd.f32 %v3007_v23, %v8238_v27 }
 0x4e1   : > { %v8486_v48 = vadd.f32 %v3106_v33, %v3008_v32  ;;  %v3208_v39 = vpop.f32.mrf.mxu0  ;;  %v3307_v19 = vpop.f32.mrf.mxu1 }
 0x4e2   : > { %v3209_v57 = vadd.f32 %v3208_v39, %v8228_v31 }
 0x4e3   : > { %3661 = vmatmul.bf16.gmra.mxu2 %v8336_v25  ;;  %3760 = vmatmul.bf16.gmra.mxu3 %v8328_v4  ;;  %v3384_v8 = vmax.f32 %v8486_v48, 0.0 }
 0x4e4   : > { %v8492_v20 = vadd.f32 %v3307_v19, %v3209_v57  ;;  %3859 = vmatmul.bf16.gmra.mxu0 %v8336_v25  ;;  %3958 = vmatmul.bf16.gmra.mxu1 %v8328_v4  ;;  %v8544_v19 = vpack.c.bf16 %v3385_v42, %v3383_v15 }
 0x4e6   : > { %v3010_v41 = vpop.f32.mrf.mxu2  ;;  %v3109_v61 = vpop.f32.mrf.mxu3  ;;  %v3387_v55 = vmax.f32 %v8492_v20, 0.0 }
 0x4e7   : > { %v3011_v56 = vadd.f32 %v3010_v41, %v8238_v27 }
 0x4e9   : > { %v8501_v0 = vadd.f32 %v3109_v61, %v3011_v56  ;;  %v3210_v6 = vpop.f32.mrf.mxu0  ;;  %v3309_v52 = vpop.f32.mrf.mxu1 }
 0x4ea   : > { %v3211_v26 = vadd.f32 %v3210_v6, %v8228_v31  ;;  %v8552_v6 = vpack.c.bf16 %v3384_v8, %v3382_v2 }
 0x4eb   : > { %v3386_v20 = vmax.f32 %v8501_v0, 0.0 }
 0x4ec   : > { %v8506_v25 = vadd.f32 %v3309_v52, %v3211_v26 }
 0x4ee   : > { %v3012_v4 = vpop.f32.mrf.mxu2  ;;  %v3111_v44 = vpop.f32.mrf.mxu3  ;;  %v3389_v48 = vmax.f32 %v8506_v25, 0.0 }
 0x4ef   : > { %v3013_v24 = vadd.f32 %v3012_v4, %v8238_v27 }
 0x4f1   : > { %v8510_v37 = vadd.f32 %v3111_v44, %v3013_v24  ;;  %v3213_v16 = vpop.f32.mrf.mxu0  ;;  %v3312_v51 = vpop.f32.mrf.mxu1 }
 0x4f2   : > { %v3214_v59 = vadd.f32 %v3213_v16, %v8228_v31 }
 0x4f3   : > { %3666 = vmatmul.bf16.gmra.mxu2 %v8360_v18  ;;  %3765 = vmatmul.bf16.gmra.mxu3 %v8352_v5  ;;  %v3388_v40 = vmax.f32 %v8510_v37, 0.0 }
 0x4f4   : > { %v8516_v28 = vadd.f32 %v3312_v51, %v3214_v59  ;;  %3864 = vmatmul.bf16.gmra.mxu0 %v8360_v18  ;;  %3963 = vmatmul.bf16.gmra.mxu1 %v8352_v5  ;;  %v8568_v51 = vpack.c.bf16 %v3389_v48, %v3387_v55 }
 0x4f6   : > { %v3015_v49 = vpop.f32.mrf.mxu2  ;;  %v3114_v30 = vpop.f32.mrf.mxu3  ;;  %v3391_v42 = vmax.f32 %v8516_v28, 0.0 }
 0x4f7   : > { %v3016_v13 = vadd.f32 %v3015_v49, %v8238_v27 }
 0x4f9   : > { %v8525_v29 = vadd.f32 %v3114_v30, %v3016_v13  ;;  %v3215_v10 = vpop.f32.mrf.mxu0  ;;  %v3314_v45 = vpop.f32.mrf.mxu1 }
 0x4fa   : > { %v3216_v50 = vadd.f32 %v3215_v10, %v8228_v31  ;;  %v8576_v10 = vpack.c.bf16 %v3388_v40, %v3386_v20 }
 0x4fb   : > { %v3390_v28 = vmax.f32 %v8525_v29, 0.0 }
 0x4fc   : > { %v8530_v18 = vadd.f32 %v3314_v45, %v3216_v50 }
 0x4fe   : > { %v3017_v5 = vpop.f32.mrf.mxu2  ;;  %v3116_v21 = vpop.f32.mrf.mxu3  ;;  %v3393_v37 = vmax.f32 %v8530_v18, 0.0 }
 0x4ff   : > { %v3018_v43 = vadd.f32 %v3017_v5, %v8238_v27 }
 0x501   : > { %v8534_v23 = vadd.f32 %v3116_v21, %v3018_v43  ;;  %v3218_v33 = vpop.f32.mrf.mxu0  ;;  %v3317_v62 = vpop.f32.mrf.mxu1 }
 0x502   : > { %v3219_v32 = vadd.f32 %v3218_v33, %v8228_v31 }
 0x503   : > { %3671 = vmatmul.bf16.gmra.mxu2 %v8384_v3  ;;  %3770 = vmatmul.bf16.gmra.mxu3 %v8376_v36  ;;  %v3392_v15 = vmax.f32 %v8534_v23, 0.0 }
 0x504   : > { %v8540_v39 = vadd.f32 %v3317_v62, %v3219_v32  ;;  %3869 = vmatmul.bf16.gmra.mxu0 %v8384_v3  ;;  %3968 = vmatmul.bf16.gmra.mxu1 %v8376_v36  ;;  %v8592_v62 = vpack.c.bf16 %v3393_v37, %v3391_v42 }
 0x506   : > { %v3020_v58 = vpop.f32.mrf.mxu2  ;;  %v3119_v57 = vpop.f32.mrf.mxu3  ;;  %v3395_v48 = vmax.f32 %v8540_v39, 0.0 }
 0x507   : > { %v3021_v41 = vadd.f32 %v3020_v58, %v8238_v27 }
 0x509   : > { %v8549_v61 = vadd.f32 %v3119_v57, %v3021_v41  ;;  %v3220_v53 = vpop.f32.mrf.mxu0  ;;  %v3319_v56 = vpop.f32.mrf.mxu1 }
 0x50a   : > { %v3221_v14 = vadd.f32 %v3220_v53, %v8228_v31  ;;  %v8600_v53 = vpack.c.bf16 %v3392_v15, %v3390_v28 }
 0x50b   : > { %v3394_v39 = vmax.f32 %v8549_v61, 0.0 }
 0x50c   : > { %v8554_v3 = vadd.f32 %v3319_v56, %v3221_v14 }
 0x50e   : > { %v3022_v36 = vpop.f32.mrf.mxu2  ;;  %v3121_v52 = vpop.f32.mrf.mxu3  ;;  %v3397_v23 = vmax.f32 %v8554_v3, 0.0 }
 0x50f   : > { %v3023_v26 = vadd.f32 %v3022_v36, %v8238_v27 }
 0x511   : > { %v8558_v4 = vadd.f32 %v3121_v52, %v3023_v26  ;;  %v3223_v44 = vpop.f32.mrf.mxu0  ;;  %v3322_v47 = vpop.f32.mrf.mxu1 }
 0x512   : > { %v3224_v24 = vadd.f32 %v3223_v44, %v8228_v31 }
 0x513   : > { %3676 = vmatmul.bf16.gmra.mxu2 %v8408_v17  ;;  %3775 = vmatmul.bf16.gmra.mxu3 %v8400_v63  ;;  %v3396_v55 = vmax.f32 %v8558_v4, 0.0  ;;  %v6340_v4 = vld [vmem:[#allocation20 + $0x74] sm:$0xf0] }
 0x514   : > { %v8564_v16 = vadd.f32 %v3322_v47, %v3224_v24  ;;  %3874 = vmatmul.bf16.gmra.mxu0 %v8408_v17  ;;  %3973 = vmatmul.bf16.gmra.mxu1 %v8400_v63  ;;  %v8616_v47 = vpack.c.bf16 %v3397_v23, %v3395_v48 }
 0x516   : > { %v3025_v25 = vpop.f32.mrf.mxu2  ;;  %v3124_v59 = vpop.f32.mrf.mxu3 }
 0x517   : > { %v3026_v49 = vadd.f32 %v3025_v25, %v8238_v27 }
 0x519   : > { %v8573_v30 = vadd.f32 %v3124_v59, %v3026_v49  ;;  %v3225_v35 = vpop.f32.mrf.mxu0  ;;  %v3324_v13 = vpop.f32.mrf.mxu1 }
 0x51a   : > { %v3226_v11 = vadd.f32 %v3225_v35, %v8228_v31  ;;  %v8624_v35 = vpack.c.bf16 %v3396_v55, %v3394_v39 }
 0x51c   : > { %v8578_v17 = vadd.f32 %v3324_v13, %v3226_v11 }
 0x51e   : > { %v3027_v63 = vpop.f32.mrf.mxu2  ;;  %v3126_v45 = vpop.f32.mrf.mxu3 }
 0x51f   : > { %v3028_v50 = vadd.f32 %v3027_v63, %v8238_v27  ;;  %v5883_v63 = vld [vmem:[#allocation20 + $0x70] sm:$0xf] }
 0x521   : > { %v8582_v5 = vadd.f32 %v3126_v45, %v3028_v50  ;;  %v3228_v21 = vpop.f32.mrf.mxu0  ;;  %v3327_v0 = vpop.f32.mrf.mxu1  ;;  %v5947_v45 = vld [vmem:[#allocation20 + $0xf0] sm:$0xf]  ;;  %v3401_v50 = vmax.f32 %v8578_v17, 0.0 }
 0x522   : > { %v3229_v43 = vadd.f32 %v3228_v21, %v8228_v31 }
 0x523   : > { %3681 = vmatmul.bf16.gmra.mxu2 %v8432_v12  ;;  %3780 = vmatmul.bf16.gmra.mxu3 %v8424_v60 }
 0x524   : > { %v8588_v33 = vadd.f32 %v3327_v0, %v3229_v43  ;;  %3879 = vmatmul.bf16.gmra.mxu0 %v8432_v12  ;;  %3978 = vmatmul.bf16.gmra.mxu1 %v8424_v60  ;;  %v5884_v0 = vor.u32 %v6340_v4, %v5883_v63  ;;  %v6356_v43 = vld [vmem:[#allocation20 + $0xf4] sm:$0xf0] }
 0x526   : > { %v3030_v18 = vpop.f32.mrf.mxu2  ;;  %v3129_v32 = vpop.f32.mrf.mxu3  ;;  %4386 = vmatpush.bf16.msrb.mxu2 %v5884_v0 }
 0x527   : > { %v3031_v58 = vadd.f32 %v3030_v18, %v8238_v27  ;;  %v5948_v18 = vor.u32 %v6356_v43, %v5947_v45 }
 0x529   : > { %v8597_v57 = vadd.f32 %v3129_v32, %v3031_v58  ;;  %v3230_v8 = vpop.f32.mrf.mxu0  ;;  %v3329_v41 = vpop.f32.mrf.mxu1  ;;  %v3399_v32 = vmax.f32 %v8564_v16, 0.0  ;;  %4399 = vmatpush.bf16.msrb.mxu3 %v5948_v18 }
 0x52a   : > { %v3231_v2 = vadd.f32 %v3230_v8, %v8228_v31  ;;  %v3400_v8 = vmax.f32 %v8582_v5, 0.0  ;;  %v3482_v5 = vld [vmem:[%s8983_s21] sm:$0x3]  ;;  %s7026_s21 = scalar_lea.hbm %s7025_s20, 8 }
 0x52b   : > { %v8640_v17 = vpack.c.bf16 %v3401_v50, %v3399_v32  ;;  %v8655_v55 = vperm.slane %v3482_v5, 1  ;;  %p7027_p1 = scmp.ne.s32.totalorder %s7025_s20, %s7026_s21  ;;  %p7032_p9 = scmp.lt.s32.totalorder %s7030_s4, %s7026_s21 }
 0x52c   : > { %v8602_v12 = vadd.f32 %v3329_v41, %v3231_v2  ;;  %v6339_v41 = vld [vmem:[#allocation20 + $0x74] sm:$0xf]  ;;  %v5885_v2 = vld [vmem:[#allocation20 + $0x78] sm:$0xf0] }
 0x52d   : > { %p7028_p3 = pnand %p7027_p1, %p7400_p4  ;;  %p7033_p5 = por %p7032_p9, %p7031_p7 }
 0x52e   : > { %v3032_v60 = vpop.f32.mrf.mxu2  ;;  %v3131_v56 = vpop.f32.mrf.mxu3  ;;  %v3405_v39 = vmax.f32 %v8602_v12, 0.0 }
 0x52f   : > { %v3033_v14 = vadd.f32 %v3032_v60, %v8238_v27  ;;  %v6355_v60 = vld [vmem:[#allocation20 + $0xf4] sm:$0xf]  ;;  %p7029_p12 = pneg %p7028_p3 }
 0x531   : > { %v8606_v36 = vadd.f32 %v3131_v56, %v3033_v14  ;;  %v3233_v52 = vpop.f32.mrf.mxu0  ;;  %v3332_v29 = vpop.f32.mrf.mxu1  ;;  %v3398_v56 = vmax.f32 %v8573_v30, 0.0  ;;  %p7034_p8 = pnand %p7033_p5, %p7029_p12 }
 0x532   : > { %v3234_v26 = vadd.f32 %v3233_v52, %v8228_v31  ;;  %v5949_v52 = vld [vmem:[#allocation20 + $0xf8] sm:$0xf0] }
 0x533   : > { %3686 = vmatmul.bf16.gmra.mxu2 %v8456_v46  ;;  %3785 = vmatmul.bf16.gmra.mxu3 %v8448_v7  ;;  %v8651_v48 = vpack.c.bf16 %v3400_v8, %v3398_v56  ;;  %v3404_v4 = vmax.f32 %v8606_v36, 0.0  ;;  %v5875_v36 = vld [vmem:[#allocation20 + $0x60] sm:$0xf]  ;;  %v6338_v8 = vld [vmem:[#allocation20 + $0x64] sm:$0xf0] }
 0x534   : > { %v8612_v44 = vadd.f32 %v3332_v29, %v3234_v26  ;;  %3884 = vmatmul.bf16.gmra.mxu0 %v8456_v46  ;;  %3983 = vmatmul.bf16.gmra.mxu1 %v8448_v7  ;;  %v5952_v26 = vor.u32 %v6355_v60, %v5949_v52  ;;  %v5876_v60 = vor.u32 %v6338_v8, %v5875_v36 }
 0x536   : > { %v3035_v3 = vpop.f32.mrf.mxu2  ;;  %v3134_v24 = vpop.f32.mrf.mxu3  ;;  %4425 = vmatpush.bf16.msra.mxu1 %v5952_v26  ;;  %4387 = vmatpush.bf16.msrb.mxu2 %v5876_v60  ;;  %v6354_v26 = vld [vmem:[#allocation20 + $0xe4] sm:$0xf0] }
 0x537   : > { %v3036_v25 = vadd.f32 %v3035_v3, %v8238_v27 }
 0x539   : > { %v8621_v59 = vadd.f32 %v3134_v24, %v3036_v25  ;;  %v3235_v40 = vpop.f32.mrf.mxu0  ;;  %v3334_v49 = vpop.f32.mrf.mxu1 }
 0x53a   : > { %v3236_v20 = vadd.f32 %v3235_v40, %v8228_v31 }
 0x53c   : > { %v8626_v46 = vadd.f32 %v3334_v49, %v3236_v20 }
 0x53e   : > { %v3037_v7 = vpop.f32.mrf.mxu2  ;;  %v3136_v13 = vpop.f32.mrf.mxu3 }
 0x53f   : > { %v3038_v11 = vadd.f32 %v3037_v7, %v8238_v27  ;;  %v3403_v7 = vmax.f32 %v8588_v33, 0.0  ;;  %v3402_v33 = vmax.f32 %v8597_v57, 0.0 }
 0x541   : > { %v8630_v61 = vadd.f32 %v3136_v13, %v3038_v11  ;;  %v3238_v37 = vpop.f32.mrf.mxu0  ;;  %v3337_v21 = vpop.f32.mrf.mxu1  ;;  %v8665_v13 = vperm.slane %v3482_v5, 0  ;;  %v8675_v43 = vpack.c.bf16 %v3404_v4, %v3402_v33 }
 0x542   : > { %v3239_v42 = vadd.f32 %v3238_v37, %v8228_v31 }
 0x543   : > { %3691 = vmatmul.bf16.gmra.mxu2 %v8480_v34  ;;  %3790 = vmatmul.bf16.gmra.mxu3 %v8472_v54 }
 0x544   : > { %v8636_v15 = vadd.f32 %v3337_v21, %v3239_v42  ;;  %3889 = vmatmul.bf16.gmra.mxu0 %v8480_v34  ;;  %3988 = vmatmul.bf16.gmra.mxu1 %v8472_v54  ;;  %v5888_v54 = vor.u32 %v6339_v41, %v5885_v2 }
 0x546   : > { %v3040_v58 = vpop.f32.mrf.mxu2  ;;  %v3139_v28 = vpop.f32.mrf.mxu3  ;;  %4412 = vmatpush.bf16.msra.mxu0 %v5888_v54 }
 0x547   : > { %v3041_v16 = vadd.f32 %v3040_v58, %v8238_v27 }
 0x549   : > { %v8645_v14 = vadd.f32 %v3139_v28, %v3041_v16  ;;  %v3240_v34 = vpop.f32.mrf.mxu0  ;;  %v3339_v23 = vpop.f32.mrf.mxu1  ;;  %v3409_v16 = vmax.f32 %v8626_v46, 0.0 }
 0x54a   : > { %v3241_v29 = vadd.f32 %v3240_v34, %v8228_v31  ;;  %v3407_v34 = vmax.f32 %v8612_v44, 0.0 }
 0x54c   : > { %v8653_v3 = vadd.f32 %v3339_v23, %v3241_v29  ;;  %v5939_v29 = vld [vmem:[#allocation20 + $0xe0] sm:$0xf]  ;;  %v8685_v5 = vpack.c.bf16 %v3409_v16, %v3407_v34  ;;  %v3411_v16 = vmax.f32 %v8636_v15, 0.0 }
 0x54e   : > { %v3042_v30 = vpop.f32.mrf.mxu2  ;;  %v3141_v24 = vpop.f32.mrf.mxu3 }
 0x54f   : > { %v3043_v25 = vadd.f32 %v3042_v30, %v8238_v27  ;;  %v8669_v27 = vpack.c.bf16 %v3405_v39, %v3403_v7  ;;  %v3408_v39 = vmax.f32 %v8630_v61, 0.0 }
 0x551   : > { %v8659_v31 = vadd.f32 %v3141_v24, %v3043_v25  ;;  %v3855_v40 = vpop.f32.mrf.mxu0  ;;  %v3954_v49 = vpop.f32.mrf.mxu1  ;;  %v5940_v25 = vor.u32 %v6354_v26, %v5939_v29 }
 0x552   : > { %v3856_v20 = vadd.f32 %v3855_v40, %v8655_v55 }
 0x553   : > { %3696 = vmatmul.bf16.gmra.mxu2 %v8504_v9  ;;  %3795 = vmatmul.bf16.gmra.mxu3 %v8496_v1 }
 0x554   : > { %v3955_v11 = vadd.f32 %v3954_v49, %v3856_v20  ;;  %3894 = vmatmul.bf16.gmra.mxu0 %v8504_v9  ;;  %3993 = vmatmul.bf16.gmra.mxu1 %v8496_v1  ;;  %v6337_v20 = vld [vmem:[#allocation20 + $0x64] sm:$0xf] }
 0x555   : > { %4400 = vmatpush.bf16.msrb.mxu3 %v5940_v25 }
 0x556   : > { %v3657_v12 = vpop.f32.mrf.mxu2  ;;  %v3756_v63 = vpop.f32.mrf.mxu3  ;;  %v4045_v42 = vmax.f32 %v3955_v11, 0.0 }
 0x557   : > { %v3658_v45 = vadd.f32 %v3657_v12, %v8665_v13 }
 0x559   : > { %v3757_v50 = vadd.f32 %v3756_v63, %v3658_v45  ;;  %v3857_v37 = vpop.f32.mrf.mxu0  ;;  %v3956_v21 = vpop.f32.mrf.mxu1 }
 0x55a   : > { %v3858_v0 = vadd.f32 %v3857_v37, %v8655_v55  ;;  %v6353_v37 = vld [vmem:[#allocation20 + $0xe4] sm:$0xf] }
 0x55b   : > { %v4044_v23 = vmax.f32 %v3757_v50, 0.0 }
 0x55c   : > { %v3957_v9 = vadd.f32 %v3956_v21, %v3858_v0  ;;  %v5941_v21 = vld [vmem:[#allocation20 + $0xe8] sm:$0xf0] }
 0x55e   : > { %v4047_v1 = vmax.f32 %v3957_v9, 0.0  ;;  %v3659_v18 = vpop.f32.mrf.mxu2  ;;  %v3758_v32 = vpop.f32.mrf.mxu3 }
 0x55f   : > { %v3660_v58 = vadd.f32 %v3659_v18, %v8665_v13 }
 0x560   : > { %v4151_v28 = vadd.f32 %v4047_v1, %v4045_v42  ;;  %v5944_v1 = vor.u32 %v6353_v37, %v5941_v21  ;;  %v5867_v37 = vld [vmem:[#allocation20 + $0x50] sm:$0xf]  ;;  %v6336_v21 = vld [vmem:[#allocation20 + $0x54] sm:$0xf0] }
 0x561   : > { %v3759_v57 = vadd.f32 %v3758_v32, %v3660_v58  ;;  %v3860_v41 = vpop.f32.mrf.mxu0  ;;  %v3959_v2 = vpop.f32.mrf.mxu1  ;;  %v3413_v32 = vmax.f32 %v8653_v3, 0.0 }
 0x562   : > { %v3861_v56 = vadd.f32 %v3860_v41, %v8655_v55  ;;  %4426 = vmatpush.bf16.msra.mxu1 %v5944_v1 }
 0x563   : > { %v4046_v54 = vmax.f32 %v3759_v57, 0.0  ;;  %3701 = vmatmul.bf16.gmra.mxu2 %v8528_v22  ;;  %3800 = vmatmul.bf16.gmra.mxu3 %v8520_v38  ;;  %v8701_v60 = vpack.c.bf16 %v3413_v32, %v3411_v16 }
 0x564   : > { %v3960_v52 = vadd.f32 %v3959_v2, %v3861_v56  ;;  %3899 = vmatmul.bf16.gmra.mxu0 %v8528_v22  ;;  %3998 = vmatmul.bf16.gmra.mxu1 %v8520_v38  ;;  %v5877_v22 = vld [vmem:[#allocation20 + $0x68] sm:$0xf0]  ;;  %v3406_v38 = vmax.f32 %v8621_v59, 0.0 }
 0x565   : > { %v4116_v46 = vadd.f32 %v4046_v54, %v4044_v23  ;;  %v5880_v63 = vor.u32 %v6337_v20, %v5877_v22  ;;  %v3412_v23 = vmax.f32 %v8659_v31, 0.0 }
 0x566   : > { %v4049_v30 = vmax.f32 %v3960_v52, 0.0  ;;  %v3662_v24 = vpop.f32.mrf.mxu2  ;;  %v3761_v44 = vpop.f32.mrf.mxu3  ;;  %v8691_v33 = vpack.c.bf16 %v3408_v39, %v3406_v38  ;;  %v3410_v52 = vmax.f32 %v8645_v14, 0.0 }
 0x567   : > { %v3663_v40 = vadd.f32 %v3662_v24, %v8665_v13  ;;  %4413 = vmatpush.bf16.msra.mxu0 %v5880_v63 }
 0x568   : > { %v4152_v49 = vadd.f32 %v4151_v28, %v4049_v30 }
 0x569   : > { %v3762_v7 = vadd.f32 %v3761_v44, %v3663_v40  ;;  %v3862_v11 = vpop.f32.mrf.mxu0  ;;  %v3961_v12 = vpop.f32.mrf.mxu1 }
 0x56a   : > { %v3863_v4 = vadd.f32 %v3862_v11, %v8655_v55 }
 0x56b   : > { %v4048_v45 = vmax.f32 %v3762_v7, 0.0 }
 0x56c   : > { %v3962_v50 = vadd.f32 %v3961_v12, %v3863_v4 }
 0x56d   : > { %v4117_v61 = vadd.f32 %v4116_v46, %v4048_v45 }
 0x56e   : > { %v4051_v0 = vmax.f32 %v3962_v50, 0.0  ;;  %v3664_v9 = vpop.f32.mrf.mxu2  ;;  %v3763_v42 = vpop.f32.mrf.mxu3 }
 0x56f   : > { %v3665_v59 = vadd.f32 %v3664_v9, %v8665_v13 }
 0x570   : > { %v4153_v18 = vadd.f32 %v4152_v49, %v4051_v0  ;;  %v5931_v0 = vld [vmem:[#allocation20 + $0xd0] sm:$0xf] }
 0x571   : > { %v3764_v58 = vadd.f32 %v3763_v42, %v3665_v59  ;;  %v3865_v28 = vpop.f32.mrf.mxu0  ;;  %v3964_v36 = vpop.f32.mrf.mxu1  ;;  %v5868_v59 = vor.u32 %v6336_v21, %v5867_v37 }
 0x572   : > { %v3866_v8 = vadd.f32 %v3865_v28, %v8655_v55 }
 0x573   : > { %v4050_v57 = vmax.f32 %v3764_v58, 0.0  ;;  %3706 = vmatmul.bf16.gmra.mxu2 %v8552_v6  ;;  %3805 = vmatmul.bf16.gmra.mxu3 %v8544_v19 }
 0x574   : > { %v3965_v41 = vadd.f32 %v3964_v36, %v3866_v8  ;;  %3904 = vmatmul.bf16.gmra.mxu0 %v8552_v6  ;;  %4003 = vmatmul.bf16.gmra.mxu1 %v8544_v19  ;;  %v8707_v19 = vpack.c.bf16 %v3412_v23, %v3410_v52  ;;  %v5933_v52 = vld [vmem:[#allocation20 + $0xd8] sm:$0xf0] }
 0x575   : > { %v4118_v2 = vadd.f32 %v4117_v61, %v4050_v57  ;;  %4388 = vmatpush.bf16.msrb.mxu2 %v5868_v59 }
 0x576   : > { %v4053_v3 = vmax.f32 %v3965_v41, 0.0  ;;  %v3667_v56 = vpop.f32.mrf.mxu2  ;;  %v3766_v34 = vpop.f32.mrf.mxu3 }
 0x577   : > { %v3668_v15 = vadd.f32 %v3667_v56, %v8665_v13  ;;  %v6351_v56 = vld [vmem:[#allocation20 + $0xd4] sm:$0xf] }
 0x578   : > { %v4154_v54 = vadd.f32 %v4153_v18, %v4053_v3  ;;  %v6352_v18 = vld [vmem:[#allocation20 + $0xd4] sm:$0xf0]  ;;  %v5869_v3 = vld [vmem:[#allocation20 + $0x58] sm:$0xf0] }
 0x579   : > { %v3767_v46 = vadd.f32 %v3766_v34, %v3668_v15  ;;  %v3867_v29 = vpop.f32.mrf.mxu0  ;;  %v3966_v26 = vpop.f32.mrf.mxu1 }
 0x57a   : > { %v3868_v6 = vadd.f32 %v3867_v29, %v8655_v55  ;;  %v5936_v29 = vor.u32 %v6351_v56, %v5933_v52  ;;  %v5861_v52 = vld [vmem:[#allocation20 + $0x48] sm:$0xf0] }
 0x57b   : > { %v4052_v30 = vmax.f32 %v3767_v46, 0.0 }
 0x57c   : > { %v3967_v24 = vadd.f32 %v3966_v26, %v3868_v6  ;;  %4427 = vmatpush.bf16.msra.mxu1 %v5936_v29 }
 0x57d   : > { %v4119_v44 = vadd.f32 %v4118_v2, %v4052_v30  ;;  %v6335_v2 = vld [vmem:[#allocation20 + $0x54] sm:$0xf] }
 0x57e   : > { %v4055_v25 = vmax.f32 %v3967_v24, 0.0  ;;  %v3669_v39 = vpop.f32.mrf.mxu2  ;;  %v3768_v40 = vpop.f32.mrf.mxu3 }
 0x57f   : > { %v3670_v31 = vadd.f32 %v3669_v39, %v8665_v13 }
 0x580   : > { %v4155_v49 = vadd.f32 %v4154_v54, %v4055_v25  ;;  %v5872_v54 = vor.u32 %v6335_v2, %v5869_v3 }
 0x581   : > { %v3769_v20 = vadd.f32 %v3768_v40, %v3670_v31  ;;  %v3870_v22 = vpop.f32.mrf.mxu0  ;;  %v3969_v38 = vpop.f32.mrf.mxu1 }
 0x582   : > { %v3871_v14 = vadd.f32 %v3870_v22, %v8655_v55  ;;  %4414 = vmatpush.bf16.msra.mxu0 %v5872_v54  ;;  %v6333_v54 = vld [vmem:[#allocation20 + $0x44] sm:$0xf] }
 0x583   : > { %v4054_v7 = vmax.f32 %v3769_v20, 0.0  ;;  %3711 = vmatmul.bf16.gmra.mxu2 %v8576_v10  ;;  %3810 = vmatmul.bf16.gmra.mxu3 %v8568_v51 }
 0x584   : > { %v3970_v11 = vadd.f32 %v3969_v38, %v3871_v14  ;;  %3909 = vmatmul.bf16.gmra.mxu0 %v8576_v10  ;;  %4008 = vmatmul.bf16.gmra.mxu1 %v8568_v51  ;;  %v5932_v10 = vor.u32 %v6352_v18, %v5931_v0 }
 0x585   : > { %v4120_v12 = vadd.f32 %v4119_v44, %v4054_v7 }
 0x586   : > { %v4057_v63 = vmax.f32 %v3970_v11, 0.0  ;;  %v3672_v4 = vpop.f32.mrf.mxu2  ;;  %v3771_v45 = vpop.f32.mrf.mxu3  ;;  %4401 = vmatpush.bf16.msrb.mxu3 %v5932_v10  ;;  %v6334_v10 = vld [vmem:[#allocation20 + $0x44] sm:$0xf0] }
 0x587   : > { %v3673_v50 = vadd.f32 %v3672_v4, %v8665_v13 }
 0x588   : > { %v4156_v61 = vadd.f32 %v4155_v49, %v4057_v63 }
 0x589   : > { %v3772_v9 = vadd.f32 %v3771_v45, %v3673_v50  ;;  %v3872_v42 = vpop.f32.mrf.mxu0  ;;  %v3971_v1 = vpop.f32.mrf.mxu1 }
 0x58a   : > { %v3873_v32 = vadd.f32 %v3872_v42, %v8655_v55 }
 0x58b   : > { %v4056_v58 = vmax.f32 %v3772_v9, 0.0 }
 0x58c   : > { %v3972_v51 = vadd.f32 %v3971_v1, %v3873_v32  ;;  %v5859_v32 = vld [vmem:[#allocation20 + $0x40] sm:$0xf] }
 0x58d   : > { %v4121_v28 = vadd.f32 %v4120_v12, %v4056_v58 }
 0x58e   : > { %v4059_v36 = vmax.f32 %v3972_v51, 0.0  ;;  %v3674_v8 = vpop.f32.mrf.mxu2  ;;  %v3773_v16 = vpop.f32.mrf.mxu3 }
 0x58f   : > { %v3675_v57 = vadd.f32 %v3674_v8, %v8665_v13 }
 0x590   : > { %v4157_v41 = vadd.f32 %v4156_v61, %v4059_v36  ;;  %v5860_v36 = vor.u32 %v6334_v10, %v5859_v32 }
 0x591   : > { %v3774_v34 = vadd.f32 %v3773_v16, %v3675_v57  ;;  %v3875_v23 = vpop.f32.mrf.mxu0  ;;  %v3974_v15 = vpop.f32.mrf.mxu1 }
 0x592   : > { %v3876_v46 = vadd.f32 %v3875_v23, %v8655_v55  ;;  %4389 = vmatpush.bf16.msrb.mxu2 %v5860_v36 }
 0x593   : > { %v4058_v26 = vmax.f32 %v3774_v34, 0.0  ;;  %3716 = vmatmul.bf16.gmra.mxu2 %v8600_v53  ;;  %3815 = vmatmul.bf16.gmra.mxu3 %v8592_v62 }
 0x594   : > { %v3975_v6 = vadd.f32 %v3974_v15, %v3876_v46  ;;  %3914 = vmatmul.bf16.gmra.mxu0 %v8600_v53  ;;  %4013 = vmatmul.bf16.gmra.mxu1 %v8592_v62 }
 0x595   : > { %v4122_v30 = vadd.f32 %v4121_v28, %v4058_v26 }
 0x596   : > { %v4061_v24 = vmax.f32 %v3975_v6, 0.0  ;;  %v3677_v44 = vpop.f32.mrf.mxu2  ;;  %v3776_v25 = vpop.f32.mrf.mxu3  ;;  %v5864_v6 = vor.u32 %v6333_v54, %v5861_v52  ;;  %v6348_v54 = vld [vmem:[#allocation20 + $0xb4] sm:$0xf0] }
 0x597   : > { %v3678_v39 = vadd.f32 %v3677_v44, %v8665_v13 }
 0x598   : > { %v4158_v40 = vadd.f32 %v4157_v41, %v4061_v24  ;;  %v6350_v41 = vld [vmem:[#allocation20 + $0xc4] sm:$0xf0]  ;;  %4415 = vmatpush.bf16.msra.mxu0 %v5864_v6 }
 0x599   : > { %v3777_v31 = vadd.f32 %v3776_v25, %v3678_v39  ;;  %v3877_v49 = vpop.f32.mrf.mxu0  ;;  %v3976_v20 = vpop.f32.mrf.mxu1  ;;  %v6349_v39 = vld [vmem:[#allocation20 + $0xc4] sm:$0xf] }
 0x59a   : > { %v3878_v22 = vadd.f32 %v3877_v49, %v8655_v55 }
 0x59b   : > { %v4060_v38 = vmax.f32 %v3777_v31, 0.0 }
 0x59c   : > { %v3977_v14 = vadd.f32 %v3976_v20, %v3878_v22 }
 0x59d   : > { %v4123_v7 = vadd.f32 %v4122_v30, %v4060_v38 }
 0x59e   : > { %v4063_v53 = vmax.f32 %v3977_v14, 0.0  ;;  %v3679_v11 = vpop.f32.mrf.mxu2  ;;  %v3778_v62 = vpop.f32.mrf.mxu3 }
 0x59f   : > { %v3680_v12 = vadd.f32 %v3679_v11, %v8665_v13 }
 0x5a0   : > { %v4159_v63 = vadd.f32 %v4158_v40, %v4063_v53  ;;  %v5925_v40 = vld [vmem:[#allocation20 + $0xc8] sm:$0xf0] }
 0x5a1   : > { %v3779_v4 = vadd.f32 %v3778_v62, %v3680_v12  ;;  %v3880_v45 = vpop.f32.mrf.mxu0  ;;  %v3979_v50 = vpop.f32.mrf.mxu1  ;;  %v5928_v22 = vor.u32 %v6349_v39, %v5925_v40 }
 0x5a2   : > { %v3881_v61 = vadd.f32 %v3880_v45, %v8655_v55 }
 0x5a3   : > { %v4062_v37 = vmax.f32 %v3779_v4, 0.0  ;;  %3721 = vmatmul.bf16.gmra.mxu2 %v8624_v35  ;;  %3820 = vmatmul.bf16.gmra.mxu3 %v8616_v47 }
 0x5a4   : > { %v3980_v21 = vadd.f32 %v3979_v50, %v3881_v61  ;;  %3919 = vmatmul.bf16.gmra.mxu0 %v8624_v35  ;;  %4018 = vmatmul.bf16.gmra.mxu1 %v8616_v47  ;;  %v5923_v47 = vld [vmem:[#allocation20 + $0xc0] sm:$0xf] }
 0x5a5   : > { %v4124_v0 = vadd.f32 %v4123_v7, %v4062_v37  ;;  %v5924_v34 = vor.u32 %v6350_v41, %v5923_v47  ;;  %4428 = vmatpush.bf16.msra.mxu1 %v5928_v22  ;;  %v6347_v22 = vld [vmem:[#allocation20 + $0xb4] sm:$0xf] }
 0x5a6   : > { %v4065_v9 = vmax.f32 %v3980_v21, 0.0  ;;  %v3682_v42 = vpop.f32.mrf.mxu2  ;;  %v3781_v1 = vpop.f32.mrf.mxu3 }
 0x5a7   : > { %v3683_v59 = vadd.f32 %v3682_v42, %v8665_v13  ;;  %4402 = vmatpush.bf16.msrb.mxu3 %v5924_v34 }
 0x5a8   : > { %v4160_v18 = vadd.f32 %v4159_v63, %v4065_v9 }
 0x5a9   : > { %v3782_v58 = vadd.f32 %v3781_v1, %v3683_v59  ;;  %v3882_v51 = vpop.f32.mrf.mxu0  ;;  %v3981_v28 = vpop.f32.mrf.mxu1 }
 0x5aa   : > { %v3883_v8 = vadd.f32 %v3882_v51, %v8655_v55 }
 0x5ab   : > { %v4064_v16 = vmax.f32 %v3782_v58, 0.0 }
 0x5ac   : > { %v3982_v35 = vadd.f32 %v3981_v28, %v3883_v8 }
 0x5ad   : > { %v4125_v57 = vadd.f32 %v4124_v0, %v4064_v16 }
 0x5ae   : > { %v4067_v2 = vmax.f32 %v3982_v35, 0.0  ;;  %v3684_v3 = vpop.f32.mrf.mxu2  ;;  %v3783_v56 = vpop.f32.mrf.mxu3 }
 0x5af   : > { %v3685_v23 = vadd.f32 %v3684_v3, %v8665_v13  ;;  %v6332_v3 = vld [vmem:[#allocation20 + $0x34] sm:$0xf0] }
 0x5b0   : > { %v4161_v15 = vadd.f32 %v4160_v18, %v4067_v2  ;;  %v5851_v2 = vld [vmem:[#allocation20 + $0x30] sm:$0xf] }
 0x5b1   : > { %v3784_v46 = vadd.f32 %v3783_v56, %v3685_v23  ;;  %v3885_v29 = vpop.f32.mrf.mxu0  ;;  %v3984_v26 = vpop.f32.mrf.mxu1  ;;  %v5915_v56 = vld [vmem:[#allocation20 + $0xb0] sm:$0xf] }
 0x5b2   : > { %v3886_v30 = vadd.f32 %v3885_v29, %v8655_v55  ;;  %v5916_v29 = vor.u32 %v6348_v54, %v5915_v56 }
 0x5b3   : > { %v4066_v24 = vmax.f32 %v3784_v46, 0.0  ;;  %3726 = vmatmul.bf16.gmra.mxu2 %v8651_v48  ;;  %3825 = vmatmul.bf16.gmra.mxu3 %v8640_v17 }
 0x5b4   : > { %v3985_v44 = vadd.f32 %v3984_v26, %v3886_v30  ;;  %3924 = vmatmul.bf16.gmra.mxu0 %v8651_v48  ;;  %4023 = vmatmul.bf16.gmra.mxu1 %v8640_v17 }
 0x5b5   : > { %v4126_v25 = vadd.f32 %v4125_v57, %v4066_v24  ;;  %4403 = vmatpush.bf16.msrb.mxu3 %v5916_v29 }
 0x5b6   : > { %v4069_v31 = vmax.f32 %v3985_v44, 0.0  ;;  %v3687_v49 = vpop.f32.mrf.mxu2  ;;  %v3786_v20 = vpop.f32.mrf.mxu3 }
 0x5b7   : > { %v3688_v38 = vadd.f32 %v3687_v49, %v8665_v13  ;;  %v6331_v49 = vld [vmem:[#allocation20 + $0x34] sm:$0xf] }
 0x5b8   : > { %v4162_v14 = vadd.f32 %v4161_v15, %v4069_v31  ;;  %v5852_v15 = vor.u32 %v6332_v3, %v5851_v2  ;;  %v5843_v2 = vld [vmem:[#allocation20 + $0x20] sm:$0xf]  ;;  %v6330_v3 = vld [vmem:[#allocation20 + $0x24] sm:$0xf0] }
 0x5b9   : > { %v3787_v7 = vadd.f32 %v3786_v20, %v3688_v38  ;;  %v3887_v53 = vpop.f32.mrf.mxu0  ;;  %v3986_v11 = vpop.f32.mrf.mxu1  ;;  %v5853_v20 = vld [vmem:[#allocation20 + $0x38] sm:$0xf0] }
 0x5ba   : > { %v3888_v62 = vadd.f32 %v3887_v53, %v8655_v55  ;;  %4390 = vmatpush.bf16.msrb.mxu2 %v5852_v15  ;;  %v5856_v53 = vor.u32 %v6331_v49, %v5853_v20  ;;  %v5844_v15 = vor.u32 %v6330_v3, %v5843_v2  ;;  %v5845_v49 = vld [vmem:[#allocation20 + $0x28] sm:$0xf0] }
 0x5bb   : > { %v4068_v48 = vmax.f32 %v3787_v7, 0.0 }
 0x5bc   : > { %v3987_v17 = vadd.f32 %v3986_v11, %v3888_v62  ;;  %4416 = vmatpush.bf16.msra.mxu0 %v5856_v53 }
 0x5bd   : > { %v4127_v12 = vadd.f32 %v4126_v25, %v4068_v48 }
 0x5be   : > { %v3689_v63 = vpop.f32.mrf.mxu2  ;;  %v3788_v4 = vpop.f32.mrf.mxu3  ;;  %v4071_v37 = vmax.f32 %v3987_v17, 0.0  ;;  %4391 = vmatpush.bf16.msrb.mxu2 %v5844_v15 }
 0x5bf   : > { %v3690_v45 = vadd.f32 %v3689_v63, %v8665_v13 }
 0x5c0   : > { %v4163_v42 = vadd.f32 %v4162_v14, %v4071_v37 }
 0x5c1   : > { %v3890_v50 = vpop.f32.mrf.mxu0  ;;  %v3989_v61 = vpop.f32.mrf.mxu1  ;;  %v3789_v0 = vadd.f32 %v3788_v4, %v3690_v45 }
 0x5c2   : > { %v3891_v21 = vadd.f32 %v3890_v50, %v8655_v55 }
 0x5c3   : > { %3731 = vmatmul.bf16.gmra.mxu2 %v8675_v43  ;;  %3830 = vmatmul.bf16.gmra.mxu3 %v8669_v27  ;;  %v4070_v32 = vmax.f32 %v3789_v0, 0.0 }
 0x5c4   : > { %v3990_v9 = vadd.f32 %v3989_v61, %v3891_v21  ;;  %3929 = vmatmul.bf16.gmra.mxu0 %v8675_v43  ;;  %4028 = vmatmul.bf16.gmra.mxu1 %v8669_v27 }
 0x5c5   : > { %v4128_v16 = vadd.f32 %v4127_v12, %v4070_v32 }
 0x5c6   : > { %v4073_v1 = vmax.f32 %v3990_v9, 0.0  ;;  %v3692_v59 = vpop.f32.mrf.mxu2  ;;  %v3791_v18 = vpop.f32.mrf.mxu3 }
 0x5c7   : > { %v3693_v10 = vadd.f32 %v3692_v59, %v8665_v13 }
 0x5c8   : > { %v4164_v58 = vadd.f32 %v4163_v42, %v4073_v1 }
 0x5c9   : > { %v3792_v51 = vadd.f32 %v3791_v18, %v3693_v10  ;;  %v3892_v28 = vpop.f32.mrf.mxu0  ;;  %v3991_v36 = vpop.f32.mrf.mxu1 }
 0x5ca   : > { %v3893_v8 = vadd.f32 %v3892_v28, %v8655_v55 }
 0x5cb   : > { %v4072_v35 = vmax.f32 %v3792_v51, 0.0 }
 0x5cc   : > { %v3992_v47 = vadd.f32 %v3991_v36, %v3893_v8 }
 0x5cd   : > { %v4129_v57 = vadd.f32 %v4128_v16, %v4072_v35 }
 0x5ce   : > { %v3694_v43 = vpop.f32.mrf.mxu2  ;;  %v3793_v41 = vpop.f32.mrf.mxu3  ;;  %v4075_v52 = vmax.f32 %v3992_v47, 0.0 }
 0x5cf   : > { %v3695_v27 = vadd.f32 %v3694_v43, %v8665_v13 }
 0x5d0   : > { %v4165_v30 = vadd.f32 %v4164_v58, %v4075_v52 }
 0x5d1   : > { %v3895_v34 = vpop.f32.mrf.mxu0  ;;  %v3994_v23 = vpop.f32.mrf.mxu1  ;;  %v3794_v26 = vadd.f32 %v3793_v41, %v3695_v27 }
 0x5d2   : > { %v3896_v46 = vadd.f32 %v3895_v34, %v8655_v55 }
 0x5d3   : > { %3736 = vmatmul.bf16.gmra.mxu2 %v8691_v33  ;;  %3835 = vmatmul.bf16.gmra.mxu3 %v8685_v5  ;;  %v4074_v39 = vmax.f32 %v3794_v26, 0.0  ;;  %v5907_v26 = vld [vmem:[#allocation20 + $0xa0] sm:$0xf] }
 0x5d4   : > { %v3995_v6 = vadd.f32 %v3994_v23, %v3896_v46  ;;  %3934 = vmatmul.bf16.gmra.mxu0 %v8691_v33  ;;  %4033 = vmatmul.bf16.gmra.mxu1 %v8685_v5  ;;  %v5917_v33 = vld [vmem:[#allocation20 + $0xb8] sm:$0xf0] }
 0x5d5   : > { %v5920_v11 = vor.u32 %v6347_v22, %v5917_v33  ;;  %v4130_v62 = vadd.f32 %v4129_v57, %v4074_v39 }
 0x5d6   : > { %v4077_v24 = vmax.f32 %v3995_v6, 0.0  ;;  %v3697_v44 = vpop.f32.mrf.mxu2  ;;  %v3796_v25 = vpop.f32.mrf.mxu3  ;;  %v6346_v6 = vld [vmem:[#allocation20 + $0xa4] sm:$0xf0] }
 0x5d7   : > { %v3698_v40 = vadd.f32 %v3697_v44, %v8665_v13  ;;  %4429 = vmatpush.bf16.msra.mxu1 %v5920_v11  ;;  %v6345_v11 = vld [vmem:[#allocation20 + $0xa4] sm:$0xf] }
 0x5d8   : > { %v4166_v31 = vadd.f32 %v4165_v30, %v4077_v24 }
 0x5d9   : > { %v3797_v38 = vadd.f32 %v3796_v25, %v3698_v40  ;;  %v3897_v14 = vpop.f32.mrf.mxu0  ;;  %v3996_v7 = vpop.f32.mrf.mxu1  ;;  %v5908_v25 = vor.u32 %v6346_v6, %v5907_v26  ;;  %v5835_v26 = vld [vmem:[#allocation20 + $0x10] sm:$0xf]  ;;  %v6328_v6 = vld [vmem:[#allocation20 + $0x14] sm:$0xf0] }
 0x5da   : > { %v3898_v5 = vadd.f32 %v3897_v14, %v8655_v55 }
 0x5db   : > { %v4076_v48 = vmax.f32 %v3797_v38, 0.0  ;;  %4404 = vmatpush.bf16.msrb.mxu3 %v5908_v25 }
 0x5dc   : > { %v3997_v12 = vadd.f32 %v3996_v7, %v3898_v5 }
 0x5dd   : > { %v4131_v17 = vadd.f32 %v4130_v62, %v4076_v48  ;;  %v5909_v62 = vld [vmem:[#allocation20 + $0xa8] sm:$0xf0] }
 0x5de   : > { %v4079_v63 = vmax.f32 %v3997_v12, 0.0  ;;  %v3699_v4 = vpop.f32.mrf.mxu2  ;;  %v3798_v45 = vpop.f32.mrf.mxu3 }
 0x5df   : > { %v3700_v50 = vadd.f32 %v3699_v4, %v8665_v13 }
 0x5e0   : > { %v4167_v61 = vadd.f32 %v4166_v31, %v4079_v63  ;;  %v6329_v31 = vld [vmem:[#allocation20 + $0x24] sm:$0xf]  ;;  %v5912_v63 = vor.u32 %v6345_v11, %v5909_v62  ;;  %v5901_v62 = vld [vmem:[#allocation20 + $0x98] sm:$0xf0] }
 0x5e1   : > { %v3900_v37 = vpop.f32.mrf.mxu0  ;;  %v3999_v21 = vpop.f32.mrf.mxu1  ;;  %v3799_v9 = vadd.f32 %v3798_v45, %v3700_v50  ;;  %v5848_v14 = vor.u32 %v6329_v31, %v5845_v49 }
 0x5e2   : > { %v3901_v0 = vadd.f32 %v3900_v37, %v8655_v55  ;;  %4430 = vmatpush.bf16.msra.mxu1 %v5912_v63 }
 0x5e3   : > { %3741 = vmatmul.bf16.gmra.mxu2 %v8707_v19  ;;  %3840 = vmatmul.bf16.gmra.mxu3 %v8701_v60  ;;  %v4078_v32 = vmax.f32 %v3799_v9, 0.0 }
 0x5e4   : > { %v4000_v42 = vadd.f32 %v3999_v21, %v3901_v0  ;;  %3939 = vmatmul.bf16.gmra.mxu0 %v8707_v19  ;;  %4038 = vmatmul.bf16.gmra.mxu1 %v8701_v60 }
 0x5e5   : > { %v4132_v16 = vadd.f32 %v4131_v17, %v4078_v32  ;;  %4417 = vmatpush.bf16.msra.mxu0 %v5848_v14  ;;  %v6327_v14 = vld [vmem:[#allocation20 + $0x14] sm:$0xf] }
 0x5e6   : > { %v4081_v1 = vmax.f32 %v4000_v42, 0.0  ;;  %v3702_v59 = vpop.f32.mrf.mxu2  ;;  %v3801_v18 = vpop.f32.mrf.mxu3 }
 0x5e7   : > { %v3703_v10 = vadd.f32 %v3702_v59, %v8665_v13 }
 0x5e8   : > { %v4168_v58 = vadd.f32 %v4167_v61, %v4081_v1 }
 0x5e9   : > { %v3802_v51 = vadd.f32 %v3801_v18, %v3703_v10  ;;  %v3902_v28 = vpop.f32.mrf.mxu0  ;;  %v4001_v36 = vpop.f32.mrf.mxu1 }
 0x5ea   : > { %v3903_v8 = vadd.f32 %v3902_v28, %v8655_v55 }
 0x5eb   : > { %v4080_v35 = vmax.f32 %v3802_v51, 0.0 }
 0x5ec   : > { %v4002_v57 = vadd.f32 %v4001_v36, %v3903_v8 }
 0x5ed   : > { %v4133_v47 = vadd.f32 %v4132_v16, %v4080_v35 }
 0x5ee   : > { %v4083_v43 = vmax.f32 %v4002_v57, 0.0  ;;  %v3704_v19 = vpop.f32.mrf.mxu2  ;;  %v3803_v41 = vpop.f32.mrf.mxu3 }
 0x5ef   : > { %v3705_v60 = vadd.f32 %v3704_v19, %v8665_v13 }
 0x5f0   : > { %v4169_v27 = vadd.f32 %v4168_v58, %v4083_v43 }
 0x5f1   : > { %v3804_v56 = vadd.f32 %v3803_v41, %v3705_v60  ;;  %v3905_v34 = vpop.f32.mrf.mxu0  ;;  %v4004_v23 = vpop.f32.mrf.mxu1 }
 0x5f2   : > { %v3906_v54 = vadd.f32 %v3905_v34, %v8655_v55 }
 0x5f3   : > { %v4082_v52 = vmax.f32 %v3804_v56, 0.0 }
 0x5f4   : > { %v4005_v46 = vadd.f32 %v4004_v23, %v3906_v54 }
 0x5f5   : > { %v4134_v29 = vadd.f32 %v4133_v47, %v4082_v52 }
 0x5f6   : > { %v4085_v30 = vmax.f32 %v4005_v46, 0.0  ;;  %v3707_v24 = vpop.f32.mrf.mxu2  ;;  %v3806_v44 = vpop.f32.mrf.mxu3 }
 0x5f7   : > { %v3708_v39 = vadd.f32 %v3707_v24, %v8665_v13 }
 0x5f8   : > { %v4170_v40 = vadd.f32 %v4169_v27, %v4085_v30  ;;  %v5899_v30 = vld [vmem:[#allocation20 + $0x90] sm:$0xf] }
 0x5f9   : > { %v3807_v20 = vadd.f32 %v3806_v44, %v3708_v39  ;;  %v3907_v22 = vpop.f32.mrf.mxu0  ;;  %v4006_v38 = vpop.f32.mrf.mxu1  ;;  %v5836_v39 = vor.u32 %v6328_v6, %v5835_v26 }
 0x5fa   : > { %v3908_v7 = vadd.f32 %v3907_v22, %v8655_v55 }
 0x5fb   : > { %v4084_v53 = vmax.f32 %v3807_v20, 0.0  ;;  %4392 = vmatpush.bf16.msrb.mxu2 %v5836_v39 }
 0x5fc   : > { %v4007_v33 = vadd.f32 %v4006_v38, %v3908_v7  ;;  %v5837_v7 = vld [vmem:[#allocation20 + $0x18] sm:$0xf0] }
 0x5fd   : > { %v4135_v5 = vadd.f32 %v4134_v29, %v4084_v53  ;;  %v6343_v53 = vld [vmem:[#allocation20 + $0x94] sm:$0xf]  ;;  %v5840_v11 = vor.u32 %v6327_v14, %v5837_v7 }
 0x5fe   : > { %v4087_v48 = vmax.f32 %v4007_v33, 0.0  ;;  %v3709_v12 = vpop.f32.mrf.mxu2  ;;  %v3808_v17 = vpop.f32.mrf.mxu3 }
 0x5ff   : > { %v3710_v4 = vadd.f32 %v3709_v12, %v8665_v13  ;;  %4418 = vmatpush.bf16.msra.mxu0 %v5840_v11 }
 0x600   : > { %v4171_v45 = vadd.f32 %v4170_v40, %v4087_v48  ;;  %v6344_v40 = vld [vmem:[#allocation20 + $0x94] sm:$0xf0]  ;;  %v5904_v48 = vor.u32 %v6343_v53, %v5901_v62 }
 0x601   : > { %v3809_v50 = vadd.f32 %v3808_v17, %v3710_v4  ;;  %v3910_v61 = vpop.f32.mrf.mxu0  ;;  %v4009_v37 = vpop.f32.mrf.mxu1  ;;  %v5900_v31 = vor.u32 %v6344_v40, %v5899_v30 }
 0x602   : > { %v3911_v21 = vadd.f32 %v3910_v61, %v8655_v55  ;;  %4431 = vmatpush.bf16.msra.mxu1 %v5904_v48 }
 0x603   : > { %v4086_v0 = vmax.f32 %v3809_v50, 0.0  ;;  %4405 = vmatpush.bf16.msrb.mxu3 %v5900_v31 }
 0x604   : > { %v4010_v9 = vadd.f32 %v4009_v37, %v3911_v21 }
 0x605   : > { %v4136_v42 = vadd.f32 %v4135_v5, %v4086_v0 }
 0x606   : > { %v4089_v1 = vmax.f32 %v4010_v9, 0.0  ;;  %v3712_v59 = vpop.f32.mrf.mxu2  ;;  %v3811_v18 = vpop.f32.mrf.mxu3  ;;  %v5827_v9 = vld [vmem:[#allocation20] sm:$0xf] }
 0x607   : > { %v3713_v32 = vadd.f32 %v3712_v59, %v8665_v13 }
 0x608   : > { %v4172_v10 = vadd.f32 %v4171_v45, %v4089_v1 }
 0x609   : > { %v3812_v58 = vadd.f32 %v3811_v18, %v3713_v32  ;;  %v3912_v51 = vpop.f32.mrf.mxu0  ;;  %v4011_v28 = vpop.f32.mrf.mxu1  ;;  %v5891_v32 = vld [vmem:[#allocation20 + $0x80] sm:$0xf] }
 0x60a   : > { %v3913_v36 = vadd.f32 %v3912_v51, %v8655_v55 }
 0x60b   : > { %v4088_v8 = vmax.f32 %v3812_v58, 0.0 }
 0x60c   : > { %v4012_v16 = vadd.f32 %v4011_v28, %v3913_v36  ;;  %v6325_v36 = vld [vmem:[#allocation20 + $0x4] sm:$0xf] }
 0x60d   : > { %v4137_v35 = vadd.f32 %v4136_v42, %v4088_v8  ;;  %v6326_v42 = vld [vmem:[#allocation20 + $0x4] sm:$0xf0]  ;;  %v5829_v8 = vld [vmem:[#allocation20 + $0x8] sm:$0xf0] }
 0x60e   : > { %v4091_v57 = vmax.f32 %v4012_v16, 0.0  ;;  %v3714_v47 = vpop.f32.mrf.mxu2  ;;  %v3813_v43 = vpop.f32.mrf.mxu3  ;;  %v5828_v18 = vor.u32 %v6326_v42, %v5827_v9 }
 0x60f   : > { %v3715_v19 = vadd.f32 %v3714_v47, %v8665_v13  ;;  %v6341_v47 = vld [vmem:[#allocation20 + $0x84] sm:$0xf] }
 0x610   : > { %v4173_v41 = vadd.f32 %v4172_v10, %v4091_v57  ;;  %4393 = vmatpush.bf16.msrb.mxu2 %v5828_v18  ;;  %v6342_v10 = vld [vmem:[#allocation20 + $0x84] sm:$0xf0]  ;;  %v5832_v57 = vor.u32 %v6325_v36, %v5829_v8  ;;  %v6385_v8 = vld [vmem:[#allocation22 + $0xe4] sm:$0xf] }
 0x611   : > { %v3814_v60 = vadd.f32 %v3813_v43, %v3715_v19  ;;  %v3915_v27 = vpop.f32.mrf.mxu0  ;;  %v4014_v2 = vpop.f32.mrf.mxu1  ;;  %v5892_v28 = vor.u32 %v6342_v10, %v5891_v32  ;;  %v5893_v43 = vld [vmem:[#allocation20 + $0x88] sm:$0xf0]  ;;  %v6386_v18 = vld [vmem:[#allocation22 + $0xe4] sm:$0xf0] }
 0x612   : > { %v3916_v3 = vadd.f32 %v3915_v27, %v8655_v55  ;;  %4419 = vmatpush.bf16.msra.mxu0 %v5832_v57 }
 0x613   : > { %v4090_v56 = vmax.f32 %v3814_v60, 0.0  ;;  %4406 = vmatpush.bf16.msrb.mxu3 %v5892_v28  ;;  %v5896_v60 = vor.u32 %v6341_v47, %v5893_v43  ;;  %v6372_v43 = vld [vmem:[#allocation22 + $0x74] sm:$0xf0] }
 0x614   : > { %v4015_v34 = vadd.f32 %v4014_v2, %v3916_v3 }
 0x615   : > { %v4138_v23 = vadd.f32 %v4137_v35, %v4090_v56  ;;  %4432 = vmatpush.bf16.msra.mxu1 %v5896_v60 }
 0x616   : > { %v4093_v15 = vmax.f32 %v4015_v34, 0.0  ;;  %v3717_v54 = vpop.f32.mrf.mxu2  ;;  %v3816_v52 = vpop.f32.mrf.mxu3 }
 0x617   : > { %v3718_v46 = vadd.f32 %v3717_v54, %v8665_v13 }
 0x618   : > { %v8776_v29 = vadd.f32 %v4173_v41, %v4093_v15 }
 0x619   : > { %v3817_v24 = vadd.f32 %v3816_v52, %v3718_v46  ;;  %v3917_v44 = vpop.f32.mrf.mxu0  ;;  %v4016_v25 = vpop.f32.mrf.mxu1 }
 0x61a   : > { %v3918_v3 = vadd.f32 %v3917_v44, %v8655_v55 }
 0x61b   : > { %v4092_v49 = vmax.f32 %v3817_v24, 0.0 }
 0x61c   : > { %v4017_v15 = vadd.f32 %v4016_v25, %v3918_v3 }
 0x61d   : > { %v8778_v20 = vadd.f32 %v4138_v23, %v4092_v49 }
 0x61e   : > { %v3719_v22 = vpop.f32.mrf.mxu2  ;;  %v3818_v38 = vpop.f32.mrf.mxu3  ;;  %v4095_v44 = vmax.f32 %v4017_v15, 0.0 }
 0x61f   : > { %v3720_v54 = vadd.f32 %v3719_v22, %v8665_v13 }
 0x621   : > { %v3920_v33 = vpop.f32.mrf.mxu0  ;;  %v4019_v5 = vpop.f32.mrf.mxu1  ;;  %v3819_v31 = vadd.f32 %v3818_v38, %v3720_v54  ;;  %v6013_v54 = vld [vmem:[#allocation22 + $0x78] sm:$0xf0] }
 0x622   : > { %v3921_v56 = vadd.f32 %v3920_v33, %v8655_v55 }
 0x624   : > { %v4020_v24 = vadd.f32 %v4019_v5, %v3921_v56  ;;  %v4175_v5 = vadd.f32 %v8776_v29, %v4095_v44 }
 0x626   : > { %v3722_v12 = vpop.f32.mrf.mxu2  ;;  %v3821_v17 = vpop.f32.mrf.mxu3  ;;  %v4097_v22 = vmax.f32 %v4020_v24, 0.0 }
 0x627   : > { %v3723_v52 = vadd.f32 %v3722_v12, %v8665_v13  ;;  %v4094_v12 = vmax.f32 %v3819_v31, 0.0  ;;  %v6061_v31 = vld [vmem:[#allocation22 + $0xd8] sm:$0xf0] }
 0x628   : > { %v4176_v9 = vadd.f32 %v4175_v5, %v4097_v22  ;;  %v6369_v5 = vld [vmem:[#allocation22 + $0x64] sm:$0xf] }
 0x629   : > { %v3922_v63 = vpop.f32.mrf.mxu0  ;;  %v4021_v4 = vpop.f32.mrf.mxu1  ;;  %v3822_v49 = vadd.f32 %v3821_v17, %v3723_v52  ;;  %v4140_v57 = vadd.f32 %v8778_v20, %v4094_v12  ;;  %v6059_v52 = vld [vmem:[#allocation22 + $0xd0] sm:$0xf] }
 0x62a   : > { %v3923_v46 = vadd.f32 %v3922_v63, %v8655_v55 }
 0x62b   : > { %v4096_v38 = vmax.f32 %v3822_v49, 0.0 }
 0x62c   : > { %v4022_v25 = vadd.f32 %v4021_v4, %v3923_v46 }
 0x62d   : > { %v4141_v49 = vadd.f32 %v4140_v57, %v4096_v38 }
 0x62e   : > { %v3724_v45 = vpop.f32.mrf.mxu2  ;;  %v3823_v50 = vpop.f32.mrf.mxu3  ;;  %v4099_v17 = vmax.f32 %v4022_v25, 0.0 }
 0x62f   : > { %v3725_v26 = vadd.f32 %v3724_v45, %v8665_v13 }
 0x630   : > { %v4177_v60 = vadd.f32 %v4176_v9, %v4099_v17  ;;  %v6005_v17 = vld [vmem:[#allocation22 + $0x68] sm:$0xf0] }
 0x631   : > { %v3925_v61 = vpop.f32.mrf.mxu0  ;;  %v4024_v37 = vpop.f32.mrf.mxu1  ;;  %v8804_v14 = vadd.f32 %v3823_v50, %v3725_v26  ;;  %v6075_v50 = vld [vmem:[#allocation22 + $0xf0] sm:$0xf] }
 0x632   : > { %v3926_v39 = vadd.f32 %v3925_v61, %v8655_v55  ;;  %v6388_v61 = vld [vmem:[#allocation22 + $0xf4] sm:$0xf0] }
 0x633   : > { %v4098_v63 = vmax.f32 %v8804_v14, 0.0  ;;  %v6076_v29 = vor.u32 %v6388_v61, %v6075_v50  ;;  %v6051_v50 = vld [vmem:[#allocation22 + $0xc0] sm:$0xf]  ;;  %v6382_v61 = vld [vmem:[#allocation22 + $0xc4] sm:$0xf0] }
 0x634   : > { %v4025_v62 = vadd.f32 %v4024_v37, %v3926_v39  ;;  %v6077_v37 = vld [vmem:[#allocation22 + $0xf8] sm:$0xf0]  ;;  %v6052_v14 = vor.u32 %v6382_v61, %v6051_v50 }
 0x635   : > { %4653 = vmatpush.bf16.msra.mxu3 %v6076_v29  ;;  %v6053_v29 = vld [vmem:[#allocation22 + $0xc8] sm:$0xf0] }
 0x636   : > { %v3727_v21 = vpop.f32.mrf.mxu2  ;;  %v3826_v0 = vpop.f32.mrf.mxu3  ;;  %v4101_v32 = vmax.f32 %v4025_v62, 0.0 }
 0x637   : > { %v3728_v40 = vadd.f32 %v3727_v21, %v8665_v13  ;;  %v6387_v21 = vld [vmem:[#allocation22 + $0xf4] sm:$0xf] }
 0x638   : > { %v6080_v36 = vor.u32 %v6387_v21, %v6077_v37  ;;  %v4142_v37 = vadd.f32 %v4141_v49, %v4098_v63 }
 0x639   : > { %v3927_v1 = vpop.f32.mrf.mxu0  ;;  %v4026_v59 = vpop.f32.mrf.mxu1  ;;  %v8813_v48 = vadd.f32 %v3826_v0, %v3728_v40  ;;  %v6067_v0 = vld [vmem:[#allocation22 + $0xe0] sm:$0xf]  ;;  %v6383_v40 = vld [vmem:[#allocation22 + $0xd4] sm:$0xf] }
 0x63a   : > { %v3928_v7 = vadd.f32 %v3927_v1, %v8655_v55  ;;  %v6068_v47 = vor.u32 %v6386_v18, %v6067_v0  ;;  %4679 = vmatpush.bf16.msrb.mxu1 %v6080_v36  ;;  %v6064_v9 = vor.u32 %v6383_v40, %v6061_v31 }
 0x63b   : > { %v4100_v10 = vmax.f32 %v8813_v48, 0.0 }
 0x63c   : > { %v8818_v42 = vadd.f32 %v4026_v59, %v3928_v7  ;;  %v6011_v59 = vld [vmem:[#allocation22 + $0x70] sm:$0xf]  ;;  %v6003_v7 = vld [vmem:[#allocation22 + $0x60] sm:$0xf]  ;;  %4654 = vmatpush.bf16.msra.mxu3 %v6068_v47 }
 0x63d   : > { %v6012_v15 = vor.u32 %v6372_v43, %v6011_v59 }
 0x63e   : > { %v8780_v58 = vpop.f32.mrf.mxu2  ;;  %v8782_v51 = vpop.f32.mrf.mxu3  ;;  %v4103_v46 = vmax.f32 %v8818_v42, 0.0  ;;  %v6008_v42 = vor.u32 %v6369_v5, %v6005_v17 }
 0x63f   : > { %v3730_v3 = vadd.f32 %v8780_v58, %v8665_v13  ;;  %v4178_v58 = vadd.f32 %v4177_v60, %v4101_v32  ;;  %4640 = vmatpush.bf16.msra.mxu2 %v6012_v15  ;;  %v6368_v32 = vld [vmem:[#allocation22 + $0x54] sm:$0xf0]  ;;  %v4143_v15 = vadd.f32 %v4142_v37, %v4100_v10  ;;  %v6045_v37 = vld [vmem:[#allocation22 + $0xb8] sm:$0xf0] }
 0x641   : > { %v3930_v16 = vpop.f32.mrf.mxu0  ;;  %v4029_v35 = vpop.f32.mrf.mxu1  ;;  %v3829_v38 = vadd.f32 %v8782_v51, %v3730_v3  ;;  %v6367_v51 = vld [vmem:[#allocation22 + $0x54] sm:$0xf]  ;;  %v4179_v36 = vadd.f32 %v4178_v58, %v4103_v46 }
 0x642   : > { %v3931_v53 = vadd.f32 %v3930_v16, %v8655_v55  ;;  %v6069_v16 = vld [vmem:[#allocation22 + $0xe8] sm:$0xf0] }
 0x643   : > { %v6072_v56 = vor.u32 %v6385_v8, %v6069_v16  ;;  %v4102_v63 = vmax.f32 %v3829_v38, 0.0 }
 0x644   : > { %v8820_v1 = vadd.f32 %v4029_v35, %v3931_v53  ;;  %v6371_v35 = vld [vmem:[#allocation22 + $0x74] sm:$0xf]  ;;  %v6370_v53 = vld [vmem:[#allocation22 + $0x64] sm:$0xf0] }
 0x645   : > { %v6016_v39 = vor.u32 %v6371_v35, %v6013_v54  ;;  %v6004_v12 = vor.u32 %v6370_v53, %v6003_v7  ;;  %4680 = vmatpush.bf16.msrb.mxu1 %v6072_v56  ;;  %v4144_v46 = vadd.f32 %v4143_v15, %v4102_v63  ;;  %v6364_v63 = vld [vmem:[#allocation22 + $0x34] sm:$0xf0]  ;;  %v6029_v15 = vld [vmem:[#allocation22 + $0x98] sm:$0xf0] }
 0x646   : > { %v8784_v19 = vpop.f32.mrf.mxu2  ;;  %v8786_v41 = vpop.f32.mrf.mxu3  ;;  %v4105_v26 = vmax.f32 %v8820_v1, 0.0  ;;  %v6381_v1 = vld [vmem:[#allocation22 + $0xc4] sm:$0xf] }
 0x647   : > { %v3733_v25 = vadd.f32 %v8784_v19, %v8665_v13  ;;  %4666 = vmatpush.bf16.msrb.mxu0 %v6016_v39  ;;  %4641 = vmatpush.bf16.msra.mxu2 %v6004_v12  ;;  %v6056_v35 = vor.u32 %v6381_v1, %v6053_v29  ;;  %v6380_v1 = vld [vmem:[#allocation22 + $0xb4] sm:$0xf0]  ;;  %v6379_v29 = vld [vmem:[#allocation22 + $0xb4] sm:$0xf] }
 0x649   : > { %v3932_v27 = vpop.f32.mrf.mxu0  ;;  %v8788_v2 = vpop.f32.mrf.mxu1  ;;  %4681 = vmatpush.bf16.msrb.mxu1 %v6064_v9 }
 0x64a   : > { %v3933_v28 = vadd.f32 %v3932_v27, %v8655_v55  ;;  %v6384_v27 = vld [vmem:[#allocation22 + $0xd4] sm:$0xf0] }
 0x64b   : > { %4667 = vmatpush.bf16.msrb.mxu0 %v6008_v42  ;;  %v6043_v42 = vld [vmem:[#allocation22 + $0xb0] sm:$0xf] }
 0x64c   : > { %v4032_v22 = vadd.f32 %v8788_v2, %v3933_v28  ;;  %v5997_v28 = vld [vmem:[#allocation22 + $0x58] sm:$0xf0] }
 0x64d   : > { %4682 = vmatpush.bf16.msrb.mxu1 %v6056_v35  ;;  %v5981_v35 = vld [vmem:[#allocation22 + $0x38] sm:$0xf0] }
 0x64e   : > { %v8792_v34 = vpop.f32.mrf.mxu2  ;;  %v8794_v23 = vpop.f32.mrf.mxu3  ;;  %v4107_v57 = vmax.f32 %v4032_v22, 0.0 }
 0x64f   : > { %v3735_v19 = vadd.f32 %v8792_v34, %v8665_v13  ;;  %v3832_v34 = vadd.f32 %v8786_v41, %v3733_v25  ;;  %v4180_v41 = vadd.f32 %v4179_v36, %v4105_v26  ;;  %v6035_v36 = vld [vmem:[#allocation22 + $0xa0] sm:$0xf] }
 0x651   : > { %v3935_v6 = vpop.f32.mrf.mxu0  ;;  %v8800_v30 = vpop.f32.mrf.mxu1  ;;  %v3834_v59 = vadd.f32 %v8794_v23, %v3735_v19 }
 0x652   : > { %v3936_v20 = vadd.f32 %v3935_v6, %v8655_v55  ;;  %v6060_v6 = vor.u32 %v6384_v27, %v6059_v52  ;;  %v4181_v27 = vadd.f32 %v4180_v41, %v4107_v57  ;;  %v6037_v57 = vld [vmem:[#allocation22 + $0xa8] sm:$0xf0]  ;;  %v6027_v41 = vld [vmem:[#allocation22 + $0x90] sm:$0xf] }
 0x654   : > { %v4035_v0 = vadd.f32 %v8800_v30, %v3936_v20  ;;  %4655 = vmatpush.bf16.msra.mxu3 %v6060_v6  ;;  %v6000_v30 = vor.u32 %v6367_v51, %v5997_v28  ;;  %v4106_v20 = vmax.f32 %v3834_v59, 0.0  ;;  %v6365_v51 = vld [vmem:[#allocation22 + $0x44] sm:$0xf]  ;;  %v5989_v28 = vld [vmem:[#allocation22 + $0x48] sm:$0xf0] }
 0x655   : > { %v6363_v59 = vld [vmem:[#allocation22 + $0x34] sm:$0xf] }
 0x656   : > { %v8808_v33 = vpop.f32.mrf.mxu2  ;;  %v8810_v11 = vpop.f32.mrf.mxu3  ;;  %v4109_v60 = vmax.f32 %v4035_v0, 0.0  ;;  %4668 = vmatpush.bf16.msrb.mxu0 %v6000_v30  ;;  %v5987_v0 = vld [vmem:[#allocation22 + $0x40] sm:$0xf]  ;;  %v5979_v30 = vld [vmem:[#allocation22 + $0x30] sm:$0xf] }
 0x657   : > { %v3738_v8 = vadd.f32 %v8808_v33, %v8665_v13 }
 0x658   : > { %4656 = vmatpush.bf16.msra.mxu3 %v6052_v14  ;;  %v4182_v39 = vadd.f32 %v4181_v27, %v4109_v60  ;;  %v6376_v60 = vld [vmem:[#allocation22 + $0x94] sm:$0xf0]  ;;  %v6361_v27 = vld [vmem:[#allocation22 + $0x24] sm:$0xf] }
 0x659   : > { %v3937_v4 = vpop.f32.mrf.mxu0  ;;  %v8816_v45 = vpop.f32.mrf.mxu1  ;;  %v3837_v54 = vadd.f32 %v8810_v11, %v3738_v8  ;;  %v6378_v8 = vld [vmem:[#allocation22 + $0xa4] sm:$0xf0] }
 0x65a   : > { %v3938_v62 = vadd.f32 %v3937_v4, %v8655_v55  ;;  %v5995_v4 = vld [vmem:[#allocation22 + $0x50] sm:$0xf] }
 0x65b   : > { %v5996_v16 = vor.u32 %v6368_v32, %v5995_v4  ;;  %v4108_v31 = vmax.f32 %v3837_v54, 0.0  ;;  %v6044_v4 = vor.u32 %v6380_v1, %v6043_v42 }
 0x65c   : > { %v4037_v47 = vadd.f32 %v8816_v45, %v3938_v62  ;;  %v4104_v45 = vmax.f32 %v3832_v34, 0.0  ;;  %v5992_v34 = vor.u32 %v6365_v51, %v5989_v28 }
 0x65d   : > { %4642 = vmatpush.bf16.msra.mxu2 %v5996_v16  ;;  %4657 = vmatpush.bf16.msra.mxu3 %v6044_v4  ;;  %v6377_v16 = vld [vmem:[#allocation22 + $0xa4] sm:$0xf] }
 0x65e   : > { %v3739_v24 = vpop.f32.mrf.mxu2  ;;  %v8830_v44 = vpop.f32.mrf.mxu3  ;;  %v4111_v23 = vmax.f32 %v4037_v47, 0.0  ;;  %v4145_v10 = vadd.f32 %v4144_v46, %v4104_v45  ;;  %v6036_v47 = vor.u32 %v6378_v8, %v6035_v36  ;;  %v6040_v14 = vor.u32 %v6377_v16, %v6037_v57  ;;  %4669 = vmatpush.bf16.msrb.mxu0 %v5992_v34  ;;  %v5971_v45 = vld [vmem:[#allocation22 + $0x20] sm:$0xf] }
 0x65f   : > { %v3740_v43 = vadd.f32 %v3739_v24, %v8665_v13 }
 0x660   : > { %v4183_v58 = vadd.f32 %v4182_v39, %v4111_v23  ;;  %v4146_v22 = vadd.f32 %v4145_v10, %v4106_v20  ;;  %v5973_v23 = vld [vmem:[#allocation22 + $0x28] sm:$0xf0]  ;;  %v6373_v39 = vld [vmem:[#allocation22 + $0x84] sm:$0xf]  ;;  %v5963_v10 = vld [vmem:[#allocation22 + $0x10] sm:$0xf] }
 0x661   : > { %v3940_v21 = vpop.f32.mrf.mxu0  ;;  %v4039_v2 = vpop.f32.mrf.mxu1  ;;  %v3839_v26 = vadd.f32 %v8830_v44, %v3740_v43  ;;  %4658 = vmatpush.bf16.msra.mxu3 %v6036_v47  ;;  %v5980_v43 = vor.u32 %v6364_v63, %v5979_v30  ;;  %v5976_v20 = vor.u32 %v6361_v27, %v5973_v23  ;;  %v6400_v47 = vld [vmem:[#allocation23 + $0x58] sm:$0xff]  ;;  %v6399_v30 = vld [vmem:[#allocation23 + $0x50] sm:$0xff] }
 0x662   : > { %v3941_v18 = vadd.f32 %v3940_v21, %v8655_v55  ;;  %v4147_v6 = vadd.f32 %v4146_v22, %v4108_v31  ;;  %v6360_v31 = vld [vmem:[#allocation22 + $0x14] sm:$0xf0]  ;;  %v5955_v22 = vld [vmem:[#allocation22] sm:$0xf] }
 0x663   : > { %v4110_v7 = vmax.f32 %v3839_v26, 0.0  ;;  %v6019_v26 = vld [vmem:[#allocation22 + $0x80] sm:$0xf]  ;;  %v6392_v63 = vld [vmem:[#allocation23 + $0x18] sm:$0xff] }
 0x664   : > { %v4040_v3 = vadd.f32 %v4039_v2, %v3941_v18  ;;  %v6048_v18 = vor.u32 %v6379_v29, %v6045_v37 }
 0x665   : > { %v4148_v61 = vadd.f32 %v4147_v6, %v4110_v7  ;;  %v6404_v6 = vld [vmem:[#allocation23 + $0x78] sm:$0xff] }
 0x666   : > { %v3742_v33 = vpop.f32.mrf.mxu2  ;;  %v3841_v56 = vpop.f32.mrf.mxu3  ;;  %v4113_v40 = vmax.f32 %v4040_v3, 0.0  ;;  %4683 = vmatpush.bf16.msrb.mxu1 %v6048_v18  ;;  %v5984_v3 = vor.u32 %v6363_v59, %v5981_v35  ;;  %v6398_v59 = vld [vmem:[#allocation23 + $0x48] sm:$0xff]  ;;  %v6397_v35 = vld [vmem:[#allocation23 + $0x40] sm:$0xff] }
 0x667   : > { %v3743_v52 = vadd.f32 %v3742_v33, %v8665_v13  ;;  %v6028_v33 = vor.u32 %v6376_v60, %v6027_v41  ;;  %v6390_v41 = vld [vmem:[#allocation23 + $0x8] sm:$0xff]  ;;  %v6389_v60 = vld [vmem:[#allocation23] sm:$0xff] }
 0x668   : > { %v4184_v53 = vadd.f32 %v4183_v58, %v4113_v40  ;;  %4670 = vmatpush.bf16.msrb.mxu0 %v5984_v3  ;;  %v6359_v58 = vld [vmem:[#allocation22 + $0x14] sm:$0xf] }
 0x669   : > { %v3942_v24 = vpop.f32.mrf.mxu0  ;;  %v3842_v11 = vadd.f32 %v3841_v56, %v3743_v52  ;;  %v4041_v49 = vpop.f32.mrf.mxu1  ;;  %v6375_v56 = vld [vmem:[#allocation22 + $0x94] sm:$0xf]  ;;  %v6362_v52 = vld [vmem:[#allocation22 + $0x24] sm:$0xf0]  ;;  %4659 = vmatpush.bf16.msra.mxu3 %v6028_v33  ;;  %v4474_v33 = vld [vmem:[%s8985_s17] sm:$0x3] }
 0x66a   : > { %v3943_v48 = vadd.f32 %v3942_v24, %v8655_v55  ;;  %4684 = vmatpush.bf16.msrb.mxu1 %v6040_v14  ;;  %v6032_v54 = vor.u32 %v6375_v56, %v6029_v15  ;;  %v5972_v46 = vor.u32 %v6362_v52, %v5971_v45  ;;  %v6374_v24 = vld [vmem:[#allocation22 + $0x84] sm:$0xf0]  ;;  %v6393_v14 = vld [vmem:[#allocation23 + $0x20] sm:$0xff]  ;;  %v4477_v56 = vperm.slane %v4474_v33, 1 }
 0x66b   : > { %v4112_v12 = vmax.f32 %v3842_v11, 0.0  ;;  %v6020_v40 = vor.u32 %v6374_v24, %v6019_v26  ;;  %v4476_v23 = vperm.slane %v4474_v33, 0 }
 0x66c   : > { %v4042_v25 = vadd.f32 %v4041_v49, %v3943_v48  ;;  %v6021_v48 = vld [vmem:[#allocation22 + $0x88] sm:$0xf0]  ;;  %4671 = vmatpush.bf16.msrb.mxu0 %v5976_v20  ;;  %v5964_v49 = vor.u32 %v6360_v31, %v5963_v10 }
 0x66d   : > { %v4149_v19 = vadd.f32 %v4148_v61, %v4112_v12  ;;  %v6024_v11 = vor.u32 %v6373_v39, %v6021_v48  ;;  %4660 = vmatpush.bf16.msra.mxu3 %v6020_v40  ;;  %v6402_v61 = vld [vmem:[#allocation23 + $0x68] sm:$0xff] }
 0x66e   : > { %v4115_v5 = vmax.f32 %v4042_v25, 0.0  ;;  %v3744_v62 = vpop.f32.mrf.mxu2  ;;  %v3843_v50 = vpop.f32.mrf.mxu3  ;;  %4685 = vmatpush.bf16.msrb.mxu1 %v6032_v54  ;;  %v5965_v25 = vld [vmem:[#allocation22 + $0x18] sm:$0xf0] }
 0x66f   : > { %v3745_v44 = vadd.f32 %v3744_v62, %v8665_v13  ;;  %v6366_v13 = vld [vmem:[#allocation22 + $0x44] sm:$0xf0]  ;;  %v5968_v7 = vor.u32 %v6359_v58, %v5965_v25  ;;  %v5957_v62 = vld [vmem:[#allocation22 + $0x8] sm:$0xf0] }
 0x670   : > { %v4185_v17 = vadd.f32 %v4184_v53, %v4115_v5  ;;  %v5988_v32 = vor.u32 %v6366_v13, %v5987_v0  ;;  %v6358_v53 = vld [vmem:[#allocation22 + $0x4] sm:$0xf0]  ;;  %v6357_v5 = vld [vmem:[#allocation22 + $0x4] sm:$0xf]  ;;  %v6585_v58 = vld [vmem:[%s8986_s25] ss:$0 sm:$0xff] }
 0x671   : > { %v3844_v38 = vadd.f32 %v3843_v50, %v3745_v44  ;;  %v5956_v12 = vor.u32 %v6358_v53, %v5955_v22  ;;  %4672 = vmatpush.bf16.msrb.mxu0 %v5968_v7  ;;  %v5960_v44 = vor.u32 %v6357_v5, %v5957_v62  ;;  %v6396_v50 = vld [vmem:[#allocation23 + $0x38] sm:$0xff] }
 0x672   : > { %v4187_v55 = vpack.c.bf16 %v4185_v17, %v4185_v17  ;;  %4643 = vmatpush.bf16.msra.mxu2 %v5988_v32  ;;  %4686 = vmatpush.bf16.msrb.mxu1 %v6024_v11  ;;  %v6403_v17 = vld [vmem:[#allocation23 + $0x70] sm:$0xff] }
 0x673   : > { %v4114_v21 = vmax.f32 %v3844_v38, 0.0  ;;  %v6395_v38 = vld [vmem:[#allocation23 + $0x30] sm:$0xff] }
 0x674   : > { %4407 = vmatmul.bf16.vlgmr.msrb.gmra.mxu3 %v4187_v55  ;;  %4433 = vmatmul.bf16.vlgmr.msra.gmra.mxu1 %v4187_v55  ;;  %v4220_v55 = vld [vmem:[%s8984_s26] sm:$0x3] }
 0x675   : > { %v4150_v2 = vadd.f32 %v4149_v19, %v4114_v21  ;;  %4841 = vmatpush.bf16.msrb.mxu3 %v6404_v6  ;;  %4673 = vmatpush.bf16.msrb.mxu0 %v5960_v44  ;;  %v6401_v21 = vld [vmem:[#allocation23 + $0x60] sm:$0xff]  ;;  %v4222_v0 = vperm.slane %v4220_v55, 0 }
 0x676   : > { %4644 = vmatpush.bf16.msra.mxu2 %v5980_v43  ;;  %v6391_v43 = vld [vmem:[#allocation23 + $0x10] sm:$0xff] }
 0x677   : > { %v4186_v9 = vpack.c.bf16 %v4150_v2, %v4150_v2  ;;  %v6394_v2 = vld [vmem:[#allocation23 + $0x28] sm:$0xff] }
 0x679   : > { %4394 = vmatmul.bf16.vlgmr.msrb.gmra.mxu2 %v4186_v9  ;;  %4420 = vmatmul.bf16.vlgmr.msra.gmra.mxu0 %v4186_v9  ;;  %v4223_v9 = vperm.slane %v4220_v55, 1 }
 0x67a   : > { %4645 = vmatpush.bf16.msra.mxu2 %v5972_v46  ;;  %4842 = vmatpush.bf16.msrb.mxu3 %v6403_v17 }
 0x67e   : > { %4646 = vmatpush.bf16.msra.mxu2 %v5964_v49  ;;  %4843 = vmatpush.bf16.msrb.mxu3 %v6402_v61 }
 0x682   : > { %4647 = vmatpush.bf16.msra.mxu2 %v5956_v12  ;;  %4844 = vmatpush.bf16.msrb.mxu3 %v6401_v21 }
 0x686   : > { %4828 = vmatpush.bf16.msrb.mxu2 %v6396_v50  ;;  %4845 = vmatpush.bf16.msrb.mxu3 %v6400_v47 }
 0x68a   : > { %4829 = vmatpush.bf16.msrb.mxu2 %v6395_v38  ;;  %4846 = vmatpush.bf16.msrb.mxu3 %v6399_v30 }
 0x68e   : > { %4830 = vmatpush.bf16.msrb.mxu2 %v6394_v2  ;;  %4847 = vmatpush.bf16.msrb.mxu3 %v6398_v59 }
 0x692   : > { %4831 = vmatpush.bf16.msrb.mxu2 %v6393_v14  ;;  %4848 = vmatpush.bf16.msrb.mxu3 %v6397_v35 }
 0x696   : > { %4832 = vmatpush.bf16.msrb.mxu2 %v6392_v63 }
 0x69a   : > { %4833 = vmatpush.bf16.msrb.mxu2 %v6391_v43 }
 0x69e   : > { %4834 = vmatpush.bf16.msrb.mxu2 %v6390_v41 }
 0x6a2   : > { %4835 = vmatpush.bf16.msrb.mxu2 %v6389_v60 }
 0x6f1   : > { %v4434_v19 = vpop.f32.mrf.mxu1 }
 0x6f6   : > { %v4421_v42 = vpop.f32.mrf.mxu0 }
 0x6f7   : > { %v4408_v1 = vpop.f32.mrf.mxu3  ;;  %v4422_v29 = vadd.f32 %v4421_v42, %v4223_v9 }
 0x6f9   : > { %v4435_v4 = vadd.f32 %v4434_v19, %v4422_v29  ;;  %v4436_v37 = vpop.f32.mrf.mxu1 }
 0x6fb   : > { %v4439_v13 = vmax.f32 %v4435_v4, 0.0 }
 0x6fc   : > { %v4395_v18 = vpop.f32.mrf.mxu2 }
 0x6fd   : > { %v4441_v32 = vpack.c.bf16 %v4439_v13, %v4439_v13  ;;  %v4396_v51 = vadd.f32 %v4395_v18, %v4222_v0 }
 0x6fe   : > { %v4423_v28 = vpop.f32.mrf.mxu0 }
 0x6ff   : > { %v4409_v36 = vadd.f32 %v4408_v1, %v4396_v51  ;;  %v4410_v34 = vpop.f32.mrf.mxu3  ;;  %4661 = vmatmul.bf16.vlgmr.msra.gmra.mxu3 %v4441_v32  ;;  %4687 = vmatmul.bf16.vlgmr.msrb.gmra.mxu1 %v4441_v32 }
 0x701   : > { %v4438_v8 = vmax.f32 %v4409_v36, 0.0 }
 0x703   : > { %v4440_v16 = vpack.c.bf16 %v4438_v8, %v4438_v8 }
 0x704   : > { %v4397_v57 = vpop.f32.mrf.mxu2 }
 0x705   : > { %4648 = vmatmul.bf16.vlgmr.msra.gmra.mxu2 %v4440_v16  ;;  %4674 = vmatmul.bf16.vlgmr.msrb.gmra.mxu0 %v4440_v16 }
 0x77c   : > { %v4688_v3 = vpop.f32.mrf.mxu1 }
 0x782   : > { %v4662_v15 = vpop.f32.mrf.mxu3  ;;  %v4675_v45 = vpop.f32.mrf.mxu0 }
 0x783   : > { %v4676_v54 = vadd.f32 %v4675_v45, %v4477_v56 }
 0x784   : > { %v4690_v52 = vpop.f32.mrf.mxu1 }
 0x785   : > { %v4689_v27 = vadd.f32 %v4688_v3, %v4676_v54 }
 0x787   : > { %v4693_v46 = vmax.f32 %v4689_v27, 0.0 }
 0x788   : > { %v4649_v20 = vpop.f32.mrf.mxu2 }
 0x789   : > { %v4695_v26 = vpack.c.bf16 %v4693_v46, %v4693_v46  ;;  %v4650_v24 = vadd.f32 %v4649_v20, %v4476_v23 }
 0x78a   : > { %v4664_v39 = vpop.f32.mrf.mxu3  ;;  %v4677_v40 = vpop.f32.mrf.mxu0 }
 0x78b   : > { %v4663_v48 = vadd.f32 %v4662_v15, %v4650_v24  ;;  %4849 = vmatmul.bf16.vlgmr.msrb.gmra.mxu3 %v4695_v26 }
 0x78d   : > { %v4692_v10 = vmax.f32 %v4663_v48, 0.0 }
 0x78f   : > { %v4694_v31 = vpack.c.bf16 %v4692_v10, %v4692_v10 }
 0x790   : > { %v4651_v11 = vpop.f32.mrf.mxu2 }
 0x791   : > { %4836 = vmatmul.bf16.vlgmr.msrb.gmra.mxu2 %v4694_v31 }
 0x80e   : > { %v4850_v49 = vpop.f32.mrf.mxu3 }
 0x814   : > { %v4837_v25 = vpop.f32.mrf.mxu2 }
 0x815   : > { %v4838_v22 = vadd.f32 %v6585_v58, %v4837_v25 }
 0x816   : > { %v4852_v7 = vpop.f32.mrf.mxu3 }
 0x817   : > { %v4851_v53 = vadd.f32 %v4850_v49, %v4838_v22 }
 0x819   : > { %4854 = vmax.xlane.f32.xlu0 %v4851_v53 }
 0x81c   : > { %v4839_v5 = vpop.f32.mrf.mxu2 }
 0x88c   : > { %v4855_v62 = vpop.xlane.xlu0 %4854 }
 0x88d   : > { %v4856_v6 = vsub.f32 %v4851_v53, %v4855_v62 }
 0x88f   : > { %v4857_v12 = vmul.f32 1.442695, %v4856_v6 }
 0x891   : > { %6586 = vpow2.f32 %v4857_v12 }
 0x897   : > { %v6587_v44 = vpop.eup %6586 }
 0x898   : > { %4859 = vadd.xlane.f32.xlu0 %v6587_v44 }
 0x90b   : > { %v4860_v17 = vpop.xlane.xlu0 %4859 }
 0x90c   : > { %6588 = vlog2.f32 %v4860_v17 }
 0x912   : > { %v6589_v50 = vpop.eup %6588 }
 0x913   : > { %v4862_v61 = vmul.f32 0.6931472, %v6589_v50 }
 0x915   : > { %v4863_v38 = vsub.f32 %v4856_v6, %v4862_v61 }
 0x917   : > { %4864 = vst [vmem:[%s937_s1] sm:$0xff] %v4863_v38 }
 0x918   : > { %7037 = shalt.err (!%p7034_p8)
}
 0x919   : > { %6459 = dma.vmem_to_hbm [thread:$0]  (%p7400_p4), %s4879_s7, 128, %s4881_s14, %s4866_s16  }
 0x91a PF: > { %s4892_s18 = sand.u32 1, %s7096_s3   ;;  %p8988_p10 = scmp.ge.s32.totalorder %s7108_s30, 2 }
 0x91b   : > { %s4893_s29 = scalar_lea.sflag [#allocation4], %s4892_s18 }
 0x91c   : > { %p6506_p11 = pnand %p8988_p10, %p7404_p6 }
 0x91e   : > { %p6507_p13 = pneg %p6506_p11 }
 0x920   : > { %7091 = dma.done.wait (%p6507_p13), %s4893_s29, 128  }
 0x921   : > { %7093 = vsyncadd (%p6507_p13), %s4893_s29, 4294967168  ;;  %s8989_s11 = sld [smem:[#allocation36_spill]]  ;;  %p44_p0 = scmp.ge.s32.totalorder %s7376_s23, 4  }
 0x922   : > { %s8990_s29 = sld [smem:[#allocation37_spill]]  ;;  %s8991_s3 = smov %s7100_s28 }
 0x923   : > { %s8993_s30 = smov %s7376_s23  ;;  %46 = sbr.rel (!%p44_p0) target bundleno = 36 (0x24), region = 214 }
 0x927   : > { %s8992_s28 = smov %s8989_s11 }
 0x928   :  { %4899 = vsyncpa [#allocation3], 1 }
 0x929   :  { %4901 = vsyncpa [#allocation3 + $0x1], 1 }
 0x92a   :  { %4902 = vsyncpa [#allocation6], 1 }
 0x92b   :  { %4904 = vsyncpa [#allocation6 + $0x1], 1 }
 0x92c   :  { %4905 = vsyncpa [#allocation9], 1 }
 0x92d   :  { %4906 = vsyncpa [#allocation12], 1 }
 0x92e   :  { %4907 = vsyncpa [#allocation15], 1 }
 0x92f   :  { %4908 = vsyncpa [#allocation18], 1 }
 0x930   :  { %4909 = vsyncpa [#allocation21], 1 }
 0x931   :  { %4910 = vsyncpa [#allocation24], 1 }
 0x932   :  { %4911 = vsyncpa [#allocation4], 1 }
 0x933   :  { %4913 = vsyncpa [#allocation4 + $0x1], 1 }

</bundles_post_ra>
